<compile_context>
chip_gen: v7x
topology: tpu7x:2x2x1
jax: 0.10.0
libtpu: 0.0.40
codegen_flags: <defaults>
</compile_context>

<pallas_src>
import math

import jax
import jax.numpy as jnp
from jax.experimental import pallas as pl
from jax.experimental.pallas import tpu as pltpu


def _rup(n, m):
    return ((n + m - 1) // m) * m


def _pick_th(ho, wo_pad, n_batch, target_rows=1024):
    """Largest divisor of `ho` keeping the matmul M-tile (th*wo_pad) <= target,
    while keeping at least 2 grid steps total (v7x megacore balance)."""
    divs = [d for d in range(1, ho + 1) if ho % d == 0]
    cands = [d for d in divs if d * wo_pad <= target_rows] or [1]
    th = max(cands)
    if n_batch * (ho // th) < 2:
        alt = [d for d in cands if (ho // d) >= 2]
        if alt:
            th = max(alt)
    return th


def _make_kernel(n_slabs, taps, apply_gdn, TH, Wo_pad, K, Cout):
    """Fused conv (+bias) (+GDN) tile kernel.

    refs = slabs (n_slabs) + [w, bias] (+ [gamma, beta]) + [out] + [acc scratch]
    slab ref:  (TH+halo, Wo_pad, K)  bf16
    w ref:     (n_taps, K, Cout)     bf16
    bias ref:  (1, Cout)             f32
    gamma ref: (Cout, Cout)          bf16
    beta ref:  (1, Cout)             f32
    out ref:   (TH, Wo_pad, Cout)
    acc ref:   (MR, Cout)            f32 VMEM scratch
    """
    MR = TH * Wo_pad

    def kernel(*refs):
        slab_refs = refs[:n_slabs]
        w_ref = refs[n_slabs]
        b_ref = refs[n_slabs + 1]
        if apply_gdn:
            g_ref, bt_ref = refs[n_slabs + 2], refs[n_slabs + 3]
            o_ref, acc_ref = refs[n_slabs + 4], refs[n_slabs + 5]
        else:
            o_ref, acc_ref = refs[n_slabs + 2], refs[n_slabs + 3]

        # Tap accumulation: each row tap is one bf16 MXU matmul with in-place
        # f32 accumulation in the VMEM scratch (first tap writes, rest add).
        for t, (sidx, di) in enumerate(taps):
            xs = slab_refs[sidx][pl.ds(di, TH), :, :]          # (TH, Wo_pad, K)
            part = jnp.dot(xs.reshape(MR, K), w_ref[t],
                           preferred_element_type=jnp.float32)
            if t == 0:
                acc_ref[...] = part
            else:
                acc_ref[...] += part

        y = acc_ref[...] + b_ref[...]                          # f32 (MR, Cout)
        if apply_gdn:
            # GDN epilogue: y / sqrt(beta + (y*y) @ gamma).
            # Norm matmul in bf16 on the MXU; add + rsqrt stay in f32 (EUP).
            norm = jnp.dot((y * y).astype(jnp.bfloat16), g_ref[...],
                           preferred_element_type=jnp.float32) + bt_ref[...]
            y = y * jax.lax.rsqrt(norm)
        o_ref[...] = y.reshape(TH, Wo_pad, Cout).astype(o_ref.dtype)

    return kernel


def conv_gdn_layer(x, w, b, gamma=None, beta=None, out_dtype=jnp.bfloat16,
                   target_rows=1024):
    """Fused 5x5 stride-2 conv (+bias, optional GDN).

    x: (N, H, W, Cin) real channels.  w: (5, 5, Cin, Cout) f32.  b: (Cout,).
    gamma: (Cout, Cout) or None.  beta: (Cout,) or None.
    Returns (N, Ho, Wo, Cout) real channels in out_dtype.
    """
    N, H, W, Cin = x.shape
    Cout = w.shape[-1]
    Cout_pad = _rup(Cout, 128)
    Ho, Wo = (H + 1) // 2, (W + 1) // 2
    Wo_pad = _rup(Wo, 16)                      # bf16-sublane-friendly width

    TH = _pick_th(Ho, Wo_pad, N, target_rows)
    NRB = Ho // TH
    MR = TH * Wo_pad
    apply_gdn = gamma is not None

    # Zero-padded bf16 input (halo of 2 on each side, rounded up).
    Hp, Wp = 2 * (Ho + 2), 2 * (Wo_pad + 2)
    xq = x.astype(jnp.bfloat16)
    xp = jnp.pad(xq, ((0, 0), (2, Hp - H - 2), (2, Wp - W - 2), (0, 0)))

    full_im2col = (25 * Cin <= 256)            # layer 1 (tiny Cin) only
    if full_im2col:
        # Pack all 25 taps x Cin into one contraction axis -> 1 matmul / tile.
        Kc, halo = 25 * Cin, 0
        K = _rup(Kc, 128)
        blocks = []
        for rb in range(NRB):
            r0 = rb * TH
            cols = [xp[:, 2 * r0 + i: 2 * (r0 + TH) + i: 2,
                       j: j + 2 * Wo_pad: 2, :]
                    for i in range(5) for j in range(5)]
            blocks.append(jnp.concatenate(cols, axis=-1))
        slab = jnp.stack(blocks, axis=1)       # (N, NRB, TH, Wo_pad, 25*Cin)
        slabs = [jnp.pad(slab, ((0, 0),) * 4 + ((0, K - Kc),))]
        taps = [(0, 0)]
        w_k = w.reshape(1, Kc, Cout)           # (i,j,c)-major flatten
    else:
        # Two row-phase slabs; 5 column taps concatenated along channels.
        Kc, halo = 5 * Cin, 2
        K = _rup(Kc, 128)
        slabs = []
        for p in (0, 1):
            blocks = []
            for rb in range(NRB):
                r0 = rb * TH
                cols = [xp[:, 2 * r0 + p: 2 * (r0 + TH + 2) + p: 2,
                           j: j + 2 * Wo_pad: 2, :]
                        for j in range(5)]
                blocks.append(jnp.concatenate(cols, axis=-1))
            slab = jnp.stack(blocks, axis=1)   # (N, NRB, TH+2, Wo_pad, 5*Cin)
            slabs.append(jnp.pad(slab, ((0, 0),) * 4 + ((0, K - Kc),)))
        taps = [(i % 2, i // 2) for i in range(5)]   # (phase, row offset)
        w_k = w.reshape(5, Kc, Cout)           # (j,c) flatten per row tap
    n_taps = len(taps)

    w_k = jnp.pad(w_k, ((0, 0), (0, K - Kc), (0, Cout_pad - Cout)))
    w_k = w_k.astype(jnp.bfloat16)
    b_pad = jnp.pad(b, (0, Cout_pad - Cout)).reshape(1, Cout_pad).astype(jnp.float32)

    kernel = _make_kernel(len(slabs), taps, apply_gdn, TH, Wo_pad, K, Cout_pad)

    slab_spec = pl.BlockSpec((None, None, TH + halo, Wo_pad, K),
                             lambda n, rb: (n, rb, 0, 0, 0))
    in_specs = [slab_spec] * len(slabs) + [
        pl.BlockSpec((n_taps, K, Cout_pad), lambda n, rb: (0, 0, 0)),
        pl.BlockSpec((1, Cout_pad), lambda n, rb: (0, 0)),
    ]
    args = list(slabs) + [w_k, b_pad]
    if apply_gdn:
        g_pad = jnp.pad(gamma, ((0, Cout_pad - Cout), (0, Cout_pad - Cout)))
        bt_pad = jnp.pad(beta, (0, Cout_pad - Cout), constant_values=1.0)
        in_specs += [pl.BlockSpec((Cout_pad, Cout_pad), lambda n, rb: (0, 0)),
                     pl.BlockSpec((1, Cout_pad), lambda n, rb: (0, 0))]
        args += [g_pad.astype(jnp.bfloat16),
                 bt_pad.reshape(1, Cout_pad).astype(jnp.float32)]

    # Advisory cost estimate so XLA schedules the surrounding ops sensibly.
    flops = 2 * N * Ho * Wo_pad * K * Cout_pad * n_taps
    trans = 0
    if apply_gdn:
        flops += 2 * N * Ho * Wo_pad * Cout_pad * Cout_pad
        trans = N * Ho * Wo_pad * Cout_pad
    bytes_acc = (sum(int(a.size) * a.dtype.itemsize for a in args)
                 + N * Ho * Wo_pad * Cout_pad * jnp.dtype(out_dtype).itemsize)
    cost = pl.CostEstimate(flops=flops, transcendentals=trans,
                           bytes_accessed=bytes_acc)

    out = pl.pallas_call(
        kernel,
        out_shape=jax.ShapeDtypeStruct((N, Ho, Wo_pad, Cout_pad), out_dtype),
        grid=(N, NRB),
        in_specs=in_specs,
        out_specs=pl.BlockSpec((None, TH, Wo_pad, Cout_pad),
                               lambda n, rb: (n, rb, 0, 0)),
        scratch_shapes=[pltpu.VMEM((MR, Cout_pad), jnp.float32)],
        compiler_params=pltpu.CompilerParams(
            dimension_semantics=("parallel", "parallel"),
            vmem_limit_bytes=48 * 1024 * 1024),
        cost_estimate=cost,
    )(*args)
    # Padded columns hold post-GDN garbage and padded channels are zero-fill:
    # slice both off before handing the activation to the next layer.
    return out[:, :, :Wo, :Cout]


# --------------------------- encoder forward pass ---------------------------

@jax.jit
def encoder_forward(x_nchw, params):
    x = jnp.transpose(x_nchw, (0, 2, 3, 1))                  # NCHW -> NHWC
    for i in range(1, 5):
        w, b = params[f"w{i}"], params[f"b{i}"]
        if i < 4:                                            # cov1..3 + GDN
            x = conv_gdn_layer(x, w, b, params[f"gamma{i}"], params[f"beta{i}"],
                               out_dtype=jnp.bfloat16)
        else:                                                # cov4, no GDN
            x = conv_gdn_layer(x, w, b, out_dtype=jnp.float32)
    return jnp.transpose(x, (0, 3, 1, 2))                    # NHWC -> NCHW


def encoder_reference(x_nchw, params):
    """Pure-JAX reference mirroring the kernel's numerics (bf16 conv inputs,
    f32 accumulation, bf16 GDN norm matmul)."""
    x = jnp.transpose(x_nchw, (0, 2, 3, 1))
    for i in range(1, 5):
        y = jax.lax.conv_general_dilated(
            x.astype(jnp.bfloat16), params[f"w{i}"].astype(jnp.bfloat16),
            window_strides=(2, 2), padding=[(2, 2), (2, 2)],
            dimension_numbers=("NHWC", "HWIO", "NHWC"),
            preferred_element_type=jnp.float32) + params[f"b{i}"]
        if i < 4:
            norm = params[f"beta{i}"] + jnp.einsum(
                "nhwc,cd->nhwd", (y * y).astype(jnp.bfloat16),
                params[f"gamma{i}"].astype(jnp.bfloat16),
                preferred_element_type=jnp.float32)
            y = y * jax.lax.rsqrt(norm)
            y = y.astype(jnp.bfloat16)          # inter-layer bf16, like kernel
        x = y
    return jnp.transpose(x, (0, 3, 1, 2)).astype(jnp.float32)


# ------------------------------ parameter init -------------------------------

def _xavier_normal(key, kh, kw, cin, cout, gain):
    fan_in, fan_out = cin * kh * kw, cout * kh * kw
    std = gain * math.sqrt(2.0 / (fan_in + fan_out))
    return std * jax.random.normal(key, (kh, kw, cin, cout), jnp.float32)


def init_params(key, input_channels=3, medium_channels=32, output_channels=64):
    ks = jax.random.split(key, 8)
    gain1 = math.sqrt(2 * (3 + medium_channels) / 6)  # matches the module's cov1 gain
    params = {
        "w1": _xavier_normal(ks[0], 5, 5, input_channels, medium_channels, gain1),
        "b1": jnp.full((medium_channels,), 0.01, jnp.float32),
        "w2": _xavier_normal(ks[1], 5, 5, medium_channels, medium_channels, math.sqrt(2)),
        "b2": jnp.full((medium_channels,), 0.01, jnp.float32),
        "w3": _xavier_normal(ks[2], 5, 5, medium_channels, medium_channels, math.sqrt(2)),
        "w4": _xavier_normal(ks[3], 5, 5, medium_channels, output_channels, math.sqrt(2)),
    }
    # cov3/cov4 biases keep PyTorch's default Conv2d bias init (uniform +-1/sqrt(fan_in)).
    for name, cin, cout, k in (("b3", medium_channels, medium_channels, ks[4]),
                               ("b4", medium_channels, output_channels, ks[5])):
        bound = 1.0 / math.sqrt(cin * 25)
        params[name] = jax.random.uniform(k, (cout,), jnp.float32, -bound, bound)
    # GDN parameters (standard init: beta = 1, gamma = 0.1 * I).
    for i in range(1, 4):
        params[f"beta{i}"] = jnp.ones((medium_channels,), jnp.float32)
        params[f"gamma{i}"] = 0.1 * jnp.eye(medium_channels, dtype=jnp.float32)
    return params


# ----------------------------------- main ------------------------------------

if __name__ == "__main__":
    key = jax.random.PRNGKey(0)
    k_x, k_p = jax.random.split(key)

    N, Cin, H, W = 2, 3, 16, 16
    Cmed, Cout = 32, 64  # small stand-ins for medium=192 / output=384

    x = jax.random.normal(k_x, (N, Cin, H, W), jnp.float32)
    params = init_params(k_p, Cin, Cmed, Cout)

    out = jax.block_until_ready(encoder_forward(x, params))
    assert out.shape == (N, Cout, H // 16, W // 16), out.shape

    ref = jax.block_until_ready(encoder_reference(x, params))
    max_err = float(jnp.max(jnp.abs(out - ref)))
    assert jnp.allclose(out, ref, atol=2e-2, rtol=2e-2), max_err

    print("KERNEL_OK")
</pallas_src>

<mosaic_0001>
module attributes {stable_mosaic.version = 11 : i64} {
  func.func @kernel(%arg0: i32, %arg1: i32, %arg2: memref<1x1x8x16x128xbf16, #tpu.memory_space<vmem>>, %arg3: memref<1x128x128xbf16, #tpu.memory_space<vmem>>, %arg4: memref<1x128xf32, #tpu.memory_space<vmem>>, %arg5: memref<128x128xbf16, #tpu.memory_space<vmem>>, %arg6: memref<1x128xf32, #tpu.memory_space<vmem>>, %arg7: memref<1x8x16x128xbf16, #tpu.memory_space<vmem>>, %arg8: memref<128x128xf32, #tpu.memory_space<vmem>>) attributes {dimension_semantics = [#tpu.dimension_semantics<parallel>, #tpu.dimension_semantics<parallel>], iteration_bounds = array<i64: 2, 1>, scalar_prefetch = 0 : i64, scratch_operands = 1 : i64, tpu.core_type = #tpu.core_type<tc>, window_params = [{transform_indices = @transform_0, window_bounds = array<i64: 1, 1, 8, 16, 128>}, {pipeline_mode = #tpu.pipeline_mode<synchronous>, transform_indices = @transform_1, window_bounds = array<i64: 1, 128, 128>}, {pipeline_mode = #tpu.pipeline_mode<synchronous>, transform_indices = @transform_2, window_bounds = array<i64: 1, 128>}, {pipeline_mode = #tpu.pipeline_mode<synchronous>, transform_indices = @transform_3, window_bounds = array<i64: 128, 128>}, {pipeline_mode = #tpu.pipeline_mode<synchronous>, transform_indices = @transform_4, window_bounds = array<i64: 1, 128>}, {transform_indices = @transform_5, window_bounds = array<i64: 1, 8, 16, 128>}]} {
    %c0 = arith.constant 0 : index
    %c0_0 = arith.constant 0 : index
    %c0_1 = arith.constant 0 : index
    %c0_2 = arith.constant 0 : index
    %c0_3 = arith.constant 0 : index
    %0 = vector.load %arg2[%c0, %c0_0, %c0_1, %c0_2, %c0_3] : memref<1x1x8x16x128xbf16, #tpu.memory_space<vmem>>, vector<1x1x8x16x128xbf16>
    %1 = vector.shape_cast %0 : vector<1x1x8x16x128xbf16> to vector<8x16x128xbf16>
    %2 = vector.shape_cast %1 : vector<8x16x128xbf16> to vector<128x128xbf16>
    %c0_4 = arith.constant 0 : index
    %c0_5 = arith.constant 0 : index
    %c0_6 = arith.constant 0 : index
    %3 = vector.load %arg3[%c0_4, %c0_5, %c0_6] : memref<1x128x128xbf16, #tpu.memory_space<vmem>>, vector<1x128x128xbf16>
    %4 = vector.shape_cast %3 : vector<1x128x128xbf16> to vector<128x128xbf16>
    %cst = arith.constant dense<0.000000e+00> : vector<128x128xf32>
    %5 = tpu.matmul %2, %4, %cst {dimension_numbers = #tpu.dot_dimension_numbers<[1], [0], [0], [1], [0, 0, 1, 1], [], []>} : vector<128x128xbf16>, vector<128x128xbf16>, vector<128x128xf32> -> vector<128x128xf32>
    %c0_7 = arith.constant 0 : index
    %c0_8 = arith.constant 0 : index
    %6 = vector.load %arg8[%c0_7, %c0_8] : memref<128x128xf32, #tpu.memory_space<vmem>>, vector<128x128xf32>
    tpu.vector_store %arg8[%c0_7, %c0_8], %5 {strides = array<i32>} : memref<128x128xf32, #tpu.memory_space<vmem>>, vector<128x128xf32>,
    %c0_9 = arith.constant 0 : index
    %c0_10 = arith.constant 0 : index
    %7 = vector.load %arg8[%c0_9, %c0_10] : memref<128x128xf32, #tpu.memory_space<vmem>>, vector<128x128xf32>
    %c0_11 = arith.constant 0 : index
    %c0_12 = arith.constant 0 : index
    %8 = vector.load %arg4[%c0_11, %c0_12] : memref<1x128xf32, #tpu.memory_space<vmem>>, vector<1x128xf32>
    %9 = vector.broadcast %8 : vector<1x128xf32> to vector<128x128xf32>
    %10 = arith.addf %7, %9 : vector<128x128xf32>
    %11 = arith.mulf %10, %10 : vector<128x128xf32>
    %12 = arith.truncf %11 : vector<128x128xf32> to vector<128x128xbf16>
    %c0_13 = arith.constant 0 : index
    %c0_14 = arith.constant 0 : index
    %13 = vector.load %arg5[%c0_13, %c0_14] : memref<128x128xbf16, #tpu.memory_space<vmem>>, vector<128x128xbf16>
    %cst_15 = arith.constant dense<0.000000e+00> : vector<128x128xf32>
    %14 = tpu.matmul %12, %13, %cst_15 {dimension_numbers = #tpu.dot_dimension_numbers<[1], [0], [0], [1], [0, 0, 1, 1], [], []>} : vector<128x128xbf16>, vector<128x128xbf16>, vector<128x128xf32> -> vector<128x128xf32>
    %c0_16 = arith.constant 0 : index
    %c0_17 = arith.constant 0 : index
    %15 = vector.load %arg6[%c0_16, %c0_17] : memref<1x128xf32, #tpu.memory_space<vmem>>, vector<1x128xf32>
    %16 = vector.broadcast %15 : vector<1x128xf32> to vector<128x128xf32>
    %17 = arith.addf %14, %16 : vector<128x128xf32>
    %18 = math.rsqrt %17 : vector<128x128xf32>
    %19 = arith.mulf %10, %18 : vector<128x128xf32>
    %20 = vector.shape_cast %19 : vector<128x128xf32> to vector<8x16x128xf32>
    %21 = arith.truncf %20 : vector<8x16x128xf32> to vector<8x16x128xbf16>
    %c0_18 = arith.constant 0 : index
    %c0_19 = arith.constant 0 : index
    %c0_20 = arith.constant 0 : index
    %c0_21 = arith.constant 0 : index
    %22 = vector.load %arg7[%c0_18, %c0_19, %c0_20, %c0_21] : memref<1x8x16x128xbf16, #tpu.memory_space<vmem>>, vector<1x8x16x128xbf16>
    %23 = vector.shape_cast %22 : vector<1x8x16x128xbf16> to vector<8x16x128xbf16>
    %24 = vector.shape_cast %21 : vector<8x16x128xbf16> to vector<1x8x16x128xbf16>
    tpu.vector_store %arg7[%c0_18, %c0_19, %c0_20, %c0_21], %24 {strides = array<i32>} : memref<1x8x16x128xbf16, #tpu.memory_space<vmem>>, vector<1x8x16x128xbf16>,
    return
  }
  func.func @transform_0(%arg0: i32, %arg1: i32) -> (i32, i32, i32, i32, i32) {
    %c0_i32 = arith.constant 0 : i32
    %c0_i32_0 = arith.constant 0 : i32
    %c0_i32_1 = arith.constant 0 : i32
    %c0_i32_2 = arith.constant 0 : i32
    return %arg0, %arg1, %c0_i32, %c0_i32_0, %c0_i32_1 : i32, i32, i32, i32, i32
  }
  func.func @transform_1(%arg0: i32, %arg1: i32) -> (i32, i32, i32) {
    %c0_i32 = arith.constant 0 : i32
    %c0_i32_0 = arith.constant 0 : i32
    %c0_i32_1 = arith.constant 0 : i32
    %c0_i32_2 = arith.constant 0 : i32
    return %c0_i32, %c0_i32_0, %c0_i32_1 : i32, i32, i32
  }
  func.func @transform_2(%arg0: i32, %arg1: i32) -> (i32, i32) {
    %c0_i32 = arith.constant 0 : i32
    %c0_i32_0 = arith.constant 0 : i32
    %c0_i32_1 = arith.constant 0 : i32
    return %c0_i32, %c0_i32_0 : i32, i32
  }
  func.func @transform_3(%arg0: i32, %arg1: i32) -> (i32, i32) {
    %c0_i32 = arith.constant 0 : i32
    %c0_i32_0 = arith.constant 0 : i32
    %c0_i32_1 = arith.constant 0 : i32
    return %c0_i32, %c0_i32_0 : i32, i32
  }
  func.func @transform_4(%arg0: i32, %arg1: i32) -> (i32, i32) {
    %c0_i32 = arith.constant 0 : i32
    %c0_i32_0 = arith.constant 0 : i32
    %c0_i32_1 = arith.constant 0 : i32
    return %c0_i32, %c0_i32_0 : i32, i32
  }
  func.func @transform_5(%arg0: i32, %arg1: i32) -> (i32, i32, i32, i32) {
    %c0_i32 = arith.constant 0 : i32
    %c0_i32_0 = arith.constant 0 : i32
    %c0_i32_1 = arith.constant 0 : i32
    return %arg0, %arg1, %c0_i32, %c0_i32_0 : i32, i32, i32, i32
  }
}

module attributes {stable_mosaic.version = 11 : i64} {
  func.func @kernel(%arg0: i32, %arg1: i32, %arg2: memref<1x1x6x16x256xbf16, #tpu.memory_space<vmem>>, %arg3: memref<1x1x6x16x256xbf16, #tpu.memory_space<vmem>>, %arg4: memref<5x256x128xbf16, #tpu.memory_space<vmem>>, %arg5: memref<1x128xf32, #tpu.memory_space<vmem>>, %arg6: memref<128x128xbf16, #tpu.memory_space<vmem>>, %arg7: memref<1x128xf32, #tpu.memory_space<vmem>>, %arg8: memref<1x4x16x128xbf16, #tpu.memory_space<vmem>>, %arg9: memref<64x128xf32, #tpu.memory_space<vmem>>) attributes {dimension_semantics = [#tpu.dimension_semantics<parallel>, #tpu.dimension_semantics<parallel>], iteration_bounds = array<i64: 2, 1>, scalar_prefetch = 0 : i64, scratch_operands = 1 : i64, tpu.core_type = #tpu.core_type<tc>, window_params = [{transform_indices = @transform_0, window_bounds = array<i64: 1, 1, 6, 16, 256>}, {transform_indices = @transform_1, window_bounds = array<i64: 1, 1, 6, 16, 256>}, {pipeline_mode = #tpu.pipeline_mode<synchronous>, transform_indices = @transform_2, window_bounds = array<i64: 5, 256, 128>}, {pipeline_mode = #tpu.pipeline_mode<synchronous>, transform_indices = @transform_3, window_bounds = array<i64: 1, 128>}, {pipeline_mode = #tpu.pipeline_mode<synchronous>, transform_indices = @transform_4, window_bounds = array<i64: 128, 128>}, {pipeline_mode = #tpu.pipeline_mode<synchronous>, transform_indices = @transform_5, window_bounds = array<i64: 1, 128>}, {transform_indices = @transform_6, window_bounds = array<i64: 1, 4, 16, 128>}]} {
    %c0 = arith.constant 0 : index
    %c0_0 = arith.constant 0 : index
    %c0_1 = arith.constant 0 : index
    %c0_2 = arith.constant 0 : index
    %c0_3 = arith.constant 0 : index
    %0 = vector.load %arg2[%c0, %c0_0, %c0_1, %c0_2, %c0_3] : memref<1x1x6x16x256xbf16, #tpu.memory_space<vmem>>, vector<1x1x4x16x256xbf16>
    %1 = vector.shape_cast %0 : vector<1x1x4x16x256xbf16> to vector<4x16x256xbf16>
    %2 = vector.shape_cast %1 : vector<4x16x256xbf16> to vector<64x256xbf16>
    %c0_4 = arith.constant 0 : index
    %c0_5 = arith.constant 0 : index
    %c0_6 = arith.constant 0 : index
    %3 = vector.load %arg4[%c0_4, %c0_5, %c0_6] : memref<5x256x128xbf16, #tpu.memory_space<vmem>>, vector<1x256x128xbf16>
    %4 = vector.shape_cast %3 : vector<1x256x128xbf16> to vector<256x128xbf16>
    %cst = arith.constant dense<0.000000e+00> : vector<64x128xf32>
    %5 = tpu.matmul %2, %4, %cst {dimension_numbers = #tpu.dot_dimension_numbers<[1], [0], [0], [1], [0, 0, 1, 1], [], []>} : vector<64x256xbf16>, vector<256x128xbf16>, vector<64x128xf32> -> vector<64x128xf32>
    %c0_7 = arith.constant 0 : index
    %c0_8 = arith.constant 0 : index
    %6 = vector.load %arg9[%c0_7, %c0_8] : memref<64x128xf32, #tpu.memory_space<vmem>>, vector<64x128xf32>
    tpu.vector_store %arg9[%c0_7, %c0_8], %5 {strides = array<i32>} : memref<64x128xf32, #tpu.memory_space<vmem>>, vector<64x128xf32>,
    %c0_9 = arith.constant 0 : index
    %c0_10 = arith.constant 0 : index
    %c0_11 = arith.constant 0 : index
    %c0_12 = arith.constant 0 : index
    %c0_13 = arith.constant 0 : index
    %7 = vector.load %arg3[%c0_9, %c0_10, %c0_11, %c0_12, %c0_13] : memref<1x1x6x16x256xbf16, #tpu.memory_space<vmem>>, vector<1x1x4x16x256xbf16>
    %8 = vector.shape_cast %7 : vector<1x1x4x16x256xbf16> to vector<4x16x256xbf16>
    %9 = vector.shape_cast %8 : vector<4x16x256xbf16> to vector<64x256xbf16>
    %c1 = arith.constant 1 : index
    %c0_14 = arith.constant 0 : index
    %c0_15 = arith.constant 0 : index
    %10 = vector.load %arg4[%c1, %c0_14, %c0_15] : memref<5x256x128xbf16, #tpu.memory_space<vmem>>, vector<1x256x128xbf16>
    %11 = vector.shape_cast %10 : vector<1x256x128xbf16> to vector<256x128xbf16>
    %cst_16 = arith.constant dense<0.000000e+00> : vector<64x128xf32>
    %12 = tpu.matmul %9, %11, %cst_16 {dimension_numbers = #tpu.dot_dimension_numbers<[1], [0], [0], [1], [0, 0, 1, 1], [], []>} : vector<64x256xbf16>, vector<256x128xbf16>, vector<64x128xf32> -> vector<64x128xf32>
    %c0_17 = arith.constant 0 : index
    %c0_18 = arith.constant 0 : index
    %13 = vector.load %arg9[%c0_17, %c0_18] : memref<64x128xf32, #tpu.memory_space<vmem>>, vector<64x128xf32>
    %14 = arith.addf %13, %12 : vector<64x128xf32>
    %c0_19 = arith.constant 0 : index
    %c0_20 = arith.constant 0 : index
    %15 = vector.load %arg9[%c0_19, %c0_20] : memref<64x128xf32, #tpu.memory_space<vmem>>, vector<64x128xf32>
    tpu.vector_store %arg9[%c0_19, %c0_20], %14 {strides = array<i32>} : memref<64x128xf32, #tpu.memory_space<vmem>>, vector<64x128xf32>,
    %c0_21 = arith.constant 0 : index
    %c0_22 = arith.constant 0 : index
    %c1_23 = arith.constant 1 : index
    %c0_24 = arith.constant 0 : index
    %c0_25 = arith.constant 0 : index
    %16 = vector.load %arg2[%c0_21, %c0_22, %c1_23, %c0_24, %c0_25] : memref<1x1x6x16x256xbf16, #tpu.memory_space<vmem>>, vector<1x1x4x16x256xbf16>
    %17 = vector.shape_cast %16 : vector<1x1x4x16x256xbf16> to vector<4x16x256xbf16>
    %18 = vector.shape_cast %17 : vector<4x16x256xbf16> to vector<64x256xbf16>
    %c2 = arith.constant 2 : index
    %c0_26 = arith.constant 0 : index
    %c0_27 = arith.constant 0 : index
    %19 = vector.load %arg4[%c2, %c0_26, %c0_27] : memref<5x256x128xbf16, #tpu.memory_space<vmem>>, vector<1x256x128xbf16>
    %20 = vector.shape_cast %19 : vector<1x256x128xbf16> to vector<256x128xbf16>
    %cst_28 = arith.constant dense<0.000000e+00> : vector<64x128xf32>
    %21 = tpu.matmul %18, %20, %cst_28 {dimension_numbers = #tpu.dot_dimension_numbers<[1], [0], [0], [1], [0, 0, 1, 1], [], []>} : vector<64x256xbf16>, vector<256x128xbf16>, vector<64x128xf32> -> vector<64x128xf32>
    %c0_29 = arith.constant 0 : index
    %c0_30 = arith.constant 0 : index
    %22 = vector.load %arg9[%c0_29, %c0_30] : memref<64x128xf32, #tpu.memory_space<vmem>>, vector<64x128xf32>
    %23 = arith.addf %22, %21 : vector<64x128xf32>
    %c0_31 = arith.constant 0 : index
    %c0_32 = arith.constant 0 : index
    %24 = vector.load %arg9[%c0_31, %c0_32] : memref<64x128xf32, #tpu.memory_space<vmem>>, vector<64x128xf32>
    tpu.vector_store %arg9[%c0_31, %c0_32], %23 {strides = array<i32>} : memref<64x128xf32, #tpu.memory_space<vmem>>, vector<64x128xf32>,
    %c0_33 = arith.constant 0 : index
    %c0_34 = arith.constant 0 : index
    %c1_35 = arith.constant 1 : index
    %c0_36 = arith.constant 0 : index
    %c0_37 = arith.constant 0 : index
    %25 = vector.load %arg3[%c0_33, %c0_34, %c1_35, %c0_36, %c0_37] : memref<1x1x6x16x256xbf16, #tpu.memory_space<vmem>>, vector<1x1x4x16x256xbf16>
    %26 = vector.shape_cast %25 : vector<1x1x4x16x256xbf16> to vector<4x16x256xbf16>
    %27 = vector.shape_cast %26 : vector<4x16x256xbf16> to vector<64x256xbf16>
    %c3 = arith.constant 3 : index
    %c0_38 = arith.constant 0 : index
    %c0_39 = arith.constant 0 : index
    %28 = vector.load %arg4[%c3, %c0_38, %c0_39] : memref<5x256x128xbf16, #tpu.memory_space<vmem>>, vector<1x256x128xbf16>
    %29 = vector.shape_cast %28 : vector<1x256x128xbf16> to vector<256x128xbf16>
    %cst_40 = arith.constant dense<0.000000e+00> : vector<64x128xf32>
    %30 = tpu.matmul %27, %29, %cst_40 {dimension_numbers = #tpu.dot_dimension_numbers<[1], [0], [0], [1], [0, 0, 1, 1], [], []>} : vector<64x256xbf16>, vector<256x128xbf16>, vector<64x128xf32> -> vector<64x128xf32>
    %c0_41 = arith.constant 0 : index
    %c0_42 = arith.constant 0 : index
    %31 = vector.load %arg9[%c0_41, %c0_42] : memref<64x128xf32, #tpu.memory_space<vmem>>, vector<64x128xf32>
    %32 = arith.addf %31, %30 : vector<64x128xf32>
    %c0_43 = arith.constant 0 : index
    %c0_44 = arith.constant 0 : index
    %33 = vector.load %arg9[%c0_43, %c0_44] : memref<64x128xf32, #tpu.memory_space<vmem>>, vector<64x128xf32>
    tpu.vector_store %arg9[%c0_43, %c0_44], %32 {strides = array<i32>} : memref<64x128xf32, #tpu.memory_space<vmem>>, vector<64x128xf32>,
    %c0_45 = arith.constant 0 : index
    %c0_46 = arith.constant 0 : index
    %c2_47 = arith.constant 2 : index
    %c0_48 = arith.constant 0 : index
    %c0_49 = arith.constant 0 : index
    %34 = vector.load %arg2[%c0_45, %c0_46, %c2_47, %c0_48, %c0_49] : memref<1x1x6x16x256xbf16, #tpu.memory_space<vmem>>, vector<1x1x4x16x256xbf16>
    %35 = vector.shape_cast %34 : vector<1x1x4x16x256xbf16> to vector<4x16x256xbf16>
    %36 = vector.shape_cast %35 : vector<4x16x256xbf16> to vector<64x256xbf16>
    %c4 = arith.constant 4 : index
    %c0_50 = arith.constant 0 : index
    %c0_51 = arith.constant 0 : index
    %37 = vector.load %arg4[%c4, %c0_50, %c0_51] : memref<5x256x128xbf16, #tpu.memory_space<vmem>>, vector<1x256x128xbf16>
    %38 = vector.shape_cast %37 : vector<1x256x128xbf16> to vector<256x128xbf16>
    %cst_52 = arith.constant dense<0.000000e+00> : vector<64x128xf32>
    %39 = tpu.matmul %36, %38, %cst_52 {dimension_numbers = #tpu.dot_dimension_numbers<[1], [0], [0], [1], [0, 0, 1, 1], [], []>} : vector<64x256xbf16>, vector<256x128xbf16>, vector<64x128xf32> -> vector<64x128xf32>
    %c0_53 = arith.constant 0 : index
    %c0_54 = arith.constant 0 : index
    %40 = vector.load %arg9[%c0_53, %c0_54] : memref<64x128xf32, #tpu.memory_space<vmem>>, vector<64x128xf32>
    %41 = arith.addf %40, %39 : vector<64x128xf32>
    %c0_55 = arith.constant 0 : index
    %c0_56 = arith.constant 0 : index
    %42 = vector.load %arg9[%c0_55, %c0_56] : memref<64x128xf32, #tpu.memory_space<vmem>>, vector<64x128xf32>
    tpu.vector_store %arg9[%c0_55, %c0_56], %41 {strides = array<i32>} : memref<64x128xf32, #tpu.memory_space<vmem>>, vector<64x128xf32>,
    %c0_57 = arith.constant 0 : index
    %c0_58 = arith.constant 0 : index
    %43 = vector.load %arg9[%c0_57, %c0_58] : memref<64x128xf32, #tpu.memory_space<vmem>>, vector<64x128xf32>
    %c0_59 = arith.constant 0 : index
    %c0_60 = arith.constant 0 : index
    %44 = vector.load %arg5[%c0_59, %c0_60] : memref<1x128xf32, #tpu.memory_space<vmem>>, vector<1x128xf32>
    %45 = vector.broadcast %44 : vector<1x128xf32> to vector<64x128xf32>
    %46 = arith.addf %43, %45 : vector<64x128xf32>
    %47 = arith.mulf %46, %46 : vector<64x128xf32>
    %48 = arith.truncf %47 : vector<64x128xf32> to vector<64x128xbf16>
    %c0_61 = arith.constant 0 : index
    %c0_62 = arith.constant 0 : index
    %49 = vector.load %arg6[%c0_61, %c0_62] : memref<128x128xbf16, #tpu.memory_space<vmem>>, vector<128x128xbf16>
    %cst_63 = arith.constant dense<0.000000e+00> : vector<64x128xf32>
    %50 = tpu.matmul %48, %49, %cst_63 {dimension_numbers = #tpu.dot_dimension_numbers<[1], [0], [0], [1], [0, 0, 1, 1], [], []>} : vector<64x128xbf16>, vector<128x128xbf16>, vector<64x128xf32> -> vector<64x128xf32>
    %c0_64 = arith.constant 0 : index
    %c0_65 = arith.constant 0 : index
    %51 = vector.load %arg7[%c0_64, %c0_65] : memref<1x128xf32, #tpu.memory_space<vmem>>, vector<1x128xf32>
    %52 = vector.broadcast %51 : vector<1x128xf32> to vector<64x128xf32>
    %53 = arith.addf %50, %52 : vector<64x128xf32>
    %54 = math.rsqrt %53 : vector<64x128xf32>
    %55 = arith.mulf %46, %54 : vector<64x128xf32>
    %56 = vector.shape_cast %55 : vector<64x128xf32> to vector<4x16x128xf32>
    %57 = arith.truncf %56 : vector<4x16x128xf32> to vector<4x16x128xbf16>
    %c0_66 = arith.constant 0 : index
    %c0_67 = arith.constant 0 : index
    %c0_68 = arith.constant 0 : index
    %c0_69 = arith.constant 0 : index
    %58 = vector.load %arg8[%c0_66, %c0_67, %c0_68, %c0_69] : memref<1x4x16x128xbf16, #tpu.memory_space<vmem>>, vector<1x4x16x128xbf16>
    %59 = vector.shape_cast %58 : vector<1x4x16x128xbf16> to vector<4x16x128xbf16>
    %60 = vector.shape_cast %57 : vector<4x16x128xbf16> to vector<1x4x16x128xbf16>
    tpu.vector_store %arg8[%c0_66, %c0_67, %c0_68, %c0_69], %60 {strides = array<i32>} : memref<1x4x16x128xbf16, #tpu.memory_space<vmem>>, vector<1x4x16x128xbf16>,
    return
  }
  func.func @transform_0(%arg0: i32, %arg1: i32) -> (i32, i32, i32, i32, i32) {
    %c0_i32 = arith.constant 0 : i32
    %c0_i32_0 = arith.constant 0 : i32
    %c0_i32_1 = arith.constant 0 : i32
    %c0_i32_2 = arith.constant 0 : i32
    return %arg0, %arg1, %c0_i32, %c0_i32_0, %c0_i32_1 : i32, i32, i32, i32, i32
  }
  func.func @transform_1(%arg0: i32, %arg1: i32) -> (i32, i32, i32, i32, i32) {
    %c0_i32 = arith.constant 0 : i32
    %c0_i32_0 = arith.constant 0 : i32
    %c0_i32_1 = arith.constant 0 : i32
    %c0_i32_2 = arith.constant 0 : i32
    return %arg0, %arg1, %c0_i32, %c0_i32_0, %c0_i32_1 : i32, i32, i32, i32, i32
  }
  func.func @transform_2(%arg0: i32, %arg1: i32) -> (i32, i32, i32) {
    %c0_i32 = arith.constant 0 : i32
    %c0_i32_0 = arith.constant 0 : i32
    %c0_i32_1 = arith.constant 0 : i32
    %c0_i32_2 = arith.constant 0 : i32
    return %c0_i32, %c0_i32_0, %c0_i32_1 : i32, i32, i32
  }
  func.func @transform_3(%arg0: i32, %arg1: i32) -> (i32, i32) {
    %c0_i32 = arith.constant 0 : i32
    %c0_i32_0 = arith.constant 0 : i32
    %c0_i32_1 = arith.constant 0 : i32
    return %c0_i32, %c0_i32_0 : i32, i32
  }
  func.func @transform_4(%arg0: i32, %arg1: i32) -> (i32, i32) {
    %c0_i32 = arith.constant 0 : i32
    %c0_i32_0 = arith.constant 0 : i32
    %c0_i32_1 = arith.constant 0 : i32
    return %c0_i32, %c0_i32_0 : i32, i32
  }
  func.func @transform_5(%arg0: i32, %arg1: i32) -> (i32, i32) {
    %c0_i32 = arith.constant 0 : i32
    %c0_i32_0 = arith.constant 0 : i32
    %c0_i32_1 = arith.constant 0 : i32
    return %c0_i32, %c0_i32_0 : i32, i32
  }
  func.func @transform_6(%arg0: i32, %arg1: i32) -> (i32, i32, i32, i32) {
    %c0_i32 = arith.constant 0 : i32
    %c0_i32_0 = arith.constant 0 : i32
    %c0_i32_1 = arith.constant 0 : i32
    return %arg0, %arg1, %c0_i32, %c0_i32_0 : i32, i32, i32, i32
  }
}

module attributes {stable_mosaic.version = 11 : i64} {
  func.func @kernel(%arg0: i32, %arg1: i32, %arg2: memref<1x1x4x16x256xbf16, #tpu.memory_space<vmem>>, %arg3: memref<1x1x4x16x256xbf16, #tpu.memory_space<vmem>>, %arg4: memref<5x256x128xbf16, #tpu.memory_space<vmem>>, %arg5: memref<1x128xf32, #tpu.memory_space<vmem>>, %arg6: memref<128x128xbf16, #tpu.memory_space<vmem>>, %arg7: memref<1x128xf32, #tpu.memory_space<vmem>>, %arg8: memref<1x2x16x128xbf16, #tpu.memory_space<vmem>>, %arg9: memref<32x128xf32, #tpu.memory_space<vmem>>) attributes {dimension_semantics = [#tpu.dimension_semantics<parallel>, #tpu.dimension_semantics<parallel>], iteration_bounds = array<i64: 2, 1>, scalar_prefetch = 0 : i64, scratch_operands = 1 : i64, tpu.core_type = #tpu.core_type<tc>, window_params = [{transform_indices = @transform_0, window_bounds = array<i64: 1, 1, 4, 16, 256>}, {transform_indices = @transform_1, window_bounds = array<i64: 1, 1, 4, 16, 256>}, {pipeline_mode = #tpu.pipeline_mode<synchronous>, transform_indices = @transform_2, window_bounds = array<i64: 5, 256, 128>}, {pipeline_mode = #tpu.pipeline_mode<synchronous>, transform_indices = @transform_3, window_bounds = array<i64: 1, 128>}, {pipeline_mode = #tpu.pipeline_mode<synchronous>, transform_indices = @transform_4, window_bounds = array<i64: 128, 128>}, {pipeline_mode = #tpu.pipeline_mode<synchronous>, transform_indices = @transform_5, window_bounds = array<i64: 1, 128>}, {transform_indices = @transform_6, window_bounds = array<i64: 1, 2, 16, 128>}]} {
    %c0 = arith.constant 0 : index
    %c0_0 = arith.constant 0 : index
    %c0_1 = arith.constant 0 : index
    %c0_2 = arith.constant 0 : index
    %c0_3 = arith.constant 0 : index
    %0 = vector.load %arg2[%c0, %c0_0, %c0_1, %c0_2, %c0_3] : memref<1x1x4x16x256xbf16, #tpu.memory_space<vmem>>, vector<1x1x2x16x256xbf16>
    %1 = vector.shape_cast %0 : vector<1x1x2x16x256xbf16> to vector<2x16x256xbf16>
    %2 = vector.shape_cast %1 : vector<2x16x256xbf16> to vector<32x256xbf16>
    %c0_4 = arith.constant 0 : index
    %c0_5 = arith.constant 0 : index
    %c0_6 = arith.constant 0 : index
    %3 = vector.load %arg4[%c0_4, %c0_5, %c0_6] : memref<5x256x128xbf16, #tpu.memory_space<vmem>>, vector<1x256x128xbf16>
    %4 = vector.shape_cast %3 : vector<1x256x128xbf16> to vector<256x128xbf16>
    %cst = arith.constant dense<0.000000e+00> : vector<32x128xf32>
    %5 = tpu.matmul %2, %4, %cst {dimension_numbers = #tpu.dot_dimension_numbers<[1], [0], [0], [1], [0, 0, 1, 1], [], []>} : vector<32x256xbf16>, vector<256x128xbf16>, vector<32x128xf32> -> vector<32x128xf32>
    %c0_7 = arith.constant 0 : index
    %c0_8 = arith.constant 0 : index
    %6 = vector.load %arg9[%c0_7, %c0_8] : memref<32x128xf32, #tpu.memory_space<vmem>>, vector<32x128xf32>
    tpu.vector_store %arg9[%c0_7, %c0_8], %5 {strides = array<i32>} : memref<32x128xf32, #tpu.memory_space<vmem>>, vector<32x128xf32>,
    %c0_9 = arith.constant 0 : index
    %c0_10 = arith.constant 0 : index
    %c0_11 = arith.constant 0 : index
    %c0_12 = arith.constant 0 : index
    %c0_13 = arith.constant 0 : index
    %7 = vector.load %arg3[%c0_9, %c0_10, %c0_11, %c0_12, %c0_13] : memref<1x1x4x16x256xbf16, #tpu.memory_space<vmem>>, vector<1x1x2x16x256xbf16>
    %8 = vector.shape_cast %7 : vector<1x1x2x16x256xbf16> to vector<2x16x256xbf16>
    %9 = vector.shape_cast %8 : vector<2x16x256xbf16> to vector<32x256xbf16>
    %c1 = arith.constant 1 : index
    %c0_14 = arith.constant 0 : index
    %c0_15 = arith.constant 0 : index
    %10 = vector.load %arg4[%c1, %c0_14, %c0_15] : memref<5x256x128xbf16, #tpu.memory_space<vmem>>, vector<1x256x128xbf16>
    %11 = vector.shape_cast %10 : vector<1x256x128xbf16> to vector<256x128xbf16>
    %cst_16 = arith.constant dense<0.000000e+00> : vector<32x128xf32>
    %12 = tpu.matmul %9, %11, %cst_16 {dimension_numbers = #tpu.dot_dimension_numbers<[1], [0], [0], [1], [0, 0, 1, 1], [], []>} : vector<32x256xbf16>, vector<256x128xbf16>, vector<32x128xf32> -> vector<32x128xf32>
    %c0_17 = arith.constant 0 : index
    %c0_18 = arith.constant 0 : index
    %13 = vector.load %arg9[%c0_17, %c0_18] : memref<32x128xf32, #tpu.memory_space<vmem>>, vector<32x128xf32>
    %14 = arith.addf %13, %12 : vector<32x128xf32>
    %c0_19 = arith.constant 0 : index
    %c0_20 = arith.constant 0 : index
    %15 = vector.load %arg9[%c0_19, %c0_20] : memref<32x128xf32, #tpu.memory_space<vmem>>, vector<32x128xf32>
    tpu.vector_store %arg9[%c0_19, %c0_20], %14 {strides = array<i32>} : memref<32x128xf32, #tpu.memory_space<vmem>>, vector<32x128xf32>,
    %c0_21 = arith.constant 0 : index
    %c0_22 = arith.constant 0 : index
    %c1_23 = arith.constant 1 : index
    %c0_24 = arith.constant 0 : index
    %c0_25 = arith.constant 0 : index
    %16 = vector.load %arg2[%c0_21, %c0_22, %c1_23, %c0_24, %c0_25] : memref<1x1x4x16x256xbf16, #tpu.memory_space<vmem>>, vector<1x1x2x16x256xbf16>
    %17 = vector.shape_cast %16 : vector<1x1x2x16x256xbf16> to vector<2x16x256xbf16>
    %18 = vector.shape_cast %17 : vector<2x16x256xbf16> to vector<32x256xbf16>
    %c2 = arith.constant 2 : index
    %c0_26 = arith.constant 0 : index
    %c0_27 = arith.constant 0 : index
    %19 = vector.load %arg4[%c2, %c0_26, %c0_27] : memref<5x256x128xbf16, #tpu.memory_space<vmem>>, vector<1x256x128xbf16>
    %20 = vector.shape_cast %19 : vector<1x256x128xbf16> to vector<256x128xbf16>
    %cst_28 = arith.constant dense<0.000000e+00> : vector<32x128xf32>
    %21 = tpu.matmul %18, %20, %cst_28 {dimension_numbers = #tpu.dot_dimension_numbers<[1], [0], [0], [1], [0, 0, 1, 1], [], []>} : vector<32x256xbf16>, vector<256x128xbf16>, vector<32x128xf32> -> vector<32x128xf32>
    %c0_29 = arith.constant 0 : index
    %c0_30 = arith.constant 0 : index
    %22 = vector.load %arg9[%c0_29, %c0_30] : memref<32x128xf32, #tpu.memory_space<vmem>>, vector<32x128xf32>
    %23 = arith.addf %22, %21 : vector<32x128xf32>
    %c0_31 = arith.constant 0 : index
    %c0_32 = arith.constant 0 : index
    %24 = vector.load %arg9[%c0_31, %c0_32] : memref<32x128xf32, #tpu.memory_space<vmem>>, vector<32x128xf32>
    tpu.vector_store %arg9[%c0_31, %c0_32], %23 {strides = array<i32>} : memref<32x128xf32, #tpu.memory_space<vmem>>, vector<32x128xf32>,
    %c0_33 = arith.constant 0 : index
    %c0_34 = arith.constant 0 : index
    %c1_35 = arith.constant 1 : index
    %c0_36 = arith.constant 0 : index
    %c0_37 = arith.constant 0 : index
    %25 = vector.load %arg3[%c0_33, %c0_34, %c1_35, %c0_36, %c0_37] : memref<1x1x4x16x256xbf16, #tpu.memory_space<vmem>>, vector<1x1x2x16x256xbf16>
    %26 = vector.shape_cast %25 : vector<1x1x2x16x256xbf16> to vector<2x16x256xbf16>
    %27 = vector.shape_cast %26 : vector<2x16x256xbf16> to vector<32x256xbf16>
    %c3 = arith.constant 3 : index
    %c0_38 = arith.constant 0 : index
    %c0_39 = arith.constant 0 : index
    %28 = vector.load %arg4[%c3, %c0_38, %c0_39] : memref<5x256x128xbf16, #tpu.memory_space<vmem>>, vector<1x256x128xbf16>
    %29 = vector.shape_cast %28 : vector<1x256x128xbf16> to vector<256x128xbf16>
    %cst_40 = arith.constant dense<0.000000e+00> : vector<32x128xf32>
    %30 = tpu.matmul %27, %29, %cst_40 {dimension_numbers = #tpu.dot_dimension_numbers<[1], [0], [0], [1], [0, 0, 1, 1], [], []>} : vector<32x256xbf16>, vector<256x128xbf16>, vector<32x128xf32> -> vector<32x128xf32>
    %c0_41 = arith.constant 0 : index
    %c0_42 = arith.constant 0 : index
    %31 = vector.load %arg9[%c0_41, %c0_42] : memref<32x128xf32, #tpu.memory_space<vmem>>, vector<32x128xf32>
    %32 = arith.addf %31, %30 : vector<32x128xf32>
    %c0_43 = arith.constant 0 : index
    %c0_44 = arith.constant 0 : index
    %33 = vector.load %arg9[%c0_43, %c0_44] : memref<32x128xf32, #tpu.memory_space<vmem>>, vector<32x128xf32>
    tpu.vector_store %arg9[%c0_43, %c0_44], %32 {strides = array<i32>} : memref<32x128xf32, #tpu.memory_space<vmem>>, vector<32x128xf32>,
    %c0_45 = arith.constant 0 : index
    %c0_46 = arith.constant 0 : index
    %c2_47 = arith.constant 2 : index
    %c0_48 = arith.constant 0 : index
    %c0_49 = arith.constant 0 : index
    %34 = vector.load %arg2[%c0_45, %c0_46, %c2_47, %c0_48, %c0_49] : memref<1x1x4x16x256xbf16, #tpu.memory_space<vmem>>, vector<1x1x2x16x256xbf16>
    %35 = vector.shape_cast %34 : vector<1x1x2x16x256xbf16> to vector<2x16x256xbf16>
    %36 = vector.shape_cast %35 : vector<2x16x256xbf16> to vector<32x256xbf16>
    %c4 = arith.constant 4 : index
    %c0_50 = arith.constant 0 : index
    %c0_51 = arith.constant 0 : index
    %37 = vector.load %arg4[%c4, %c0_50, %c0_51] : memref<5x256x128xbf16, #tpu.memory_space<vmem>>, vector<1x256x128xbf16>
    %38 = vector.shape_cast %37 : vector<1x256x128xbf16> to vector<256x128xbf16>
    %cst_52 = arith.constant dense<0.000000e+00> : vector<32x128xf32>
    %39 = tpu.matmul %36, %38, %cst_52 {dimension_numbers = #tpu.dot_dimension_numbers<[1], [0], [0], [1], [0, 0, 1, 1], [], []>} : vector<32x256xbf16>, vector<256x128xbf16>, vector<32x128xf32> -> vector<32x128xf32>
    %c0_53 = arith.constant 0 : index
    %c0_54 = arith.constant 0 : index
    %40 = vector.load %arg9[%c0_53, %c0_54] : memref<32x128xf32, #tpu.memory_space<vmem>>, vector<32x128xf32>
    %41 = arith.addf %40, %39 : vector<32x128xf32>
    %c0_55 = arith.constant 0 : index
    %c0_56 = arith.constant 0 : index
    %42 = vector.load %arg9[%c0_55, %c0_56] : memref<32x128xf32, #tpu.memory_space<vmem>>, vector<32x128xf32>
    tpu.vector_store %arg9[%c0_55, %c0_56], %41 {strides = array<i32>} : memref<32x128xf32, #tpu.memory_space<vmem>>, vector<32x128xf32>,
    %c0_57 = arith.constant 0 : index
    %c0_58 = arith.constant 0 : index
    %43 = vector.load %arg9[%c0_57, %c0_58] : memref<32x128xf32, #tpu.memory_space<vmem>>, vector<32x128xf32>
    %c0_59 = arith.constant 0 : index
    %c0_60 = arith.constant 0 : index
    %44 = vector.load %arg5[%c0_59, %c0_60] : memref<1x128xf32, #tpu.memory_space<vmem>>, vector<1x128xf32>
    %45 = vector.broadcast %44 : vector<1x128xf32> to vector<32x128xf32>
    %46 = arith.addf %43, %45 : vector<32x128xf32>
    %47 = arith.mulf %46, %46 : vector<32x128xf32>
    %48 = arith.truncf %47 : vector<32x128xf32> to vector<32x128xbf16>
    %c0_61 = arith.constant 0 : index
    %c0_62 = arith.constant 0 : index
    %49 = vector.load %arg6[%c0_61, %c0_62] : memref<128x128xbf16, #tpu.memory_space<vmem>>, vector<128x128xbf16>
    %cst_63 = arith.constant dense<0.000000e+00> : vector<32x128xf32>
    %50 = tpu.matmul %48, %49, %cst_63 {dimension_numbers = #tpu.dot_dimension_numbers<[1], [0], [0], [1], [0, 0, 1, 1], [], []>} : vector<32x128xbf16>, vector<128x128xbf16>, vector<32x128xf32> -> vector<32x128xf32>
    %c0_64 = arith.constant 0 : index
    %c0_65 = arith.constant 0 : index
    %51 = vector.load %arg7[%c0_64, %c0_65] : memref<1x128xf32, #tpu.memory_space<vmem>>, vector<1x128xf32>
    %52 = vector.broadcast %51 : vector<1x128xf32> to vector<32x128xf32>
    %53 = arith.addf %50, %52 : vector<32x128xf32>
    %54 = math.rsqrt %53 : vector<32x128xf32>
    %55 = arith.mulf %46, %54 : vector<32x128xf32>
    %56 = vector.shape_cast %55 : vector<32x128xf32> to vector<2x16x128xf32>
    %57 = arith.truncf %56 : vector<2x16x128xf32> to vector<2x16x128xbf16>
    %c0_66 = arith.constant 0 : index
    %c0_67 = arith.constant 0 : index
    %c0_68 = arith.constant 0 : index
    %c0_69 = arith.constant 0 : index
    %58 = vector.load %arg8[%c0_66, %c0_67, %c0_68, %c0_69] : memref<1x2x16x128xbf16, #tpu.memory_space<vmem>>, vector<1x2x16x128xbf16>
    %59 = vector.shape_cast %58 : vector<1x2x16x128xbf16> to vector<2x16x128xbf16>
    %60 = vector.shape_cast %57 : vector<2x16x128xbf16> to vector<1x2x16x128xbf16>
    tpu.vector_store %arg8[%c0_66, %c0_67, %c0_68, %c0_69], %60 {strides = array<i32>} : memref<1x2x16x128xbf16, #tpu.memory_space<vmem>>, vector<1x2x16x128xbf16>,
    return
  }
  func.func @transform_0(%arg0: i32, %arg1: i32) -> (i32, i32, i32, i32, i32) {
    %c0_i32 = arith.constant 0 : i32
    %c0_i32_0 = arith.constant 0 : i32
    %c0_i32_1 = arith.constant 0 : i32
    %c0_i32_2 = arith.constant 0 : i32
    return %arg0, %arg1, %c0_i32, %c0_i32_0, %c0_i32_1 : i32, i32, i32, i32, i32
  }
  func.func @transform_1(%arg0: i32, %arg1: i32) -> (i32, i32, i32, i32, i32) {
    %c0_i32 = arith.constant 0 : i32
    %c0_i32_0 = arith.constant 0 : i32
    %c0_i32_1 = arith.constant 0 : i32
    %c0_i32_2 = arith.constant 0 : i32
    return %arg0, %arg1, %c0_i32, %c0_i32_0, %c0_i32_1 : i32, i32, i32, i32, i32
  }
  func.func @transform_2(%arg0: i32, %arg1: i32) -> (i32, i32, i32) {
    %c0_i32 = arith.constant 0 : i32
    %c0_i32_0 = arith.constant 0 : i32
    %c0_i32_1 = arith.constant 0 : i32
    %c0_i32_2 = arith.constant 0 : i32
    return %c0_i32, %c0_i32_0, %c0_i32_1 : i32, i32, i32
  }
  func.func @transform_3(%arg0: i32, %arg1: i32) -> (i32, i32) {
    %c0_i32 = arith.constant 0 : i32
    %c0_i32_0 = arith.constant 0 : i32
    %c0_i32_1 = arith.constant 0 : i32
    return %c0_i32, %c0_i32_0 : i32, i32
  }
  func.func @transform_4(%arg0: i32, %arg1: i32) -> (i32, i32) {
    %c0_i32 = arith.constant 0 : i32
    %c0_i32_0 = arith.constant 0 : i32
    %c0_i32_1 = arith.constant 0 : i32
    return %c0_i32, %c0_i32_0 : i32, i32
  }
  func.func @transform_5(%arg0: i32, %arg1: i32) -> (i32, i32) {
    %c0_i32 = arith.constant 0 : i32
    %c0_i32_0 = arith.constant 0 : i32
    %c0_i32_1 = arith.constant 0 : i32
    return %c0_i32, %c0_i32_0 : i32, i32
  }
  func.func @transform_6(%arg0: i32, %arg1: i32) -> (i32, i32, i32, i32) {
    %c0_i32 = arith.constant 0 : i32
    %c0_i32_0 = arith.constant 0 : i32
    %c0_i32_1 = arith.constant 0 : i32
    return %arg0, %arg1, %c0_i32, %c0_i32_0 : i32, i32, i32, i32
  }
}

module attributes {stable_mosaic.version = 11 : i64} {
  func.func @kernel(%arg0: i32, %arg1: i32, %arg2: memref<1x1x3x16x256xbf16, #tpu.memory_space<vmem>>, %arg3: memref<1x1x3x16x256xbf16, #tpu.memory_space<vmem>>, %arg4: memref<5x256x128xbf16, #tpu.memory_space<vmem>>, %arg5: memref<1x128xf32, #tpu.memory_space<vmem>>, %arg6: memref<1x1x16x128xf32, #tpu.memory_space<vmem>>, %arg7: memref<16x128xf32, #tpu.memory_space<vmem>>) attributes {dimension_semantics = [#tpu.dimension_semantics<parallel>, #tpu.dimension_semantics<parallel>], iteration_bounds = array<i64: 2, 1>, scalar_prefetch = 0 : i64, scratch_operands = 1 : i64, tpu.core_type = #tpu.core_type<tc>, window_params = [{transform_indices = @transform_0, window_bounds = array<i64: 1, 1, 3, 16, 256>}, {transform_indices = @transform_1, window_bounds = array<i64: 1, 1, 3, 16, 256>}, {pipeline_mode = #tpu.pipeline_mode<synchronous>, transform_indices = @transform_2, window_bounds = array<i64: 5, 256, 128>}, {pipeline_mode = #tpu.pipeline_mode<synchronous>, transform_indices = @transform_3, window_bounds = array<i64: 1, 128>}, {transform_indices = @transform_4, window_bounds = array<i64: 1, 1, 16, 128>}]} {
    %c0 = arith.constant 0 : index
    %c0_0 = arith.constant 0 : index
    %c0_1 = arith.constant 0 : index
    %c0_2 = arith.constant 0 : index
    %c0_3 = arith.constant 0 : index
    %0 = vector.load %arg2[%c0, %c0_0, %c0_1, %c0_2, %c0_3] : memref<1x1x3x16x256xbf16, #tpu.memory_space<vmem>>, vector<1x1x1x16x256xbf16>
    %1 = vector.shape_cast %0 : vector<1x1x1x16x256xbf16> to vector<1x16x256xbf16>
    %2 = vector.shape_cast %1 : vector<1x16x256xbf16> to vector<16x256xbf16>
    %c0_4 = arith.constant 0 : index
    %c0_5 = arith.constant 0 : index
    %c0_6 = arith.constant 0 : index
    %3 = vector.load %arg4[%c0_4, %c0_5, %c0_6] : memref<5x256x128xbf16, #tpu.memory_space<vmem>>, vector<1x256x128xbf16>
    %4 = vector.shape_cast %3 : vector<1x256x128xbf16> to vector<256x128xbf16>
    %cst = arith.constant dense<0.000000e+00> : vector<16x128xf32>
    %5 = tpu.matmul %2, %4, %cst {dimension_numbers = #tpu.dot_dimension_numbers<[1], [0], [0], [1], [0, 0, 1, 1], [], []>} : vector<16x256xbf16>, vector<256x128xbf16>, vector<16x128xf32> -> vector<16x128xf32>
    %c0_7 = arith.constant 0 : index
    %c0_8 = arith.constant 0 : index
    %6 = vector.load %arg7[%c0_7, %c0_8] : memref<16x128xf32, #tpu.memory_space<vmem>>, vector<16x128xf32>
    tpu.vector_store %arg7[%c0_7, %c0_8], %5 {strides = array<i32>} : memref<16x128xf32, #tpu.memory_space<vmem>>, vector<16x128xf32>,
    %c0_9 = arith.constant 0 : index
    %c0_10 = arith.constant 0 : index
    %c0_11 = arith.constant 0 : index
    %c0_12 = arith.constant 0 : index
    %c0_13 = arith.constant 0 : index
    %7 = vector.load %arg3[%c0_9, %c0_10, %c0_11, %c0_12, %c0_13] : memref<1x1x3x16x256xbf16, #tpu.memory_space<vmem>>, vector<1x1x1x16x256xbf16>
    %8 = vector.shape_cast %7 : vector<1x1x1x16x256xbf16> to vector<1x16x256xbf16>
    %9 = vector.shape_cast %8 : vector<1x16x256xbf16> to vector<16x256xbf16>
    %c1 = arith.constant 1 : index
    %c0_14 = arith.constant 0 : index
    %c0_15 = arith.constant 0 : index
    %10 = vector.load %arg4[%c1, %c0_14, %c0_15] : memref<5x256x128xbf16, #tpu.memory_space<vmem>>, vector<1x256x128xbf16>
    %11 = vector.shape_cast %10 : vector<1x256x128xbf16> to vector<256x128xbf16>
    %cst_16 = arith.constant dense<0.000000e+00> : vector<16x128xf32>
    %12 = tpu.matmul %9, %11, %cst_16 {dimension_numbers = #tpu.dot_dimension_numbers<[1], [0], [0], [1], [0, 0, 1, 1], [], []>} : vector<16x256xbf16>, vector<256x128xbf16>, vector<16x128xf32> -> vector<16x128xf32>
    %c0_17 = arith.constant 0 : index
    %c0_18 = arith.constant 0 : index
    %13 = vector.load %arg7[%c0_17, %c0_18] : memref<16x128xf32, #tpu.memory_space<vmem>>, vector<16x128xf32>
    %14 = arith.addf %13, %12 : vector<16x128xf32>
    %c0_19 = arith.constant 0 : index
    %c0_20 = arith.constant 0 : index
    %15 = vector.load %arg7[%c0_19, %c0_20] : memref<16x128xf32, #tpu.memory_space<vmem>>, vector<16x128xf32>
    tpu.vector_store %arg7[%c0_19, %c0_20], %14 {strides = array<i32>} : memref<16x128xf32, #tpu.memory_space<vmem>>, vector<16x128xf32>,
    %c0_21 = arith.constant 0 : index
    %c0_22 = arith.constant 0 : index
    %c1_23 = arith.constant 1 : index
    %c0_24 = arith.constant 0 : index
    %c0_25 = arith.constant 0 : index
    %16 = vector.load %arg2[%c0_21, %c0_22, %c1_23, %c0_24, %c0_25] : memref<1x1x3x16x256xbf16, #tpu.memory_space<vmem>>, vector<1x1x1x16x256xbf16>
    %17 = vector.shape_cast %16 : vector<1x1x1x16x256xbf16> to vector<1x16x256xbf16>
    %18 = vector.shape_cast %17 : vector<1x16x256xbf16> to vector<16x256xbf16>
    %c2 = arith.constant 2 : index
    %c0_26 = arith.constant 0 : index
    %c0_27 = arith.constant 0 : index
    %19 = vector.load %arg4[%c2, %c0_26, %c0_27] : memref<5x256x128xbf16, #tpu.memory_space<vmem>>, vector<1x256x128xbf16>
    %20 = vector.shape_cast %19 : vector<1x256x128xbf16> to vector<256x128xbf16>
    %cst_28 = arith.constant dense<0.000000e+00> : vector<16x128xf32>
    %21 = tpu.matmul %18, %20, %cst_28 {dimension_numbers = #tpu.dot_dimension_numbers<[1], [0], [0], [1], [0, 0, 1, 1], [], []>} : vector<16x256xbf16>, vector<256x128xbf16>, vector<16x128xf32> -> vector<16x128xf32>
    %c0_29 = arith.constant 0 : index
    %c0_30 = arith.constant 0 : index
    %22 = vector.load %arg7[%c0_29, %c0_30] : memref<16x128xf32, #tpu.memory_space<vmem>>, vector<16x128xf32>
    %23 = arith.addf %22, %21 : vector<16x128xf32>
    %c0_31 = arith.constant 0 : index
    %c0_32 = arith.constant 0 : index
    %24 = vector.load %arg7[%c0_31, %c0_32] : memref<16x128xf32, #tpu.memory_space<vmem>>, vector<16x128xf32>
    tpu.vector_store %arg7[%c0_31, %c0_32], %23 {strides = array<i32>} : memref<16x128xf32, #tpu.memory_space<vmem>>, vector<16x128xf32>,
    %c0_33 = arith.constant 0 : index
    %c0_34 = arith.constant 0 : index
    %c1_35 = arith.constant 1 : index
    %c0_36 = arith.constant 0 : index
    %c0_37 = arith.constant 0 : index
    %25 = vector.load %arg3[%c0_33, %c0_34, %c1_35, %c0_36, %c0_37] : memref<1x1x3x16x256xbf16, #tpu.memory_space<vmem>>, vector<1x1x1x16x256xbf16>
    %26 = vector.shape_cast %25 : vector<1x1x1x16x256xbf16> to vector<1x16x256xbf16>
    %27 = vector.shape_cast %26 : vector<1x16x256xbf16> to vector<16x256xbf16>
    %c3 = arith.constant 3 : index
    %c0_38 = arith.constant 0 : index
    %c0_39 = arith.constant 0 : index
    %28 = vector.load %arg4[%c3, %c0_38, %c0_39] : memref<5x256x128xbf16, #tpu.memory_space<vmem>>, vector<1x256x128xbf16>
    %29 = vector.shape_cast %28 : vector<1x256x128xbf16> to vector<256x128xbf16>
    %cst_40 = arith.constant dense<0.000000e+00> : vector<16x128xf32>
    %30 = tpu.matmul %27, %29, %cst_40 {dimension_numbers = #tpu.dot_dimension_numbers<[1], [0], [0], [1], [0, 0, 1, 1], [], []>} : vector<16x256xbf16>, vector<256x128xbf16>, vector<16x128xf32> -> vector<16x128xf32>
    %c0_41 = arith.constant 0 : index
    %c0_42 = arith.constant 0 : index
    %31 = vector.load %arg7[%c0_41, %c0_42] : memref<16x128xf32, #tpu.memory_space<vmem>>, vector<16x128xf32>
    %32 = arith.addf %31, %30 : vector<16x128xf32>
    %c0_43 = arith.constant 0 : index
    %c0_44 = arith.constant 0 : index
    %33 = vector.load %arg7[%c0_43, %c0_44] : memref<16x128xf32, #tpu.memory_space<vmem>>, vector<16x128xf32>
    tpu.vector_store %arg7[%c0_43, %c0_44], %32 {strides = array<i32>} : memref<16x128xf32, #tpu.memory_space<vmem>>, vector<16x128xf32>,
    %c0_45 = arith.constant 0 : index
    %c0_46 = arith.constant 0 : index
    %c2_47 = arith.constant 2 : index
    %c0_48 = arith.constant 0 : index
    %c0_49 = arith.constant 0 : index
    %34 = vector.load %arg2[%c0_45, %c0_46, %c2_47, %c0_48, %c0_49] : memref<1x1x3x16x256xbf16, #tpu.memory_space<vmem>>, vector<1x1x1x16x256xbf16>
    %35 = vector.shape_cast %34 : vector<1x1x1x16x256xbf16> to vector<1x16x256xbf16>
    %36 = vector.shape_cast %35 : vector<1x16x256xbf16> to vector<16x256xbf16>
    %c4 = arith.constant 4 : index
    %c0_50 = arith.constant 0 : index
    %c0_51 = arith.constant 0 : index
    %37 = vector.load %arg4[%c4, %c0_50, %c0_51] : memref<5x256x128xbf16, #tpu.memory_space<vmem>>, vector<1x256x128xbf16>
    %38 = vector.shape_cast %37 : vector<1x256x128xbf16> to vector<256x128xbf16>
    %cst_52 = arith.constant dense<0.000000e+00> : vector<16x128xf32>
    %39 = tpu.matmul %36, %38, %cst_52 {dimension_numbers = #tpu.dot_dimension_numbers<[1], [0], [0], [1], [0, 0, 1, 1], [], []>} : vector<16x256xbf16>, vector<256x128xbf16>, vector<16x128xf32> -> vector<16x128xf32>
    %c0_53 = arith.constant 0 : index
    %c0_54 = arith.constant 0 : index
    %40 = vector.load %arg7[%c0_53, %c0_54] : memref<16x128xf32, #tpu.memory_space<vmem>>, vector<16x128xf32>
    %41 = arith.addf %40, %39 : vector<16x128xf32>
    %c0_55 = arith.constant 0 : index
    %c0_56 = arith.constant 0 : index
    %42 = vector.load %arg7[%c0_55, %c0_56] : memref<16x128xf32, #tpu.memory_space<vmem>>, vector<16x128xf32>
    tpu.vector_store %arg7[%c0_55, %c0_56], %41 {strides = array<i32>} : memref<16x128xf32, #tpu.memory_space<vmem>>, vector<16x128xf32>,
    %c0_57 = arith.constant 0 : index
    %c0_58 = arith.constant 0 : index
    %43 = vector.load %arg7[%c0_57, %c0_58] : memref<16x128xf32, #tpu.memory_space<vmem>>, vector<16x128xf32>
    %c0_59 = arith.constant 0 : index
    %c0_60 = arith.constant 0 : index
    %44 = vector.load %arg5[%c0_59, %c0_60] : memref<1x128xf32, #tpu.memory_space<vmem>>, vector<1x128xf32>
    %45 = vector.broadcast %44 : vector<1x128xf32> to vector<16x128xf32>
    %46 = arith.addf %43, %45 : vector<16x128xf32>
    %47 = vector.shape_cast %46 : vector<16x128xf32> to vector<1x16x128xf32>
    %c0_61 = arith.constant 0 : index
    %c0_62 = arith.constant 0 : index
    %c0_63 = arith.constant 0 : index
    %c0_64 = arith.constant 0 : index
    %48 = vector.load %arg6[%c0_61, %c0_62, %c0_63, %c0_64] : memref<1x1x16x128xf32, #tpu.memory_space<vmem>>, vector<1x1x16x128xf32>
    %49 = vector.shape_cast %48 : vector<1x1x16x128xf32> to vector<1x16x128xf32>
    %50 = vector.shape_cast %47 : vector<1x16x128xf32> to vector<1x1x16x128xf32>
    tpu.vector_store %arg6[%c0_61, %c0_62, %c0_63, %c0_64], %50 {strides = array<i32>} : memref<1x1x16x128xf32, #tpu.memory_space<vmem>>, vector<1x1x16x128xf32>,
    return
  }
  func.func @transform_0(%arg0: i32, %arg1: i32) -> (i32, i32, i32, i32, i32) {
    %c0_i32 = arith.constant 0 : i32
    %c0_i32_0 = arith.constant 0 : i32
    %c0_i32_1 = arith.constant 0 : i32
    %c0_i32_2 = arith.constant 0 : i32
    return %arg0, %arg1, %c0_i32, %c0_i32_0, %c0_i32_1 : i32, i32, i32, i32, i32
  }
  func.func @transform_1(%arg0: i32, %arg1: i32) -> (i32, i32, i32, i32, i32) {
    %c0_i32 = arith.constant 0 : i32
    %c0_i32_0 = arith.constant 0 : i32
    %c0_i32_1 = arith.constant 0 : i32
    %c0_i32_2 = arith.constant 0 : i32
    return %arg0, %arg1, %c0_i32, %c0_i32_0, %c0_i32_1 : i32, i32, i32, i32, i32
  }
  func.func @transform_2(%arg0: i32, %arg1: i32) -> (i32, i32, i32) {
    %c0_i32 = arith.constant 0 : i32
    %c0_i32_0 = arith.constant 0 : i32
    %c0_i32_1 = arith.constant 0 : i32
    %c0_i32_2 = arith.constant 0 : i32
    return %c0_i32, %c0_i32_0, %c0_i32_1 : i32, i32, i32
  }
  func.func @transform_3(%arg0: i32, %arg1: i32) -> (i32, i32) {
    %c0_i32 = arith.constant 0 : i32
    %c0_i32_0 = arith.constant 0 : i32
    %c0_i32_1 = arith.constant 0 : i32
    return %c0_i32, %c0_i32_0 : i32, i32
  }
  func.func @transform_4(%arg0: i32, %arg1: i32) -> (i32, i32, i32, i32) {
    %c0_i32 = arith.constant 0 : i32
    %c0_i32_0 = arith.constant 0 : i32
    %c0_i32_1 = arith.constant 0 : i32
    return %arg0, %arg1, %c0_i32, %c0_i32_0 : i32, i32, i32, i32
  }
}

</mosaic_0001>

<bundles_post_ra>
// kernel: encoder_forward.4
= control target key start
LH: loop header
LB: loop body
LE: loop exit
PB: predicated region body
PF: predicated region fallthrough
CT: control target
= control target key end

     0   :  { %s1293_s18 = smov 0   ;;  %s1295_s19 = smov 0   ;;  %s1505_s0 = inlined_call_operand.vmem [shape: bf16[2,1,8,16,128], index: 0, kind: input, shape index: {}]   ;;  %s1506_s1 = inlined_call_operand.vmem [shape: bf16[1,128,128], index: 1, kind: input, shape index: {}]   ;;  %s1507_s2 = inlined_call_operand.vmem [shape: f32[1,128], index: 2, kind: input, shape index: {}]   ;;  %s1508_s3 = inlined_call_operand.vmem [shape: bf16[128,128], index: 3, kind: input, shape index: {}]   ;;  %s1509_s4 = inlined_call_operand.vmem [shape: f32[1,128], index: 4, kind: input, shape index: {}]   ;;  %s1510_s5 = inlined_call_operand.vmem [shape: bf16[2,8,16,128], index: 5, kind: output, shape index: {}]  }
   0x1   :  { %s1297_s20 = smov 0  }
   0x2 LB: > { %s27_s21 = sadd.s32 1, %s1257_s19  ;;  %p949_p0 = scmp.ge.s32.totalorder %s1261_s20, 1  ;;  %s1261_s20 = sphi %s1297_s20, %s15_s20   ;;  %s1257_s19 = sphi %s1295_s19, %s1512_s19   ;;  %s1253_s18 = sphi %s1293_s18, %s1511_s18  }
   0x3   : > { %p29_p1 = scmp.ge.s32.totalorder %s27_s21, 2  ;;  %p207_p2 = scmp.lt.s32.totalorder %s1261_s20, 3 }
   0x5   : > { %s1514_s21 = smov (%p29_p1, %s27_s21), 0  ;;  %p208_p3 = pnand %p949_p0, %p207_p2 }
   0x6   : > { %v1183_v0 = vld [vmem:[%s1506_s1] sm:$0xff] (!%p208_p3)   ;;  %p244_p4 = scmp.lt.s32.totalorder (!%p208_p3), %s1253_s18, 1  ;;  %v1184_v1 = vld [vmem:[%s1506_s1 + $0x8] sm:$0xff] (!%p208_p3)   ;;  %v1185_v2 = vld [vmem:[%s1506_s1 + $0x10] sm:$0xff] (!%p208_p3)  }
   0x7   : > { %211 = sbr.rel (%p208_p3) target bundleno = 518 (0x206), region = 40  ;;  %1095 = vmatprep.subr.bf16.mxu0 (!%p208_p3), %v1183_v0  ;;  %v1186_v3 = vld [vmem:[%s1506_s1 + $0x18] sm:$0xff] (!%p208_p3)   ;;  %v1187_v5 = vld [vmem:[%s1506_s1 + $0x20] sm:$0xff] (!%p208_p3)   ;;  %v1188_v6 = vld [vmem:[%s1506_s1 + $0x28] sm:$0xff] (!%p208_p3)  }
   0x8   : > { %1096 = vmatpush3.bf16.msra.mxu0 (!%p208_p3), %v1183_v0  ;;  %v1199_v7 = vld [vmem:[%s1508_s3] sm:$0xff] (!%p208_p3)   ;;  %v1200_v8 = vld [vmem:[%s1508_s3 + $0x8] sm:$0xff] (!%p208_p3)   ;;  %v1189_v9 = vld [vmem:[%s1506_s1 + $0x30] sm:$0xff] (!%p208_p3)  }
   0x9   : > { %1097 = vmatprep.subr.bf16.mxu0 (!%p208_p3), %v1184_v1  ;;  %1127 = vmatprep.subr.bf16.mxu1 (!%p208_p3), %v1199_v7  ;;  %v1201_v10 = vld [vmem:[%s1508_s3 + $0x10] sm:$0xff] (!%p208_p3)   ;;  %v1190_v11 = vld [vmem:[%s1506_s1 + $0x38] sm:$0xff] (!%p208_p3)   ;;  %v1203_v13 = vld [vmem:[%s1508_s3 + $0x20] sm:$0xff] (!%p208_p3)  }
   0xa   : > { %1128 = vmatpush3.bf16.msra.mxu1 (!%p208_p3), %v1199_v7  ;;  %v1202_v12 = vld [vmem:[%s1508_s3 + $0x18] sm:$0xff] (!%p208_p3)   ;;  %v1204_v16 = vld [vmem:[%s1508_s3 + $0x28] sm:$0xff] (!%p208_p3)   ;;  %v1205_v22 = vld [vmem:[%s1508_s3 + $0x30] sm:$0xff] (!%p208_p3)  }
   0xb   : > { %1129 = vmatprep.subr.bf16.mxu1 (!%p208_p3), %v1200_v8  ;;  %v1206_v23 = vld [vmem:[%s1508_s3 + $0x38] sm:$0xff] (!%p208_p3)   ;;  %v970_v24 = vld [vmem:[%s1507_s2] ss:$0 sm:$0xff] (!%p208_p3) }
   0xc   : > { %1098 = vmatpush3.bf16.msra.mxu0 (!%p208_p3), %v1184_v1 }
   0xd   : > { %1099 = vmatprep.subr.bf16.mxu0 (!%p208_p3), %v1185_v2 }
   0xe   : > { %s1516_s18 = smov (!%p244_p4, %s1253_s18), 1  ;;  %1130 = vmatpush3.bf16.msra.mxu1 %v1200_v8 }
   0xf   : > { %s998_s28 = sshll.u32 %s1516_s18, 6  ;;  %1131 = vmatprep.subr.bf16.mxu1 %v1201_v10 }
  0x10   : > { %s1328_s6 = scalar_lea.vmem %s1505_s0, %s998_s28  ;;  %1100 = vmatpush3.bf16.msra.mxu0 %v1185_v2  ;;  %s1465_s23 = scalar_lea.vmem %s1510_s5, %s998_s28 }
  0x11   : > { %v1191_v4 = vld [vmem:[%s1328_s6] sm:$0xff]   ;;  %1101 = vmatprep.subr.bf16.mxu0 %v1186_v3  ;;  %v1192_v14 = vld [vmem:[%s1328_s6 + $0x8] sm:$0xff]   ;;  %v1193_v15 = vld [vmem:[%s1328_s6 + $0x10] sm:$0xff]  }
  0x12   : > { %1111 = vmatprep.mubr.bf16.mxu0 %v1191_v4  ;;  %1132 = vmatpush3.bf16.msra.mxu1 %v1201_v10  ;;  %v1194_v17 = vld [vmem:[%s1328_s6 + $0x18] sm:$0xff]   ;;  %v1195_v18 = vld [vmem:[%s1328_s6 + $0x20] sm:$0xff]   ;;  %v1196_v19 = vld [vmem:[%s1328_s6 + $0x28] sm:$0xff]  }
  0x13   : > { %1133 = vmatprep.subr.bf16.mxu1 %v1202_v12  ;;  %v1197_v20 = vld [vmem:[%s1328_s6 + $0x30] sm:$0xff]   ;;  %v1198_v21 = vld [vmem:[%s1328_s6 + $0x38] sm:$0xff]  }
  0x14   : > { %1102 = vmatpush3.bf16.msra.mxu0 %v1186_v3 }
  0x15   : > { %1103 = vmatprep.subr.bf16.mxu0 %v1187_v5 }
  0x16   : > { %1134 = vmatpush3.bf16.msra.mxu1 %v1202_v12 }
  0x17   : > { %1135 = vmatprep.subr.bf16.mxu1 %v1203_v13 }
  0x18   : > { %1104 = vmatpush3.bf16.msra.mxu0 %v1187_v5 }
  0x19   : > { %1105 = vmatprep.subr.bf16.mxu0 %v1188_v6 }
  0x1a   : > { %1136 = vmatpush3.bf16.msra.mxu1 %v1203_v13 }
  0x1b   : > { %1137 = vmatprep.subr.bf16.mxu1 %v1204_v16 }
  0x1c   : > { %1106 = vmatpush3.bf16.msra.mxu0 %v1188_v6 }
  0x1d   : > { %1107 = vmatprep.subr.bf16.mxu0 %v1189_v9 }
  0x1e   : > { %1138 = vmatpush3.bf16.msra.mxu1 %v1204_v16 }
  0x1f   : > { %1139 = vmatprep.subr.bf16.mxu1 %v1205_v22 }
  0x20   : > { %1108 = vmatpush3.bf16.msra.mxu0 %v1189_v9 }
  0x21   : > { %1109 = vmatprep.subr.bf16.mxu0 %v1190_v11 }
  0x22   : > { %1140 = vmatpush3.bf16.msra.mxu1 %v1205_v22 }
  0x23   : > { %1141 = vmatprep.subr.bf16.mxu1 %v1206_v23 }
  0x24   : > { %1110 = vmatpush3.bf16.msra.mxu0 %v1190_v11 }
  0x26   : > { %1142 = vmatpush3.bf16.msra.mxu1 %v1206_v23 }
  0x27   : > { %1112 = vmatmul.mubr.bf16.vlgmr.msra.gmra.mrb[0].mxu0 %v1192_v14 }
  0x28   : > { %1115 = vmatprep.mubr.bf16.mxu0 %v1193_v15 }
  0x2f   : > { %1116 = vmatmul.mubr.bf16.gmra.mrb[4].mxu0 %v1194_v17  ;;  %v1447_v17 = vld [vmem:[%s1509_s4] ss:$0 sm:$0xff] }
  0x30   : > { %1119 = vmatprep.mubr.bf16.mxu0 %v1195_v18 }
  0x37   : > { %1120 = vmatmul.mubr.bf16.gmra.mrb[8].mxu0 %v1196_v19 }
  0x38   : > { %1123 = vmatprep.mubr.bf16.mxu0 %v1197_v20 }
  0x3f   : > { %1124 = vmatmul.mubr.bf16.gmra.mrb[12].mxu0 %v1198_v21 }
  0xfa   : > { %v1113_v25 = vpop.f32.mrb[0].mxu0 }
  0xfb   : > { %v427_v26 = vpop.f32.mrb[1].mxu0  ;;  %v1382_v29 = vadd.f32 %v1113_v25, %v970_v24 }
  0xfc   : > { %v1380_v27 = vadd.f32 %v970_v24, %v427_v26  ;;  %v1114_v28 = vpop.f32.mrb[2].mxu0 }
  0xfd   : > { %v1384_v30 = vadd.f32 %v1114_v28, %v970_v24  ;;  %v430_v31 = vpop.f32.mrb[3].mxu0  ;;  %v547_v36 = vmul.f32 %v1382_v29, %v1382_v29 }
  0xfe   : > { %v1386_v32 = vadd.f32 %v970_v24, %v430_v31  ;;  %v545_v34 = vmul.f32 %v1380_v27, %v1380_v27 }
  0xff   : > { %v548_v33 = vmul.f32 %v1384_v30, %v1384_v30 }
 0x100   : > { %v546_v35 = vmul.f32 %v1386_v32, %v1386_v32 }
 0x101   : > { %v562_v40 = vpack.c.bf16 %v548_v33, %v547_v36 }
 0x102   : > { %v1117_v37 = vpop.f32.mrb[4].mxu0  ;;  %v561_v38 = vpack.c.bf16 %v546_v35, %v545_v34 }
 0x103   : > { %v443_v39 = vpop.f32.mrb[5].mxu0  ;;  %v1398_v43 = vadd.f32 %v1117_v37, %v970_v24 }
 0x104   : > { %v1396_v41 = vadd.f32 %v970_v24, %v443_v39  ;;  %v1118_v42 = vpop.f32.mrb[6].mxu0  ;;  %1143 = vmatprep.mubr.bf16.mxu1 %v561_v38 }
 0x105   : > { %v1400_v44 = vadd.f32 %v1118_v42, %v970_v24  ;;  %v446_v45 = vpop.f32.mrb[7].mxu0  ;;  %1144 = vmatmul.mubr.bf16.vlgmr.msra.gmra.mrb[0].mxu1 %v562_v40  ;;  %v551_v50 = vmul.f32 %v1398_v43, %v1398_v43 }
 0x106   : > { %v1402_v46 = vadd.f32 %v970_v24, %v446_v45  ;;  %v549_v48 = vmul.f32 %v1396_v41, %v1396_v41 }
 0x107   : > { %v552_v47 = vmul.f32 %v1400_v44, %v1400_v44 }
 0x108   : > { %v550_v49 = vmul.f32 %v1402_v46, %v1402_v46 }
 0x109   : > { %v564_v54 = vpack.c.bf16 %v552_v47, %v551_v50 }
 0x10a   : > { %v1121_v51 = vpop.f32.mrb[8].mxu0  ;;  %v563_v52 = vpack.c.bf16 %v550_v49, %v549_v48 }
 0x10b   : > { %v459_v53 = vpop.f32.mrb[9].mxu0  ;;  %v1414_v57 = vadd.f32 %v1121_v51, %v970_v24 }
 0x10c   : > { %v1412_v55 = vadd.f32 %v970_v24, %v459_v53  ;;  %v1122_v56 = vpop.f32.mrb[10].mxu0  ;;  %1147 = vmatprep.mubr.bf16.mxu1 %v563_v52 }
 0x10d   : > { %v1416_v58 = vadd.f32 %v1122_v56, %v970_v24  ;;  %v462_v59 = vpop.f32.mrb[11].mxu0  ;;  %1148 = vmatmul.mubr.bf16.gmra.mrb[4].mxu1 %v564_v54  ;;  %v555_v0 = vmul.f32 %v1414_v57, %v1414_v57 }
 0x10e   : > { %v1418_v60 = vadd.f32 %v970_v24, %v462_v59  ;;  %v553_v62 = vmul.f32 %v1412_v55, %v1412_v55 }
 0x10f   : > { %v556_v61 = vmul.f32 %v1416_v58, %v1416_v58 }
 0x110   : > { %v554_v63 = vmul.f32 %v1418_v60, %v1418_v60 }
 0x111   : > { %v566_v4 = vpack.c.bf16 %v556_v61, %v555_v0 }
 0x112   : > { %v1125_v1 = vpop.f32.mrb[12].mxu0  ;;  %v565_v2 = vpack.c.bf16 %v554_v63, %v553_v62 }
 0x113   : > { %v475_v3 = vpop.f32.mrb[13].mxu0  ;;  %v1430_v7 = vadd.f32 %v1125_v1, %v970_v24 }
 0x114   : > { %v1428_v5 = vadd.f32 %v970_v24, %v475_v3  ;;  %v1126_v6 = vpop.f32.mrb[14].mxu0  ;;  %1151 = vmatprep.mubr.bf16.mxu1 %v565_v2 }
 0x115   : > { %v1432_v8 = vadd.f32 %v1126_v6, %v970_v24  ;;  %v478_v9 = vpop.f32.mrb[15].mxu0  ;;  %1152 = vmatmul.mubr.bf16.gmra.mrb[8].mxu1 %v566_v4  ;;  %v559_v14 = vmul.f32 %v1430_v7, %v1430_v7 }
 0x116   : > { %v1434_v10 = vadd.f32 %v970_v24, %v478_v9  ;;  %v557_v12 = vmul.f32 %v1428_v5, %v1428_v5 }
 0x117   : > { %v560_v11 = vmul.f32 %v1432_v8, %v1432_v8 }
 0x118   : > { %v558_v13 = vmul.f32 %v1434_v10, %v1434_v10 }
 0x119   : > { %v568_v16 = vpack.c.bf16 %v560_v11, %v559_v14 }
 0x11a   : > { %v567_v15 = vpack.c.bf16 %v558_v13, %v557_v12 }
 0x11c   : > { %1155 = vmatprep.mubr.bf16.mxu1 %v567_v15 }
 0x11d   : > { %1156 = vmatmul.mubr.bf16.gmra.mrb[12].mxu1 %v568_v16 }
 0x1d8   : > { %v1145_v18 = vpop.f32.mrb[0].mxu1 }
 0x1d9   : > { %v683_v19 = vadd.f32 %v1145_v18, %v1447_v17  ;;  %v674_v20 = vpop.f32.mrb[1].mxu1 }
 0x1da   : > { %v675_v21 = vadd.f32 %v1447_v17, %v674_v20  ;;  %v1146_v22 = vpop.f32.mrb[2].mxu1 }
 0x1db   : > { %1207 = vrsqrt.f32 %v683_v19  ;;  %v686_v23 = vadd.f32 %v1146_v22, %v1447_v17  ;;  %v677_v24 = vpop.f32.mrb[3].mxu1 }
 0x1dc   : > { %1209 = vrsqrt.f32 %v675_v21  ;;  %v678_v25 = vadd.f32 %v1447_v17, %v677_v24 }
 0x1dd   : > { %1211 = vrsqrt.f32 %v686_v23 }
 0x1de   : > { %1213 = vrsqrt.f32 %v678_v25 }
 0x1e0   : > { %v1149_v26 = vpop.f32.mrb[4].mxu1 }
 0x1e1   : > { %v699_v28 = vadd.f32 %v1149_v26, %v1447_v17  ;;  %v690_v31 = vpop.f32.mrb[5].mxu1 }
 0x1e2   : > { %v691_v33 = vadd.f32 %v1447_v17, %v690_v31  ;;  %v1150_v34 = vpop.f32.mrb[6].mxu1 }
 0x1e3   : > { %1215 = vrsqrt.f32 %v699_v28  ;;  %v702_v35 = vadd.f32 %v1150_v34, %v1447_v17  ;;  %v693_v36 = vpop.f32.mrb[7].mxu1 }
 0x1e4   : > { %1217 = vrsqrt.f32 %v691_v33  ;;  %v694_v37 = vadd.f32 %v1447_v17, %v693_v36 }
 0x1e5   : > { %v1208_v38 = vpop.eup %1207  ;;  %1219 = vrsqrt.f32 %v702_v35 }
 0x1e6   : > { %v1210_v39 = vpop.eup %1209  ;;  %1221 = vrsqrt.f32 %v694_v37  ;;  %v755_v45 = vmul.f32 %v1208_v38, %v1382_v29 }
 0x1e7   : > { %v1212_v40 = vpop.eup %1211  ;;  %v753_v49 = vmul.f32 %v1210_v39, %v1380_v27 }
 0x1e8   : > { %v1214_v42 = vpop.eup %1213  ;;  %v756_v47 = vmul.f32 %v1212_v40, %v1384_v30  ;;  %v1153_v48 = vpop.f32.mrb[8].mxu1 }
 0x1e9   : > { %v754_v50 = vmul.f32 %v1214_v42, %v1386_v32  ;;  %v715_v51 = vadd.f32 %v1153_v48, %v1447_v17  ;;  %v706_v52 = vpop.f32.mrb[9].mxu1 }
 0x1ea   : > { %v1024_v53 = vpack.c.bf16 %v756_v47, %v755_v45  ;;  %v707_v29 = vadd.f32 %v1447_v17, %v706_v52  ;;  %v1154_v30 = vpop.f32.mrb[10].mxu1 }
 0x1eb   : > { %v1019_v54 = vpack.c.bf16 %v754_v50, %v753_v49  ;;  %1223 = vrsqrt.f32 %v715_v51  ;;  %v718_v27 = vadd.f32 %v1154_v30, %v1447_v17  ;;  %v709_v56 = vpop.f32.mrb[11].mxu1 }
 0x1ec   : > { %1056 = vst [vmem:[%s1465_s23 + $0x8] sm:$0xff] %v1024_v53   ;;  %1225 = vrsqrt.f32 %v707_v29  ;;  %v710_v59 = vadd.f32 %v1447_v17, %v709_v56 }
 0x1ed   : > { %v1216_v61 = vpop.eup %1215  ;;  %1020 = vst [vmem:[%s1465_s23] sm:$0xff] %v1019_v54   ;;  %1227 = vrsqrt.f32 %v718_v27 }
 0x1ee   : > { %v1218_v32 = vpop.eup %1217  ;;  %1229 = vrsqrt.f32 %v710_v59  ;;  %v759_v0 = vmul.f32 %v1216_v61, %v1398_v43 }
 0x1ef   : > { %v1220_v62 = vpop.eup %1219  ;;  %v757_v3 = vmul.f32 %v1218_v32, %v1396_v41 }
 0x1f0   : > { %v1222_v63 = vpop.eup %1221  ;;  %v760_v1 = vmul.f32 %v1220_v62, %v1400_v44  ;;  %v1157_v2 = vpop.f32.mrb[12].mxu1 }
 0x1f1   : > { %v758_v4 = vmul.f32 %v1222_v63, %v1402_v46  ;;  %v731_v6 = vadd.f32 %v1157_v2, %v1447_v17  ;;  %v722_v9 = vpop.f32.mrb[13].mxu1 }
 0x1f2   : > { %v1034_v11 = vpack.c.bf16 %v760_v1, %v759_v0  ;;  %v723_v12 = vadd.f32 %v1447_v17, %v722_v9  ;;  %v1158_v13 = vpop.f32.mrb[14].mxu1 }
 0x1f3   : > { %v1029_v14 = vpack.c.bf16 %v758_v4, %v757_v3  ;;  %1231 = vrsqrt.f32 %v731_v6  ;;  %v734_v15 = vadd.f32 %v1158_v13, %v1447_v17  ;;  %v725_v43 = vpop.f32.mrb[15].mxu1 }
 0x1f4   : > { %1058 = vst [vmem:[%s1465_s23 + $0x18] sm:$0xff] %v1034_v11   ;;  %1233 = vrsqrt.f32 %v723_v12  ;;  %v726_v44 = vadd.f32 %v1447_v17, %v725_v43 }
 0x1f5   : > { %v1224_v41 = vpop.eup %1223  ;;  %1057 = vst [vmem:[%s1465_s23 + $0x10] sm:$0xff] %v1029_v14   ;;  %1235 = vrsqrt.f32 %v734_v15 }
 0x1f6   : > { %v1226_v46 = vpop.eup %1225  ;;  %1237 = vrsqrt.f32 %v726_v44  ;;  %v763_v19 = vmul.f32 %v1224_v41, %v1414_v57 }
 0x1f7   : > { %v1228_v16 = vpop.eup %1227  ;;  %v761_v21 = vmul.f32 %v1226_v46, %v1412_v55 }
 0x1f8   : > { %v1230_v18 = vpop.eup %1229  ;;  %v764_v20 = vmul.f32 %v1228_v16, %v1416_v58 }
 0x1f9   : > { %v762_v22 = vmul.f32 %v1230_v18, %v1418_v60 }
 0x1fa   : > { %v1044_v23 = vpack.c.bf16 %v764_v20, %v763_v19 }
 0x1fb   : > { %v1039_v17 = vpack.c.bf16 %v762_v22, %v761_v21 }
 0x1fc   : > { %1060 = vst [vmem:[%s1465_s23 + $0x28] sm:$0xff] %v1044_v23  }
 0x1fd   : > { %v1232_v24 = vpop.eup %1231  ;;  %1059 = vst [vmem:[%s1465_s23 + $0x20] sm:$0xff] %v1039_v17  }
 0x1fe   : > { %v1234_v25 = vpop.eup %1233  ;;  %v767_v31 = vmul.f32 %v1232_v24, %v1430_v7 }
 0x1ff   : > { %v1236_v26 = vpop.eup %1235  ;;  %v765_v58 = vmul.f32 %v1234_v25, %v1428_v5 }
 0x200   : > { %v1238_v28 = vpop.eup %1237  ;;  %v768_v57 = vmul.f32 %v1236_v26, %v1432_v8 }
 0x201   : > { %v766_v55 = vmul.f32 %v1238_v28, %v1434_v10 }
 0x202   : > { %v1054_v33 = vpack.c.bf16 %v768_v57, %v767_v31 }
 0x203   : > { %v1049_v34 = vpack.c.bf16 %v766_v55, %v765_v58 }
 0x204   : > { %1062 = vst [vmem:[%s1465_s23 + $0x38] sm:$0xff] %v1054_v33  }
 0x205   : > { %1061 = vst [vmem:[%s1465_s23 + $0x30] sm:$0xff] %v1049_v34  }
 0x206 PF: > { %s15_s20 = sadd.s32 1, %s1261_s20   ;;  %s1511_s18 = smov %s1257_s19 }
 0x207   : > { %p12_p5 = scmp.ge.s32.totalorder %s15_s20, 4   ;;  %s1512_s19 = smov %s1514_s21 }
 0x209   :  { %14 = sbr.rel (!%p12_p5) target bundleno = 2 (0x2), region = 70 }

// kernel: encoder_forward.5
= control target key start
LH: loop header
LB: loop body
LE: loop exit
PB: predicated region body
PF: predicated region fallthrough
CT: control target
= control target key end

     0   :  { %s2776_s21 = smov 0   ;;  %s2778_s22 = smov 0   ;;  %s3172_s0 = inlined_call_operand.vmem [shape: bf16[2,1,6,16,256], index: 0, kind: input, shape index: {}]   ;;  %s3173_s1 = inlined_call_operand.vmem [shape: bf16[2,1,6,16,256], index: 1, kind: input, shape index: {}]   ;;  %s3174_s2 = inlined_call_operand.vmem [shape: bf16[5,256,128], index: 2, kind: input, shape index: {}]   ;;  %s3175_s3 = inlined_call_operand.vmem [shape: f32[1,128], index: 3, kind: input, shape index: {}]   ;;  %s3176_s4 = inlined_call_operand.vmem [shape: bf16[128,128], index: 4, kind: input, shape index: {}]   ;;  %s3177_s5 = inlined_call_operand.vmem [shape: f32[1,128], index: 5, kind: input, shape index: {}]   ;;  %s3178_s6 = inlined_call_operand.vmem [shape: bf16[2,4,16,128], index: 6, kind: output, shape index: {}]  }
   0x1   :  { %s2780_s23 = smov 0  }
   0x2 LB: > { %s28_s24 = sadd.s32 1, %s2735_s22  ;;  %p1990_p0 = scmp.ge.s32.totalorder %s2739_s23, 1  ;;  %s2739_s23 = sphi %s2780_s23, %s16_s23   ;;  %s2735_s22 = sphi %s2778_s22, %s3180_s22   ;;  %s2731_s21 = sphi %s2776_s21, %s3179_s21  }
   0x3   : > { %p30_p1 = scmp.ge.s32.totalorder %s28_s24, 2  ;;  %p248_p2 = scmp.lt.s32.totalorder %s2739_s23, 3 }
   0x5   : > { %s3182_s24 = smov (%p30_p1, %s28_s24), 0  ;;  %p249_p3 = pnand %p1990_p0, %p248_p2 }
   0x6   : > { %v2580_v0 = vld [vmem:[%s3174_s2 + $0x40] sm:$0xff] (!%p249_p3)   ;;  %v2584_v4 = vld [vmem:[%s3174_s2 + $0x48] sm:$0xff] (!%p249_p3)   ;;  %v2588_v8 = vld [vmem:[%s3174_s2 + $0x50] sm:$0xff] (!%p249_p3)   ;;  %p296_p4 = scmp.lt.s32.totalorder (!%p249_p3), %s2731_s21, 1 }
   0x7   : > { %252 = sbr.rel (%p249_p3) target bundleno = 587 (0x24b), region = 44  ;;  %v2581_v1 = vld [vmem:[%s3174_s2 + $0xc0] sm:$0xff] (!%p249_p3)   ;;  %2319 = vmatprep.subr.bf16.mxu0 (!%p249_p3), %v2580_v0  ;;  %v2585_v5 = vld [vmem:[%s3174_s2 + $0xc8] sm:$0xff] (!%p249_p3)   ;;  %v2589_v9 = vld [vmem:[%s3174_s2 + $0xd0] sm:$0xff] (!%p249_p3)  }
   0x8   : > { %v2582_v2 = vld [vmem:[%s3174_s2] sm:$0xff] (!%p249_p3)   ;;  %2359 = vmatprep.subr.bf16.mxu1 (!%p249_p3), %v2581_v1  ;;  %v2586_v6 = vld [vmem:[%s3174_s2 + $0x8] sm:$0xff] (!%p249_p3)   ;;  %v2590_v10 = vld [vmem:[%s3174_s2 + $0x10] sm:$0xff] (!%p249_p3)  }
   0x9   : > { %v2583_v3 = vld [vmem:[%s3174_s2 + $0x80] sm:$0xff] (!%p249_p3)   ;;  %2320 = vmatpush3.bf16.msra.mxu0 (!%p249_p3), %v2582_v2  ;;  %v2587_v7 = vld [vmem:[%s3174_s2 + $0x88] sm:$0xff] (!%p249_p3)   ;;  %v2591_v11 = vld [vmem:[%s3174_s2 + $0x90] sm:$0xff] (!%p249_p3)  }
   0xa   : > { %2360 = vmatpush3.bf16.msra.mxu1 (!%p249_p3), %v2583_v3  ;;  %2321 = vmatprep.subr.bf16.mxu0 (!%p249_p3), %v2584_v4  ;;  %v2592_v12 = vld [vmem:[%s3174_s2 + $0x58] sm:$0xff] (!%p249_p3)   ;;  %v2596_v16 = vld [vmem:[%s3174_s2 + $0x60] sm:$0xff] (!%p249_p3)   ;;  %v2600_v20 = vld [vmem:[%s3174_s2 + $0x68] sm:$0xff] (!%p249_p3)  }
   0xb   : > { %2361 = vmatprep.subr.bf16.mxu1 (!%p249_p3), %v2585_v5  ;;  %v2593_v13 = vld [vmem:[%s3174_s2 + $0xd8] sm:$0xff] (!%p249_p3)   ;;  %v2597_v17 = vld [vmem:[%s3174_s2 + $0xe0] sm:$0xff] (!%p249_p3)   ;;  %v2601_v21 = vld [vmem:[%s3174_s2 + $0xe8] sm:$0xff] (!%p249_p3)  }
   0xc   : > { %v2594_v14 = vld [vmem:[%s3174_s2 + $0x18] sm:$0xff] (!%p249_p3)   ;;  %v2598_v18 = vld [vmem:[%s3174_s2 + $0x20] sm:$0xff] (!%p249_p3)   ;;  %v2602_v22 = vld [vmem:[%s3174_s2 + $0x28] sm:$0xff] (!%p249_p3)  }
   0xd   : > { %2322 = vmatpush3.bf16.msra.mxu0 (!%p249_p3), %v2586_v6  ;;  %v2595_v15 = vld [vmem:[%s3174_s2 + $0x98] sm:$0xff] (!%p249_p3)   ;;  %v2599_v19 = vld [vmem:[%s3174_s2 + $0xa0] sm:$0xff] (!%p249_p3)   ;;  %v2603_v23 = vld [vmem:[%s3174_s2 + $0xa8] sm:$0xff] (!%p249_p3)  }
   0xe   : > { %2362 = vmatpush3.bf16.msra.mxu1 %v2587_v7  ;;  %2323 = vmatprep.subr.bf16.mxu0 %v2588_v8  ;;  %s3184_s21 = smov (!%p296_p4, %s2731_s21), 1  ;;  %v2604_v24 = vld [vmem:[%s3174_s2 + $0x70] sm:$0xff]   ;;  %v2608_v28 = vld [vmem:[%s3174_s2 + $0x78] sm:$0xff]   ;;  %v2618_v36 = vld [vmem:[%s3174_s2 + $0x140] sm:$0xff]  }
   0xf   : > { %2363 = vmatprep.subr.bf16.mxu1 %v2589_v9  ;;  %v2605_v25 = vld [vmem:[%s3174_s2 + $0xf0] sm:$0xff]   ;;  %s2555_s13 = smul.u32 96, %s3184_s21  ;;  %v2609_v29 = vld [vmem:[%s3174_s2 + $0xf8] sm:$0xff]   ;;  %v2619_v37 = vld [vmem:[%s3174_s2 + $0x100] sm:$0xff]  }
  0x10   : > { %v2606_v26 = vld [vmem:[%s3174_s2 + $0x30] sm:$0xff]   ;;  %v2610_v30 = vld [vmem:[%s3174_s2 + $0x38] sm:$0xff]   ;;  %v2620_v38 = vld [vmem:[%s3174_s2 + $0x1c0] sm:$0xff]  }
  0x11   : > { %2324 = vmatpush3.bf16.msra.mxu0 %v2590_v10  ;;  %v2607_v27 = vld [vmem:[%s3174_s2 + $0xb0] sm:$0xff]   ;;  %s2894_s28 = scalar_lea.vmem %s3172_s0, %s2555_s13  ;;  %v2611_v31 = vld [vmem:[%s3174_s2 + $0xb8] sm:$0xff]   ;;  %s2905_s11 = scalar_lea.vmem %s3173_s1, %s2555_s13  ;;  %v2621_v39 = vld [vmem:[%s3174_s2 + $0x180] sm:$0xff]  }
  0x12   : > { %2364 = vmatpush3.bf16.msra.mxu1 %v2591_v11  ;;  %2325 = vmatprep.subr.bf16.mxu0 %v2592_v12  ;;  %v2612_v32 = vld [vmem:[%s2894_s28] ss:$8 sps:$4 sm:$0xff]   ;;  %v2614_v33 = vld [vmem:[%s2894_s28 + $0x4] ss:$8 sps:$4 sm:$0xff]   ;;  %v2625_v43 = vld [vmem:[%s2894_s28 + $0x14] ss:$8 sps:$4 sm:$0xff]  }
  0x13   : > { %2365 = vmatprep.subr.bf16.mxu1 %v2593_v13  ;;  %v2615_v34 = vld [vmem:[%s2905_s11] ss:$8 sps:$4 sm:$0xff]   ;;  %v2617_v35 = vld [vmem:[%s2905_s11 + $0x4] ss:$8 sps:$4 sm:$0xff]   ;;  %534 = vmatprep.mubr.bf16.mxu0 %v2614_v33  ;;  %v2934_v44 = vld [vmem:[%s2905_s11 + $0x14] ss:$8 sps:$4 sm:$0xff]  }
  0x14   : > { %784 = vmatprep.mubr.bf16.mxu1 %v2617_v35  ;;  %v2622_v40 = vld [vmem:[%s3174_s2 + $0x148] sm:$0xff]   ;;  %v2940_v46 = vld [vmem:[%s2894_s28 + $0x10] ss:$8 sps:$4 sm:$0xff]   ;;  %v2646_v60 = vld [vmem:[%s3174_s2 + $0x160] sm:$0xff]  }
  0x15   : > { %2326 = vmatpush3.bf16.msra.mxu0 %v2594_v14  ;;  %v2623_v41 = vld [vmem:[%s3174_s2 + $0x108] sm:$0xff]   ;;  %v2944_v47 = vld [vmem:[%s2905_s11 + $0x10] ss:$8 sps:$4 sm:$0xff]   ;;  %v2647_v61 = vld [vmem:[%s3174_s2 + $0x120] sm:$0xff]  }
  0x16   : > { %2366 = vmatpush3.bf16.msra.mxu1 %v2595_v15  ;;  %2327 = vmatprep.subr.bf16.mxu0 %v2596_v16  ;;  %v2624_v42 = vld [vmem:[%s3174_s2 + $0x1c8] sm:$0xff]   ;;  %v2632_v48 = vld [vmem:[%s3174_s2 + $0x150] sm:$0xff]   ;;  %v2636_v52 = vld [vmem:[%s3174_s2 + $0x158] sm:$0xff]  }
  0x17   : > { %2367 = vmatprep.subr.bf16.mxu1 %v2597_v17  ;;  %v2629_v45 = vld [vmem:[%s3174_s2 + $0x188] sm:$0xff]   ;;  %v2633_v49 = vld [vmem:[%s3174_s2 + $0x110] sm:$0xff]   ;;  %v2637_v53 = vld [vmem:[%s3174_s2 + $0x118] sm:$0xff]  }
  0x18   : > { %v2634_v50 = vld [vmem:[%s3174_s2 + $0x1d0] sm:$0xff]   ;;  %v2638_v54 = vld [vmem:[%s3174_s2 + $0x1d8] sm:$0xff]   ;;  %v2970_v55 = vld [vmem:[%s2894_s28 + $0x24] ss:$8 sps:$4 sm:$0xff]  }
  0x19   : > { %2328 = vmatpush3.bf16.msra.mxu0 %v2598_v18  ;;  %v2635_v51 = vld [vmem:[%s3174_s2 + $0x190] sm:$0xff]   ;;  %v2641_v56 = vld [vmem:[%s2905_s11 + $0x24] ss:$8 sps:$4 sm:$0xff]   ;;  %v2643_v57 = vld [vmem:[%s3174_s2 + $0x198] sm:$0xff]  }
  0x1a   : > { %2368 = vmatpush3.bf16.msra.mxu1 %v2599_v19  ;;  %2329 = vmatprep.subr.bf16.mxu0 %v2600_v20  ;;  %v2978_v58 = vld [vmem:[%s2894_s28 + $0x20] ss:$8 sps:$4 sm:$0xff]   ;;  %v3007_v3 = vld [vmem:[%s2894_s28 + $0x34] ss:$8 sps:$4 sm:$0xff]   ;;  %v3015_v6 = vld [vmem:[%s2894_s28 + $0x30] ss:$8 sps:$4 sm:$0xff]  }
  0x1b   : > { %2369 = vmatprep.subr.bf16.mxu1 %v2601_v21  ;;  %v2981_v59 = vld [vmem:[%s2905_s11 + $0x20] ss:$8 sps:$4 sm:$0xff]   ;;  %v2655_v4 = vld [vmem:[%s2905_s11 + $0x34] ss:$8 sps:$4 sm:$0xff]   ;;  %v2659_v7 = vld [vmem:[%s2905_s11 + $0x30] ss:$8 sps:$4 sm:$0xff]  }
  0x1c   : > { %v2648_v62 = vld [vmem:[%s3174_s2 + $0x1e0] sm:$0xff]   ;;  %v2650_v0 = vld [vmem:[%s3174_s2 + $0x168] sm:$0xff]   ;;  %v2660_v8 = vld [vmem:[%s3174_s2 + $0x170] sm:$0xff]  }
  0x1d   : > { %2330 = vmatpush3.bf16.msra.mxu0 %v2602_v22  ;;  %v2649_v63 = vld [vmem:[%s3174_s2 + $0x1a0] sm:$0xff]   ;;  %v2651_v1 = vld [vmem:[%s3174_s2 + $0x128] sm:$0xff]   ;;  %v2661_v9 = vld [vmem:[%s3174_s2 + $0x130] sm:$0xff]  }
  0x1e   : > { %2370 = vmatpush3.bf16.msra.mxu1 %v2603_v23  ;;  %2331 = vmatprep.subr.bf16.mxu0 %v2604_v24  ;;  %v2652_v2 = vld [vmem:[%s3174_s2 + $0x1e8] sm:$0xff]   ;;  %v2662_v10 = vld [vmem:[%s3174_s2 + $0x1f0] sm:$0xff]   ;;  %v2664_v12 = vld [vmem:[%s3174_s2 + $0x178] sm:$0xff]  }
  0x1f   : > { %2371 = vmatprep.subr.bf16.mxu1 %v2605_v25  ;;  %v2657_v5 = vld [vmem:[%s3174_s2 + $0x1a8] sm:$0xff]   ;;  %v2663_v11 = vld [vmem:[%s3174_s2 + $0x1b0] sm:$0xff]   ;;  %v2665_v13 = vld [vmem:[%s3174_s2 + $0x138] sm:$0xff]  }
  0x20   : > { %v2666_v14 = vld [vmem:[%s3174_s2 + $0x1f8] sm:$0xff]   ;;  %v2668_v16 = vld [vmem:[%s3174_s2 + $0x240] sm:$0xff]   ;;  %v2670_v18 = vld [vmem:[%s3174_s2 + $0x248] sm:$0xff]  }
  0x21   : > { %2332 = vmatpush3.bf16.msra.mxu0 %v2606_v26  ;;  %v2667_v15 = vld [vmem:[%s3174_s2 + $0x1b8] sm:$0xff]   ;;  %v2669_v17 = vld [vmem:[%s3174_s2 + $0x200] sm:$0xff]   ;;  %v2671_v19 = vld [vmem:[%s3174_s2 + $0x208] sm:$0xff]  }
  0x22   : > { %2372 = vmatpush3.bf16.msra.mxu1 %v2607_v27  ;;  %2333 = vmatprep.subr.bf16.mxu0 %v2608_v28  ;;  %v2672_v20 = vld [vmem:[%s3174_s2 + $0x250] sm:$0xff]   ;;  %v2674_v22 = vld [vmem:[%s3174_s2 + $0x258] sm:$0xff]   ;;  %v2676_v24 = vld [vmem:[%s3174_s2 + $0x260] sm:$0xff]  }
  0x23   : > { %2373 = vmatprep.subr.bf16.mxu1 %v2609_v29  ;;  %v2673_v21 = vld [vmem:[%s3174_s2 + $0x210] sm:$0xff]   ;;  %v2675_v23 = vld [vmem:[%s3174_s2 + $0x218] sm:$0xff]   ;;  %v2677_v25 = vld [vmem:[%s3174_s2 + $0x220] sm:$0xff]  }
  0x24   : > { %v2680_v26 = vld [vmem:[%s2894_s28 + $0x44] ss:$8 sps:$4 sm:$0xff]   ;;  %v2687_v33 = vld [vmem:[%s2905_s11 + $0x40] ss:$8 sps:$4 sm:$0xff]   ;;  %v2689_v35 = vld [vmem:[%s3174_s2 + $0x238] sm:$0xff]  }
  0x25   : > { %2334 = vmatpush3.bf16.msra.mxu0 %v2610_v30  ;;  %v2678_v27 = vld [vmem:[%s3174_s2 + $0x268] sm:$0xff]   ;;  %v2683_v30 = vld [vmem:[%s3174_s2 + $0x270] sm:$0xff]  }
  0x26   : > { %2374 = vmatpush3.bf16.msra.mxu1 %v2611_v31  ;;  %2399 = vmatprep.subr.bf16.mxu0 %v2618_v36  ;;  %v2684_v28 = vld [vmem:[%s2905_s11 + $0x44] ss:$8 sps:$4 sm:$0xff]   ;;  %v2682_v31 = vld [vmem:[%s2894_s28 + $0x40] ss:$8 sps:$4 sm:$0xff]   ;;  %v2690_v36 = vld [vmem:[%s2894_s28 + $0x54] ss:$8 sps:$4 sm:$0xff]  }
  0x27   : > { %2439 = vmatprep.subr.bf16.mxu1 %v2620_v38  ;;  %v2679_v29 = vld [vmem:[%s3174_s2 + $0x228] sm:$0xff]   ;;  %v2693_v38 = vld [vmem:[%s3176_s4] sm:$0xff]   ;;  %s2287_s11 = sshll.u32 %s3184_s21, 5 }
  0x28   : > { %535 = vmatmul.mubr.bf16.vlgmr.msra.gmra.mrb[0].mxu0 %v2612_v32  ;;  %v2686_v32 = vld [vmem:[%s3174_s2 + $0x230] sm:$0xff]   ;;  %s323_s20 = scalar_lea.vmem %s3178_s6, %s2287_s11 }
  0x29   : > { %785 = vmatmul.mubr.bf16.vlgmr.msra.gmra.mrb[0].mxu1 %v2615_v34  ;;  %2400 = vmatpush3.bf16.msra.mxu0 %v2619_v37  ;;  %v2688_v34 = vld [vmem:[%s3174_s2 + $0x278] sm:$0xff]  }
  0x2a   : > { %2440 = vmatpush3.bf16.msra.mxu1 %v2621_v39  ;;  %2401 = vmatprep.subr.bf16.mxu0 %v2622_v40  ;;  %v2692_v37 = vld [vmem:[%s2894_s28 + $0x50] ss:$8 sps:$4 sm:$0xff]   ;;  %v2694_v39 = vld [vmem:[%s3176_s4 + $0x8] sm:$0xff]  }
  0x2b   : > { %2441 = vmatprep.subr.bf16.mxu1 %v2624_v42  ;;  %542 = vmatprep.mubr.bf16.mxu0 %v2625_v43  ;;  %v2695_v40 = vld [vmem:[%s3176_s4 + $0x10] sm:$0xff]   ;;  %v2697_v42 = vld [vmem:[%s3176_s4 + $0x20] sm:$0xff]  }
  0x2c   : > { %792 = vmatprep.mubr.bf16.mxu1 %v2934_v44 }
  0x2d   : > { %2402 = vmatpush3.bf16.msra.mxu0 %v2623_v41  ;;  %v2696_v41 = vld [vmem:[%s3176_s4 + $0x18] sm:$0xff]  }
  0x2e   : > { %2442 = vmatpush3.bf16.msra.mxu1 %v2629_v45  ;;  %2403 = vmatprep.subr.bf16.mxu0 %v2632_v48  ;;  %v2700_v45 = vld [vmem:[%s3176_s4 + $0x38] sm:$0xff]  }
  0x2f   : > { %2443 = vmatprep.subr.bf16.mxu1 %v2634_v50 }
  0x30   : > { %543 = vmatmul.mubr.bf16.gmra.mrb[4].mxu0 %v2940_v46 }
  0x31   : > { %793 = vmatmul.mubr.bf16.gmra.mrb[4].mxu1 %v2944_v47  ;;  %2404 = vmatpush3.bf16.msra.mxu0 %v2633_v49 }
  0x32   : > { %2444 = vmatpush3.bf16.msra.mxu1 %v2635_v51  ;;  %2405 = vmatprep.subr.bf16.mxu0 %v2636_v52 }
  0x33   : > { %2445 = vmatprep.subr.bf16.mxu1 %v2638_v54  ;;  %550 = vmatprep.mubr.bf16.mxu0 %v2970_v55 }
  0x34   : > { %800 = vmatprep.mubr.bf16.mxu1 %v2641_v56 }
  0x35   : > { %2406 = vmatpush3.bf16.msra.mxu0 %v2637_v53 }
  0x36   : > { %2446 = vmatpush3.bf16.msra.mxu1 %v2643_v57  ;;  %2407 = vmatprep.subr.bf16.mxu0 %v2646_v60 }
  0x37   : > { %2447 = vmatprep.subr.bf16.mxu1 %v2648_v62 }
  0x38   : > { %551 = vmatmul.mubr.bf16.gmra.mrb[8].mxu0 %v2978_v58 }
  0x39   : > { %801 = vmatmul.mubr.bf16.gmra.mrb[8].mxu1 %v2981_v59  ;;  %2408 = vmatpush3.bf16.msra.mxu0 %v2647_v61 }
  0x3a   : > { %2448 = vmatpush3.bf16.msra.mxu1 %v2649_v63  ;;  %2409 = vmatprep.subr.bf16.mxu0 %v2650_v0 }
  0x3b   : > { %2449 = vmatprep.subr.bf16.mxu1 %v2652_v2  ;;  %558 = vmatprep.mubr.bf16.mxu0 %v3007_v3 }
  0x3c   : > { %808 = vmatprep.mubr.bf16.mxu1 %v2655_v4 }
  0x3d   : > { %2410 = vmatpush3.bf16.msra.mxu0 %v2651_v1 }
  0x3e   : > { %2450 = vmatpush3.bf16.msra.mxu1 %v2657_v5  ;;  %2411 = vmatprep.subr.bf16.mxu0 %v2660_v8 }
  0x3f   : > { %2451 = vmatprep.subr.bf16.mxu1 %v2662_v10 }
  0x40   : > { %559 = vmatmul.mubr.bf16.gmra.mrb[12].mxu0 %v3015_v6 }
  0x41   : > { %809 = vmatmul.mubr.bf16.gmra.mrb[12].mxu1 %v2659_v7  ;;  %1051 = vmatprep.mubr.bf16.mxu0 %v2625_v43  ;;  %v2698_v43 = vld [vmem:[%s3176_s4 + $0x28] sm:$0xff]  }
  0x42   : > { %2412 = vmatpush3.bf16.msra.mxu0 %v2661_v9  ;;  %1318 = vmatprep.mubr.bf16.mxu1 %v2934_v44  ;;  %v2699_v44 = vld [vmem:[%s3176_s4 + $0x30] sm:$0xff]  }
  0x43   : > { %2452 = vmatpush3.bf16.msra.mxu1 %v2663_v11  ;;  %2413 = vmatprep.subr.bf16.mxu0 %v2664_v12 }
  0x44   : > { %2453 = vmatprep.subr.bf16.mxu1 %v2666_v14 }
  0x46   : > { %2414 = vmatpush3.bf16.msra.mxu0 %v2665_v13 }
  0x47   : > { %2454 = vmatpush3.bf16.msra.mxu1 %v2667_v15  ;;  %2479 = vmatprep.subr.bf16.mxu0 %v2668_v16 }
  0x48   : > { %2531 = vmatprep.subr.bf16.mxu1 %v2693_v38 }
  0x49   : > { %1052 = vmatmul.mubr.bf16.vlgmr.msra.gmra.mrb[16].mxu0 %v2940_v46 }
  0x4a   : > { %2480 = vmatpush3.bf16.msra.mxu0 %v2669_v17  ;;  %1059 = vmatprep.mubr.bf16.mxu0 %v2970_v55 }
  0x4b   : > { %1319 = vmatmul.mubr.bf16.vlgmr.msra.gmra.mrb[16].mxu1 %v2944_v47  ;;  %2481 = vmatprep.subr.bf16.mxu0 %v2670_v18 }
  0x4c   : > { %1326 = vmatprep.mubr.bf16.mxu1 %v2641_v56  ;;  %2532 = vmatpush3.bf16.msra.mxu1 %v2693_v38 }
  0x4d   : > { %2533 = vmatprep.subr.bf16.mxu1 %v2694_v39 }
  0x4e   : > { %2482 = vmatpush3.bf16.msra.mxu0 %v2671_v19 }
  0x4f   : > { %2483 = vmatprep.subr.bf16.mxu0 %v2672_v20 }
  0x50   : > { %2534 = vmatpush3.bf16.msra.mxu1 %v2694_v39 }
  0x51   : > { %1060 = vmatmul.mubr.bf16.gmra.mrb[20].mxu0 %v2978_v58  ;;  %2535 = vmatprep.subr.bf16.mxu1 %v2695_v40 }
  0x52   : > { %2484 = vmatpush3.bf16.msra.mxu0 %v2673_v21  ;;  %1067 = vmatprep.mubr.bf16.mxu0 %v3007_v3 }
  0x53   : > { %1327 = vmatmul.mubr.bf16.gmra.mrb[20].mxu1 %v2981_v59  ;;  %2485 = vmatprep.subr.bf16.mxu0 %v2674_v22 }
  0x54   : > { %1334 = vmatprep.mubr.bf16.mxu1 %v2655_v4  ;;  %2536 = vmatpush3.bf16.msra.mxu1 %v2695_v40 }
  0x55   : > { %2537 = vmatprep.subr.bf16.mxu1 %v2696_v41 }
  0x56   : > { %2486 = vmatpush3.bf16.msra.mxu0 %v2675_v23 }
  0x57   : > { %2487 = vmatprep.subr.bf16.mxu0 %v2676_v24 }
  0x58   : > { %2538 = vmatpush3.bf16.msra.mxu1 %v2696_v41 }
  0x59   : > { %1068 = vmatmul.mubr.bf16.gmra.mrb[24].mxu0 %v3015_v6  ;;  %2539 = vmatprep.subr.bf16.mxu1 %v2697_v42 }
  0x5a   : > { %2488 = vmatpush3.bf16.msra.mxu0 %v2677_v25  ;;  %1075 = vmatprep.mubr.bf16.mxu0 %v2680_v26 }
  0x5b   : > { %1335 = vmatmul.mubr.bf16.gmra.mrb[24].mxu1 %v2659_v7  ;;  %2489 = vmatprep.subr.bf16.mxu0 %v2678_v27 }
  0x5c   : > { %1342 = vmatprep.mubr.bf16.mxu1 %v2684_v28  ;;  %2540 = vmatpush3.bf16.msra.mxu1 %v2697_v42 }
  0x5d   : > { %2541 = vmatprep.subr.bf16.mxu1 %v2698_v43 }
  0x5e   : > { %2490 = vmatpush3.bf16.msra.mxu0 %v2679_v29 }
  0x5f   : > { %2491 = vmatprep.subr.bf16.mxu0 %v2683_v30 }
  0x60   : > { %2542 = vmatpush3.bf16.msra.mxu1 %v2698_v43 }
  0x61   : > { %1076 = vmatmul.mubr.bf16.gmra.mrb[28].mxu0 %v2682_v31  ;;  %2543 = vmatprep.subr.bf16.mxu1 %v2699_v44 }
  0x62   : > { %2492 = vmatpush3.bf16.msra.mxu0 %v2686_v32  ;;  %1585 = vmatprep.mubr.bf16.mxu0 %v2970_v55 }
  0x63   : > { %1343 = vmatmul.mubr.bf16.gmra.mrb[28].mxu1 %v2687_v33  ;;  %2493 = vmatprep.subr.bf16.mxu0 %v2688_v34 }
  0x64   : > { %2544 = vmatpush3.bf16.msra.mxu1 %v2699_v44 }
  0x65   : > { %2545 = vmatprep.subr.bf16.mxu1 %v2700_v45 }
  0x66   : > { %2494 = vmatpush3.bf16.msra.mxu0 %v2689_v35 }
  0x68   : > { %2546 = vmatpush3.bf16.msra.mxu1 %v2700_v45 }
  0x69   : > { %1586 = vmatmul.mubr.bf16.vlgmr.msra.gmra.mrb[32].mxu0 %v2978_v58 }
  0x6a   : > { %1593 = vmatprep.mubr.bf16.mxu0 %v3007_v3 }
  0x71   : > { %1594 = vmatmul.mubr.bf16.gmra.mrb[36].mxu0 %v3015_v6 }
  0x72   : > { %1601 = vmatprep.mubr.bf16.mxu0 %v2680_v26 }
  0x79   : > { %1602 = vmatmul.mubr.bf16.gmra.mrb[40].mxu0 %v2682_v31 }
  0x7a   : > { %1609 = vmatprep.mubr.bf16.mxu0 %v2690_v36 }
  0x81   : > { %1610 = vmatmul.mubr.bf16.gmra.mrb[44].mxu0 %v2692_v37 }
  0xfb   : > { %v2335_v46 = vpop.f32.mrb[0].mxu0 }
  0xfc   : > { %v2375_v47 = vpop.f32.mrb[0].mxu1  ;;  %v2336_v48 = vpop.f32.mrb[1].mxu0 }
  0xfd   : > { %v2337_v49 = vadd.f32 %v2336_v48, %v2335_v46  ;;  %v2376_v50 = vpop.f32.mrb[1].mxu1  ;;  %v2338_v51 = vpop.f32.mrb[2].mxu0 }
  0xfe   : > { %v2377_v52 = vadd.f32 %v2376_v50, %v2375_v47  ;;  %v2378_v53 = vpop.f32.mrb[2].mxu1  ;;  %v2339_v54 = vpop.f32.mrb[3].mxu0 }
  0xff   : > { %v2340_v55 = vadd.f32 %v2339_v54, %v2338_v51  ;;  %v2379_v56 = vpop.f32.mrb[3].mxu1 }
 0x100   : > { %v825_v57 = vadd.f32 %v2377_v52, %v2337_v49  ;;  %v2380_v58 = vadd.f32 %v2379_v56, %v2378_v53 }
 0x102   : > { %v826_v59 = vadd.f32 %v2380_v58, %v2340_v55 }
 0x103   : > { %v2341_v60 = vpop.f32.mrb[4].mxu0 }
 0x104   : > { %v2381_v61 = vpop.f32.mrb[4].mxu1  ;;  %v2342_v62 = vpop.f32.mrb[5].mxu0 }
 0x105   : > { %v2343_v63 = vadd.f32 %v2342_v62, %v2341_v60  ;;  %v2382_v0 = vpop.f32.mrb[5].mxu1  ;;  %v2344_v1 = vpop.f32.mrb[6].mxu0 }
 0x106   : > { %v2383_v2 = vadd.f32 %v2382_v0, %v2381_v61  ;;  %v2384_v3 = vpop.f32.mrb[6].mxu1  ;;  %v2345_v4 = vpop.f32.mrb[7].mxu0 }
 0x107   : > { %v2346_v5 = vadd.f32 %v2345_v4, %v2344_v1  ;;  %v2385_v6 = vpop.f32.mrb[7].mxu1 }
 0x108   : > { %v827_v7 = vadd.f32 %v2383_v2, %v2343_v63  ;;  %v2386_v8 = vadd.f32 %v2385_v6, %v2384_v3 }
 0x10a   : > { %v828_v9 = vadd.f32 %v2386_v8, %v2346_v5 }
 0x10b   : > { %v2347_v10 = vpop.f32.mrb[8].mxu0 }
 0x10c   : > { %v2387_v11 = vpop.f32.mrb[8].mxu1  ;;  %v2348_v12 = vpop.f32.mrb[9].mxu0 }
 0x10d   : > { %v2349_v13 = vadd.f32 %v2348_v12, %v2347_v10  ;;  %v2388_v14 = vpop.f32.mrb[9].mxu1  ;;  %v2350_v15 = vpop.f32.mrb[10].mxu0 }
 0x10e   : > { %v2389_v16 = vadd.f32 %v2388_v14, %v2387_v11  ;;  %v2390_v17 = vpop.f32.mrb[10].mxu1  ;;  %v2351_v18 = vpop.f32.mrb[11].mxu0 }
 0x10f   : > { %v2352_v19 = vadd.f32 %v2351_v18, %v2350_v15  ;;  %v2391_v20 = vpop.f32.mrb[11].mxu1 }
 0x110   : > { %v829_v21 = vadd.f32 %v2389_v16, %v2349_v13  ;;  %v2392_v22 = vadd.f32 %v2391_v20, %v2390_v17 }
 0x112   : > { %v830_v23 = vadd.f32 %v2392_v22, %v2352_v19 }
 0x113   : > { %v2353_v24 = vpop.f32.mrb[12].mxu0 }
 0x114   : > { %v2393_v25 = vpop.f32.mrb[12].mxu1  ;;  %v2354_v26 = vpop.f32.mrb[13].mxu0 }
 0x115   : > { %v2394_v27 = vpop.f32.mrb[13].mxu1  ;;  %v2355_v28 = vadd.f32 %v2354_v26, %v2353_v24  ;;  %v2356_v30 = vpop.f32.mrb[14].mxu0 }
 0x116   : > { %v2395_v29 = vadd.f32 %v2394_v27, %v2393_v25  ;;  %v2396_v31 = vpop.f32.mrb[14].mxu1  ;;  %v2357_v32 = vpop.f32.mrb[15].mxu0 }
 0x117   : > { %v2397_v33 = vpop.f32.mrb[15].mxu1  ;;  %v2358_v35 = vadd.f32 %v2357_v32, %v2356_v30 }
 0x118   : > { %v831_v34 = vadd.f32 %v2395_v29, %v2355_v28  ;;  %v2398_v36 = vadd.f32 %v2397_v33, %v2396_v31 }
 0x11a   : > { %v832_v37 = vadd.f32 %v2398_v36, %v2358_v35 }
 0x11c   : > { %v2415_v38 = vpop.f32.mrb[16].mxu0 }
 0x11d   : > { %v2416_v39 = vpop.f32.mrb[17].mxu0 }
 0x11e   : > { %v2417_v40 = vadd.f32 %v2416_v39, %v2415_v38  ;;  %v2418_v41 = vpop.f32.mrb[18].mxu0  ;;  %v2455_v42 = vpop.f32.mrb[16].mxu1 }
 0x11f   : > { %v2419_v43 = vpop.f32.mrb[19].mxu0  ;;  %v2456_v44 = vpop.f32.mrb[17].mxu1 }
 0x120   : > { %v1092_v45 = vadd.f32 %v2417_v40, %v825_v57  ;;  %v2420_v46 = vadd.f32 %v2419_v43, %v2418_v41  ;;  %v2457_v47 = vadd.f32 %v2456_v44, %v2455_v42  ;;  %v2458_v48 = vpop.f32.mrb[18].mxu1  ;;  %v2267_v44 = vld [vmem:[%s3175_s3] ss:$0 sm:$0xff] }
 0x121   : > { %v2459_v49 = vpop.f32.mrb[19].mxu1 }
 0x122   : > { %v1093_v50 = vadd.f32 %v2420_v46, %v826_v59  ;;  %v1359_v51 = vadd.f32 %v2457_v47, %v1092_v45  ;;  %v2460_v52 = vadd.f32 %v2459_v49, %v2458_v48 }
 0x124   : > { %v1360_v53 = vadd.f32 %v2460_v52, %v1093_v50  ;;  %v2421_v54 = vpop.f32.mrb[20].mxu0 }
 0x125   : > { %v2422_v55 = vpop.f32.mrb[21].mxu0 }
 0x126   : > { %v2423_v56 = vadd.f32 %v2422_v55, %v2421_v54  ;;  %v2424_v58 = vpop.f32.mrb[22].mxu0  ;;  %v2461_v60 = vpop.f32.mrb[20].mxu1 }
 0x127   : > { %v2425_v61 = vpop.f32.mrb[23].mxu0  ;;  %v2462_v62 = vpop.f32.mrb[21].mxu1 }
 0x128   : > { %v1094_v63 = vadd.f32 %v2423_v56, %v827_v7  ;;  %v2426_v0 = vadd.f32 %v2425_v61, %v2424_v58  ;;  %v2463_v1 = vadd.f32 %v2462_v62, %v2461_v60  ;;  %v2464_v2 = vpop.f32.mrb[22].mxu1 }
 0x129   : > { %v2465_v57 = vpop.f32.mrb[23].mxu1 }
 0x12a   : > { %v1095_v3 = vadd.f32 %v2426_v0, %v828_v9  ;;  %v1361_v4 = vadd.f32 %v2463_v1, %v1094_v63  ;;  %v2466_v5 = vadd.f32 %v2465_v57, %v2464_v2 }
 0x12c   : > { %v1362_v6 = vadd.f32 %v2466_v5, %v1095_v3  ;;  %v2427_v59 = vpop.f32.mrb[24].mxu0 }
 0x12d   : > { %v2428_v8 = vpop.f32.mrb[25].mxu0 }
 0x12e   : > { %v2429_v10 = vadd.f32 %v2428_v8, %v2427_v59  ;;  %v2430_v11 = vpop.f32.mrb[26].mxu0  ;;  %v2467_v12 = vpop.f32.mrb[24].mxu1 }
 0x12f   : > { %v2431_v13 = vpop.f32.mrb[27].mxu0  ;;  %v2468_v14 = vpop.f32.mrb[25].mxu1 }
 0x130   : > { %v1096_v15 = vadd.f32 %v2429_v10, %v829_v21  ;;  %v2432_v16 = vadd.f32 %v2431_v13, %v2430_v11  ;;  %v2469_v17 = vadd.f32 %v2468_v14, %v2467_v12  ;;  %v2470_v18 = vpop.f32.mrb[26].mxu1 }
 0x131   : > { %v2471_v7 = vpop.f32.mrb[27].mxu1 }
 0x132   : > { %v1097_v19 = vadd.f32 %v2432_v16, %v830_v23  ;;  %v1363_v20 = vadd.f32 %v2469_v17, %v1096_v15  ;;  %v2472_v22 = vadd.f32 %v2471_v7, %v2470_v18 }
 0x134   : > { %v1364_v24 = vadd.f32 %v2472_v22, %v1097_v19  ;;  %v2433_v9 = vpop.f32.mrb[28].mxu0 }
 0x135   : > { %v2434_v25 = vpop.f32.mrb[29].mxu0 }
 0x136   : > { %v2435_v26 = vadd.f32 %v2434_v25, %v2433_v9  ;;  %v2436_v27 = vpop.f32.mrb[30].mxu0  ;;  %v2473_v28 = vpop.f32.mrb[28].mxu1 }
 0x137   : > { %v2437_v29 = vpop.f32.mrb[31].mxu0  ;;  %v2474_v30 = vpop.f32.mrb[29].mxu1 }
 0x138   : > { %v1098_v31 = vadd.f32 %v2435_v26, %v831_v34  ;;  %v2438_v32 = vadd.f32 %v2437_v29, %v2436_v27  ;;  %v2475_v33 = vadd.f32 %v2474_v30, %v2473_v28  ;;  %v2476_v35 = vpop.f32.mrb[30].mxu1  ;;  %v2268_v29 = vld [vmem:[%s3177_s5] ss:$0 sm:$0xff] }
 0x139   : > { %v2477_v21 = vpop.f32.mrb[31].mxu1 }
 0x13a   : > { %v1099_v36 = vadd.f32 %v2438_v32, %v832_v37  ;;  %v1365_v38 = vadd.f32 %v2475_v33, %v1098_v31  ;;  %v2478_v39 = vadd.f32 %v2477_v21, %v2476_v35 }
 0x13c   : > { %v1366_v40 = vadd.f32 %v2478_v39, %v1099_v36  ;;  %v2495_v23 = vpop.f32.mrb[32].mxu0 }
 0x13d   : > { %v2496_v41 = vpop.f32.mrb[33].mxu0 }
 0x13e   : > { %v2497_v42 = vadd.f32 %v2496_v41, %v2495_v23  ;;  %v2498_v43 = vpop.f32.mrb[34].mxu0 }
 0x13f   : > { %v2499_v45 = vpop.f32.mrb[35].mxu0 }
 0x140   : > { %v1626_v46 = vadd.f32 %v2497_v42, %v1359_v51  ;;  %v2500_v47 = vadd.f32 %v2499_v45, %v2498_v43 }
 0x142   : > { %v3136_v34 = vadd.f32 %v2267_v44, %v1626_v46  ;;  %v1627_v48 = vadd.f32 %v2500_v47, %v1360_v53 }
 0x144   : > { %v3138_v49 = vadd.f32 %v2267_v44, %v1627_v48  ;;  %v2501_v37 = vpop.f32.mrb[36].mxu0  ;;  %v1665_v55 = vmul.f32 %v3136_v34, %v3136_v34 }
 0x145   : > { %v2502_v50 = vpop.f32.mrb[37].mxu0 }
 0x146   : > { %v2503_v52 = vadd.f32 %v2502_v50, %v2501_v37  ;;  %v2504_v54 = vpop.f32.mrb[38].mxu0  ;;  %v1666_v56 = vmul.f32 %v3138_v49, %v3138_v49 }
 0x147   : > { %v2505_v58 = vpop.f32.mrb[39].mxu0 }
 0x148   : > { %v1628_v60 = vadd.f32 %v2503_v52, %v1361_v4  ;;  %v2506_v61 = vadd.f32 %v2505_v58, %v2504_v54  ;;  %v1673_v51 = vpack.c.bf16 %v1666_v56, %v1665_v55 }
 0x14a   : > { %v1659_v62 = vadd.f32 %v2267_v44, %v1628_v60  ;;  %v1629_v63 = vadd.f32 %v2506_v61, %v1362_v6  ;;  %2547 = vmatprep.mubr.bf16.mxu1 %v1673_v51 }
 0x14c   : > { %v1660_v53 = vadd.f32 %v2267_v44, %v1629_v63  ;;  %v2507_v0 = vpop.f32.mrb[40].mxu0  ;;  %v1667_v2 = vmul.f32 %v1659_v62, %v1659_v62 }
 0x14d   : > { %v2508_v1 = vpop.f32.mrb[41].mxu0 }
 0x14e   : > { %v1668_v57 = vmul.f32 %v1660_v53, %v1660_v53  ;;  %v2509_v3 = vadd.f32 %v2508_v1, %v2507_v0  ;;  %v2510_v5 = vpop.f32.mrb[42].mxu0 }
 0x14f   : > { %v2511_v59 = vpop.f32.mrb[43].mxu0 }
 0x150   : > { %v1674_v8 = vpack.c.bf16 %v1668_v57, %v1667_v2  ;;  %v1630_v10 = vadd.f32 %v2509_v3, %v1363_v20  ;;  %v2512_v11 = vadd.f32 %v2511_v59, %v2510_v5 }
 0x152   : > { %v3144_v12 = vadd.f32 %v2267_v44, %v1630_v10  ;;  %v1631_v13 = vadd.f32 %v2512_v11, %v1364_v24  ;;  %2548 = vmatmul.mubr.bf16.vlgmr.msra.gmra.mrb[32].mxu1 %v1674_v8 }
 0x154   : > { %v3146_v4 = vadd.f32 %v2267_v44, %v1631_v13  ;;  %v2513_v14 = vpop.f32.mrb[44].mxu0  ;;  %v1669_v17 = vmul.f32 %v3144_v12, %v3144_v12 }
 0x155   : > { %v2514_v6 = vpop.f32.mrb[45].mxu0 }
 0x156   : > { %v2515_v15 = vadd.f32 %v2514_v6, %v2513_v14  ;;  %v2516_v16 = vpop.f32.mrb[46].mxu0  ;;  %v1670_v18 = vmul.f32 %v3146_v4, %v3146_v4 }
 0x157   : > { %v2517_v7 = vpop.f32.mrb[47].mxu0 }
 0x158   : > { %v1632_v19 = vadd.f32 %v2515_v15, %v1365_v38  ;;  %v2518_v20 = vadd.f32 %v2517_v7, %v2516_v16  ;;  %v1675_v22 = vpack.c.bf16 %v1670_v18, %v1669_v17 }
 0x15a   : > { %v1663_v9 = vadd.f32 %v2267_v44, %v1632_v19  ;;  %v1633_v25 = vadd.f32 %v2518_v20, %v1366_v40  ;;  %2551 = vmatprep.mubr.bf16.mxu1 %v1675_v22 }
 0x15c   : > { %v1664_v24 = vadd.f32 %v2267_v44, %v1633_v25  ;;  %v1671_v26 = vmul.f32 %v1663_v9, %v1663_v9 }
 0x15e   : > { %v1672_v27 = vmul.f32 %v1664_v24, %v1664_v24 }
 0x160   : > { %v1676_v28 = vpack.c.bf16 %v1672_v27, %v1671_v26 }
 0x162   : > { %2552 = vmatmul.mubr.bf16.gmra.mrb[36].mxu1 %v1676_v28 }
 0x225   : > { %v2549_v30 = vpop.f32.mrb[32].mxu1 }
 0x226   : > { %v1791_v31 = vadd.f32 %v2549_v30, %v2268_v29  ;;  %v1782_v32 = vpop.f32.mrb[33].mxu1 }
 0x227   : > { %v1783_v33 = vadd.f32 %v2268_v29, %v1782_v32  ;;  %v2550_v35 = vpop.f32.mrb[34].mxu1 }
 0x228   : > { %2701 = vrsqrt.f32 %v1791_v31  ;;  %v1794_v21 = vadd.f32 %v2550_v35, %v2268_v29  ;;  %v1785_v36 = vpop.f32.mrb[35].mxu1 }
 0x229   : > { %2703 = vrsqrt.f32 %v1783_v33  ;;  %v1786_v38 = vadd.f32 %v2268_v29, %v1785_v36 }
 0x22a   : > { %2705 = vrsqrt.f32 %v1794_v21 }
 0x22b   : > { %2707 = vrsqrt.f32 %v1786_v38 }
 0x232   : > { %v2702_v39 = vpop.eup %2701 }
 0x233   : > { %v2704_v40 = vpop.eup %2703  ;;  %v1823_v42 = vmul.f32 %v2702_v39, %v1659_v62 }
 0x234   : > { %v2706_v23 = vpop.eup %2705  ;;  %v1821_v45 = vmul.f32 %v2704_v40, %v3136_v34 }
 0x235   : > { %v2708_v41 = vpop.eup %2707  ;;  %v1824_v43 = vmul.f32 %v2706_v23, %v1660_v53  ;;  %v2553_v44 = vpop.f32.mrb[36].mxu1 }
 0x236   : > { %v1822_v46 = vmul.f32 %v2708_v41, %v3138_v49  ;;  %v1807_v47 = vadd.f32 %v2553_v44, %v2268_v29  ;;  %v1798_v48 = vpop.f32.mrb[37].mxu1 }
 0x237   : > { %v2304_v37 = vpack.c.bf16 %v1824_v43, %v1823_v42  ;;  %v1799_v50 = vadd.f32 %v2268_v29, %v1798_v48  ;;  %v2554_v52 = vpop.f32.mrb[38].mxu1 }
 0x238   : > { %v2299_v54 = vpack.c.bf16 %v1822_v46, %v1821_v45  ;;  %2709 = vrsqrt.f32 %v1807_v47  ;;  %v1810_v55 = vadd.f32 %v2554_v52, %v2268_v29  ;;  %v1801_v56 = vpop.f32.mrb[39].mxu1 }
 0x239   : > { %2316 = vst [vmem:[%s323_s20 + $0x8] sm:$0xff] %v2304_v37   ;;  %2711 = vrsqrt.f32 %v1799_v50  ;;  %v1802_v58 = vadd.f32 %v2268_v29, %v1801_v56 }
 0x23a   : > { %2300 = vst [vmem:[%s323_s20] sm:$0xff] %v2299_v54   ;;  %2713 = vrsqrt.f32 %v1810_v55 }
 0x23b   : > { %2715 = vrsqrt.f32 %v1802_v58 }
 0x242   : > { %v2710_v34 = vpop.eup %2709 }
 0x243   : > { %v2712_v60 = vpop.eup %2711  ;;  %v1827_v49 = vmul.f32 %v2710_v34, %v1663_v9 }
 0x244   : > { %v2714_v61 = vpop.eup %2713  ;;  %v1825_v63 = vmul.f32 %v2712_v60, %v3144_v12 }
 0x245   : > { %v2716_v51 = vpop.eup %2715  ;;  %v1828_v62 = vmul.f32 %v2714_v61, %v1664_v24 }
 0x246   : > { %v1826_v53 = vmul.f32 %v2716_v51, %v3146_v4 }
 0x247   : > { %v2314_v0 = vpack.c.bf16 %v1828_v62, %v1827_v49 }
 0x248   : > { %v2309_v1 = vpack.c.bf16 %v1826_v53, %v1825_v63 }
 0x249   : > { %2318 = vst [vmem:[%s323_s20 + $0x18] sm:$0xff] %v2314_v0  }
 0x24a   : > { %2317 = vst [vmem:[%s323_s20 + $0x10] sm:$0xff] %v2309_v1  }
 0x24b PF: > { %s16_s23 = sadd.s32 1, %s2739_s23   ;;  %s3179_s21 = smov %s2735_s22 }
 0x24c   : > { %p13_p5 = scmp.ge.s32.totalorder %s16_s23, 4   ;;  %s3180_s22 = smov %s3182_s24 }
 0x24e   :  { %15 = sbr.rel (!%p13_p5) target bundleno = 2 (0x2), region = 84 }

// kernel: encoder_forward.6
= control target key start
LH: loop header
LB: loop body
LE: loop exit
PB: predicated region body
PF: predicated region fallthrough
CT: control target
= control target key end

     0   :  { %s2331_s21 = smov 0   ;;  %s2333_s22 = smov 0   ;;  %s2663_s0 = inlined_call_operand.vmem [shape: bf16[2,1,4,16,256], index: 0, kind: input, shape index: {}]   ;;  %s2664_s1 = inlined_call_operand.vmem [shape: bf16[2,1,4,16,256], index: 1, kind: input, shape index: {}]   ;;  %s2665_s2 = inlined_call_operand.vmem [shape: bf16[5,256,128], index: 2, kind: input, shape index: {}]   ;;  %s2666_s3 = inlined_call_operand.vmem [shape: f32[1,128], index: 3, kind: input, shape index: {}]   ;;  %s2667_s4 = inlined_call_operand.vmem [shape: bf16[128,128], index: 4, kind: input, shape index: {}]   ;;  %s2668_s5 = inlined_call_operand.vmem [shape: f32[1,128], index: 5, kind: input, shape index: {}]   ;;  %s2669_s6 = inlined_call_operand.vmem [shape: bf16[2,2,16,128], index: 6, kind: output, shape index: {}]  }
   0x1   :  { %s2335_s23 = smov 0  }
   0x2 LB: > { %s28_s24 = sadd.s32 1, %s2290_s22  ;;  %p1680_p0 = scmp.ge.s32.totalorder %s2294_s23, 1  ;;  %s2294_s23 = sphi %s2335_s23, %s16_s23   ;;  %s2290_s22 = sphi %s2333_s22, %s2671_s22   ;;  %s2286_s21 = sphi %s2331_s21, %s2670_s21  }
   0x3   : > { %p30_p1 = scmp.ge.s32.totalorder %s28_s24, 2  ;;  %p248_p2 = scmp.lt.s32.totalorder %s2294_s23, 3 }
   0x5   : > { %s2673_s24 = smov (%p30_p1, %s28_s24), 0  ;;  %p249_p3 = pnand %p1680_p0, %p248_p2 }
   0x6   : > { %v2155_v0 = vld [vmem:[%s2665_s2 + $0x40] sm:$0xff] (!%p249_p3)   ;;  %v2159_v4 = vld [vmem:[%s2665_s2 + $0x48] sm:$0xff] (!%p249_p3)   ;;  %v2163_v8 = vld [vmem:[%s2665_s2 + $0x50] sm:$0xff] (!%p249_p3)   ;;  %p296_p4 = scmp.lt.s32.totalorder (!%p249_p3), %s2286_s21, 1 }
   0x7   : > { %252 = sbr.rel (%p249_p3) target bundleno = 570 (0x23a), region = 44  ;;  %v2156_v1 = vld [vmem:[%s2665_s2 + $0xc0] sm:$0xff] (!%p249_p3)   ;;  %1961 = vmatprep.subr.bf16.mxu0 (!%p249_p3), %v2155_v0  ;;  %v2160_v5 = vld [vmem:[%s2665_s2 + $0xc8] sm:$0xff] (!%p249_p3)   ;;  %v2164_v9 = vld [vmem:[%s2665_s2 + $0xd0] sm:$0xff] (!%p249_p3)  }
   0x8   : > { %v2157_v2 = vld [vmem:[%s2665_s2] sm:$0xff] (!%p249_p3)   ;;  %1989 = vmatprep.subr.bf16.mxu1 (!%p249_p3), %v2156_v1  ;;  %v2161_v6 = vld [vmem:[%s2665_s2 + $0x8] sm:$0xff] (!%p249_p3)   ;;  %v2165_v10 = vld [vmem:[%s2665_s2 + $0x10] sm:$0xff] (!%p249_p3)  }
   0x9   : > { %v2158_v3 = vld [vmem:[%s2665_s2 + $0x80] sm:$0xff] (!%p249_p3)   ;;  %1962 = vmatpush3.bf16.msra.mxu0 (!%p249_p3), %v2157_v2  ;;  %v2162_v7 = vld [vmem:[%s2665_s2 + $0x88] sm:$0xff] (!%p249_p3)   ;;  %v2166_v11 = vld [vmem:[%s2665_s2 + $0x90] sm:$0xff] (!%p249_p3)  }
   0xa   : > { %1990 = vmatpush3.bf16.msra.mxu1 (!%p249_p3), %v2158_v3  ;;  %1963 = vmatprep.subr.bf16.mxu0 (!%p249_p3), %v2159_v4  ;;  %v2167_v12 = vld [vmem:[%s2665_s2 + $0x58] sm:$0xff] (!%p249_p3)   ;;  %v2171_v16 = vld [vmem:[%s2665_s2 + $0x60] sm:$0xff] (!%p249_p3)   ;;  %v2175_v20 = vld [vmem:[%s2665_s2 + $0x68] sm:$0xff] (!%p249_p3)  }
   0xb   : > { %1991 = vmatprep.subr.bf16.mxu1 (!%p249_p3), %v2160_v5  ;;  %v2168_v13 = vld [vmem:[%s2665_s2 + $0xd8] sm:$0xff] (!%p249_p3)   ;;  %v2172_v17 = vld [vmem:[%s2665_s2 + $0xe0] sm:$0xff] (!%p249_p3)   ;;  %v2176_v21 = vld [vmem:[%s2665_s2 + $0xe8] sm:$0xff] (!%p249_p3)  }
   0xc   : > { %v2169_v14 = vld [vmem:[%s2665_s2 + $0x18] sm:$0xff] (!%p249_p3)   ;;  %v2173_v18 = vld [vmem:[%s2665_s2 + $0x20] sm:$0xff] (!%p249_p3)   ;;  %v2177_v22 = vld [vmem:[%s2665_s2 + $0x28] sm:$0xff] (!%p249_p3)  }
   0xd   : > { %1964 = vmatpush3.bf16.msra.mxu0 (!%p249_p3), %v2161_v6  ;;  %v2170_v15 = vld [vmem:[%s2665_s2 + $0x98] sm:$0xff] (!%p249_p3)   ;;  %v2174_v19 = vld [vmem:[%s2665_s2 + $0xa0] sm:$0xff] (!%p249_p3)   ;;  %v2178_v23 = vld [vmem:[%s2665_s2 + $0xa8] sm:$0xff] (!%p249_p3)  }
   0xe   : > { %1992 = vmatpush3.bf16.msra.mxu1 %v2162_v7  ;;  %1965 = vmatprep.subr.bf16.mxu0 %v2163_v8  ;;  %s2675_s21 = smov (!%p296_p4, %s2286_s21), 1  ;;  %v2179_v24 = vld [vmem:[%s2665_s2 + $0x70] sm:$0xff]   ;;  %v2183_v28 = vld [vmem:[%s2665_s2 + $0x78] sm:$0xff]   ;;  %v2193_v36 = vld [vmem:[%s2665_s2 + $0x140] sm:$0xff]  }
   0xf   : > { %1993 = vmatprep.subr.bf16.mxu1 %v2164_v9  ;;  %v2180_v25 = vld [vmem:[%s2665_s2 + $0xf0] sm:$0xff]   ;;  %s1943_s15 = sshll.u32 %s2675_s21, 6  ;;  %v2184_v29 = vld [vmem:[%s2665_s2 + $0xf8] sm:$0xff]   ;;  %v2194_v37 = vld [vmem:[%s2665_s2 + $0x100] sm:$0xff]   ;;  %s1945_s17 = sshll.u32 %s2675_s21, 4 }
  0x10   : > { %v2181_v26 = vld [vmem:[%s2665_s2 + $0x30] sm:$0xff]   ;;  %s2449_s28 = scalar_lea.vmem %s2663_s0, %s1943_s15  ;;  %v2185_v30 = vld [vmem:[%s2665_s2 + $0x38] sm:$0xff]   ;;  %s2460_s11 = scalar_lea.vmem %s2664_s1, %s1943_s15  ;;  %v2195_v38 = vld [vmem:[%s2665_s2 + $0x1c0] sm:$0xff]  }
  0x11   : > { %1966 = vmatpush3.bf16.msra.mxu0 %v2165_v10  ;;  %v2182_v27 = vld [vmem:[%s2665_s2 + $0xb0] sm:$0xff]   ;;  %v2186_v31 = vld [vmem:[%s2665_s2 + $0xb8] sm:$0xff]   ;;  %v2187_v32 = vld [vmem:[%s2449_s28] ss:$8 sps:$4 sm:$0xff]   ;;  %s323_s20 = scalar_lea.vmem %s2669_s6, %s1945_s17 }
  0x12   : > { %1994 = vmatpush3.bf16.msra.mxu1 %v2166_v11  ;;  %1967 = vmatprep.subr.bf16.mxu0 %v2167_v12  ;;  %v2189_v33 = vld [vmem:[%s2449_s28 + $0x4] ss:$8 sps:$4 sm:$0xff]   ;;  %v2190_v34 = vld [vmem:[%s2460_s11] ss:$8 sps:$4 sm:$0xff]   ;;  %v2201_v44 = vld [vmem:[%s2665_s2 + $0x150] sm:$0xff]  }
  0x13   : > { %1995 = vmatprep.subr.bf16.mxu1 %v2168_v13  ;;  %v2192_v35 = vld [vmem:[%s2460_s11 + $0x4] ss:$8 sps:$4 sm:$0xff]   ;;  %510 = vmatprep.mubr.bf16.mxu0 %v2189_v33  ;;  %v2202_v45 = vld [vmem:[%s2665_s2 + $0x110] sm:$0xff]   ;;  %v2205_v48 = vld [vmem:[%s2665_s2 + $0x158] sm:$0xff]  }
  0x14   : > { %716 = vmatprep.mubr.bf16.mxu1 %v2192_v35  ;;  %v2196_v39 = vld [vmem:[%s2665_s2 + $0x180] sm:$0xff]   ;;  %v2197_v40 = vld [vmem:[%s2665_s2 + $0x148] sm:$0xff]   ;;  %v2203_v46 = vld [vmem:[%s2665_s2 + $0x1d0] sm:$0xff]  }
  0x15   : > { %1968 = vmatpush3.bf16.msra.mxu0 %v2169_v14  ;;  %v2198_v41 = vld [vmem:[%s2665_s2 + $0x108] sm:$0xff]   ;;  %v2204_v47 = vld [vmem:[%s2665_s2 + $0x190] sm:$0xff]   ;;  %v2206_v49 = vld [vmem:[%s2665_s2 + $0x118] sm:$0xff]  }
  0x16   : > { %1996 = vmatpush3.bf16.msra.mxu1 %v2170_v15  ;;  %1969 = vmatprep.subr.bf16.mxu0 %v2171_v16  ;;  %v2199_v42 = vld [vmem:[%s2665_s2 + $0x1c8] sm:$0xff]   ;;  %v2207_v50 = vld [vmem:[%s2665_s2 + $0x1d8] sm:$0xff]   ;;  %v2209_v52 = vld [vmem:[%s2665_s2 + $0x160] sm:$0xff]  }
  0x17   : > { %1997 = vmatprep.subr.bf16.mxu1 %v2172_v17  ;;  %v2200_v43 = vld [vmem:[%s2665_s2 + $0x188] sm:$0xff]   ;;  %v2208_v51 = vld [vmem:[%s2665_s2 + $0x198] sm:$0xff]   ;;  %v2210_v53 = vld [vmem:[%s2665_s2 + $0x120] sm:$0xff]  }
  0x18   : > { %v2211_v54 = vld [vmem:[%s2665_s2 + $0x1e0] sm:$0xff]   ;;  %v2213_v56 = vld [vmem:[%s2665_s2 + $0x168] sm:$0xff]   ;;  %v2214_v57 = vld [vmem:[%s2449_s28 + $0x14] ss:$8 sps:$4 sm:$0xff]  }
  0x19   : > { %1970 = vmatpush3.bf16.msra.mxu0 %v2173_v18  ;;  %v2212_v55 = vld [vmem:[%s2665_s2 + $0x1a0] sm:$0xff]   ;;  %v2216_v58 = vld [vmem:[%s2460_s11 + $0x14] ss:$8 sps:$4 sm:$0xff]   ;;  %v2218_v59 = vld [vmem:[%s2665_s2 + $0x128] sm:$0xff]  }
  0x1a   : > { %1998 = vmatpush3.bf16.msra.mxu1 %v2174_v19  ;;  %1971 = vmatprep.subr.bf16.mxu0 %v2175_v20  ;;  %v2219_v60 = vld [vmem:[%s2449_s28 + $0x10] ss:$8 sps:$4 sm:$0xff]   ;;  %v2221_v62 = vld [vmem:[%s2665_s2 + $0x1e8] sm:$0xff]   ;;  %v2231_v8 = vld [vmem:[%s2665_s2 + $0x240] sm:$0xff]  }
  0x1b   : > { %1999 = vmatprep.subr.bf16.mxu1 %v2176_v21  ;;  %v2220_v61 = vld [vmem:[%s2460_s11 + $0x10] ss:$8 sps:$4 sm:$0xff]   ;;  %v2222_v63 = vld [vmem:[%s2665_s2 + $0x1a8] sm:$0xff]   ;;  %v2232_v9 = vld [vmem:[%s2665_s2 + $0x200] sm:$0xff]  }
  0x1c   : > { %v2223_v0 = vld [vmem:[%s2665_s2 + $0x170] sm:$0xff]   ;;  %v2227_v4 = vld [vmem:[%s2665_s2 + $0x178] sm:$0xff]   ;;  %v2233_v10 = vld [vmem:[%s2665_s2 + $0x248] sm:$0xff]  }
  0x1d   : > { %1972 = vmatpush3.bf16.msra.mxu0 %v2177_v22  ;;  %v2224_v1 = vld [vmem:[%s2665_s2 + $0x130] sm:$0xff]   ;;  %v2228_v5 = vld [vmem:[%s2665_s2 + $0x138] sm:$0xff]   ;;  %v2234_v11 = vld [vmem:[%s2665_s2 + $0x208] sm:$0xff]  }
  0x1e   : > { %2000 = vmatpush3.bf16.msra.mxu1 %v2178_v23  ;;  %1973 = vmatprep.subr.bf16.mxu0 %v2179_v24  ;;  %v2225_v2 = vld [vmem:[%s2665_s2 + $0x1f0] sm:$0xff]   ;;  %v2229_v6 = vld [vmem:[%s2665_s2 + $0x1f8] sm:$0xff]   ;;  %v2235_v12 = vld [vmem:[%s2449_s28 + $0x24] ss:$8 sps:$4 sm:$0xff]  }
  0x1f   : > { %2001 = vmatprep.subr.bf16.mxu1 %v2180_v25  ;;  %v2226_v3 = vld [vmem:[%s2665_s2 + $0x1b0] sm:$0xff]   ;;  %v2230_v7 = vld [vmem:[%s2665_s2 + $0x1b8] sm:$0xff]   ;;  %v2237_v13 = vld [vmem:[%s2449_s28 + $0x20] ss:$8 sps:$4 sm:$0xff]  }
  0x20   : > { %v2238_v14 = vld [vmem:[%s2665_s2 + $0x250] sm:$0xff]   ;;  %v2239_v15 = vld [vmem:[%s2460_s11 + $0x24] ss:$8 sps:$4 sm:$0xff]   ;;  %v2242_v17 = vld [vmem:[%s2460_s11 + $0x20] ss:$8 sps:$4 sm:$0xff]  }
  0x21   : > { %1974 = vmatpush3.bf16.msra.mxu0 %v2181_v26  ;;  %v2241_v16 = vld [vmem:[%s2665_s2 + $0x210] sm:$0xff]   ;;  %v2243_v18 = vld [vmem:[%s2665_s2 + $0x258] sm:$0xff]   ;;  %v2245_v20 = vld [vmem:[%s2665_s2 + $0x260] sm:$0xff]  }
  0x22   : > { %2002 = vmatpush3.bf16.msra.mxu1 %v2182_v27  ;;  %1975 = vmatprep.subr.bf16.mxu0 %v2183_v28  ;;  %v2244_v19 = vld [vmem:[%s2665_s2 + $0x218] sm:$0xff]   ;;  %v2246_v21 = vld [vmem:[%s2665_s2 + $0x220] sm:$0xff]   ;;  %v2247_v22 = vld [vmem:[%s2665_s2 + $0x268] sm:$0xff]  }
  0x23   : > { %2003 = vmatprep.subr.bf16.mxu1 %v2184_v29  ;;  %v2248_v23 = vld [vmem:[%s2665_s2 + $0x228] sm:$0xff]   ;;  %v2249_v24 = vld [vmem:[%s2665_s2 + $0x270] sm:$0xff]   ;;  %v2251_v26 = vld [vmem:[%s2665_s2 + $0x278] sm:$0xff]  }
  0x24   : > { %v2250_v25 = vld [vmem:[%s2665_s2 + $0x230] sm:$0xff]   ;;  %v2252_v27 = vld [vmem:[%s2665_s2 + $0x238] sm:$0xff]   ;;  %v2261_v35 = vld [vmem:[%s2667_s4 + $0x28] sm:$0xff]  }
  0x25   : > { %1976 = vmatpush3.bf16.msra.mxu0 %v2185_v30  ;;  %v2253_v28 = vld [vmem:[%s2449_s28 + $0x34] ss:$8 sps:$4 sm:$0xff]   ;;  %v2255_v29 = vld [vmem:[%s2449_s28 + $0x30] ss:$8 sps:$4 sm:$0xff]   ;;  %v2256_v30 = vld [vmem:[%s2667_s4] sm:$0xff]  }
  0x26   : > { %2004 = vmatpush3.bf16.msra.mxu1 %v2186_v31  ;;  %2017 = vmatprep.subr.bf16.mxu0 %v2193_v36  ;;  %v2257_v31 = vld [vmem:[%s2667_s4 + $0x8] sm:$0xff]   ;;  %v2259_v33 = vld [vmem:[%s2667_s4 + $0x18] sm:$0xff]   ;;  %v2262_v36 = vld [vmem:[%s2667_s4 + $0x30] sm:$0xff]  }
  0x27   : > { %2045 = vmatprep.subr.bf16.mxu1 %v2195_v38 }
  0x28   : > { %511 = vmatmul.mubr.bf16.vlgmr.msra.gmra.mrb[0].mxu0 %v2187_v32  ;;  %v2258_v32 = vld [vmem:[%s2667_s4 + $0x10] sm:$0xff]  }
  0x29   : > { %717 = vmatmul.mubr.bf16.vlgmr.msra.gmra.mrb[0].mxu1 %v2190_v34  ;;  %2018 = vmatpush3.bf16.msra.mxu0 %v2194_v37  ;;  %v2260_v34 = vld [vmem:[%s2667_s4 + $0x20] sm:$0xff]   ;;  %v2263_v37 = vld [vmem:[%s2667_s4 + $0x38] sm:$0xff]  }
  0x2a   : > { %2046 = vmatpush3.bf16.msra.mxu1 %v2196_v39  ;;  %2019 = vmatprep.subr.bf16.mxu0 %v2197_v40 }
  0x2b   : > { %2047 = vmatprep.subr.bf16.mxu1 %v2199_v42  ;;  %518 = vmatprep.mubr.bf16.mxu0 %v2214_v57 }
  0x2c   : > { %724 = vmatprep.mubr.bf16.mxu1 %v2216_v58 }
  0x2d   : > { %2020 = vmatpush3.bf16.msra.mxu0 %v2198_v41 }
  0x2e   : > { %2048 = vmatpush3.bf16.msra.mxu1 %v2200_v43  ;;  %2021 = vmatprep.subr.bf16.mxu0 %v2201_v44 }
  0x2f   : > { %2049 = vmatprep.subr.bf16.mxu1 %v2203_v46 }
  0x30   : > { %519 = vmatmul.mubr.bf16.gmra.mrb[4].mxu0 %v2219_v60 }
  0x31   : > { %2022 = vmatpush3.bf16.msra.mxu0 %v2202_v45  ;;  %725 = vmatmul.mubr.bf16.gmra.mrb[4].mxu1 %v2220_v61 }
  0x32   : > { %2050 = vmatpush3.bf16.msra.mxu1 %v2204_v47  ;;  %2023 = vmatprep.subr.bf16.mxu0 %v2205_v48 }
  0x33   : > { %2051 = vmatprep.subr.bf16.mxu1 %v2207_v50  ;;  %931 = vmatprep.mubr.bf16.mxu0 %v2214_v57 }
  0x34   : > { %1146 = vmatprep.mubr.bf16.mxu1 %v2216_v58 }
  0x35   : > { %2024 = vmatpush3.bf16.msra.mxu0 %v2206_v49 }
  0x36   : > { %2052 = vmatpush3.bf16.msra.mxu1 %v2208_v51  ;;  %2025 = vmatprep.subr.bf16.mxu0 %v2209_v52 }
  0x37   : > { %2053 = vmatprep.subr.bf16.mxu1 %v2211_v54 }
  0x39   : > { %2026 = vmatpush3.bf16.msra.mxu0 %v2210_v53 }
  0x3a   : > { %2054 = vmatpush3.bf16.msra.mxu1 %v2212_v55  ;;  %2027 = vmatprep.subr.bf16.mxu0 %v2213_v56 }
  0x3b   : > { %2055 = vmatprep.subr.bf16.mxu1 %v2221_v62 }
  0x3d   : > { %2028 = vmatpush3.bf16.msra.mxu0 %v2218_v59 }
  0x3e   : > { %2056 = vmatpush3.bf16.msra.mxu1 %v2222_v63  ;;  %2029 = vmatprep.subr.bf16.mxu0 %v2223_v0 }
  0x3f   : > { %2057 = vmatprep.subr.bf16.mxu1 %v2225_v2 }
  0x41   : > { %2030 = vmatpush3.bf16.msra.mxu0 %v2224_v1 }
  0x42   : > { %2058 = vmatpush3.bf16.msra.mxu1 %v2226_v3  ;;  %2031 = vmatprep.subr.bf16.mxu0 %v2227_v4 }
  0x43   : > { %2059 = vmatprep.subr.bf16.mxu1 %v2229_v6 }
  0x45   : > { %2032 = vmatpush3.bf16.msra.mxu0 %v2228_v5 }
  0x46   : > { %2060 = vmatpush3.bf16.msra.mxu1 %v2230_v7  ;;  %2073 = vmatprep.subr.bf16.mxu0 %v2231_v8 }
  0x47   : > { %2111 = vmatprep.subr.bf16.mxu1 %v2256_v30 }
  0x48   : > { %932 = vmatmul.mubr.bf16.vlgmr.msra.gmra.mrb[8].mxu0 %v2219_v60 }
  0x49   : > { %2074 = vmatpush3.bf16.msra.mxu0 %v2232_v9  ;;  %1147 = vmatmul.mubr.bf16.vlgmr.msra.gmra.mrb[8].mxu1 %v2220_v61 }
  0x4a   : > { %2075 = vmatprep.subr.bf16.mxu0 %v2233_v10  ;;  %939 = vmatprep.mubr.bf16.mxu0 %v2235_v12 }
  0x4b   : > { %1154 = vmatprep.mubr.bf16.mxu1 %v2239_v15  ;;  %2112 = vmatpush3.bf16.msra.mxu1 %v2256_v30 }
  0x4c   : > { %2113 = vmatprep.subr.bf16.mxu1 %v2257_v31 }
  0x4d   : > { %2076 = vmatpush3.bf16.msra.mxu0 %v2234_v11 }
  0x4e   : > { %2077 = vmatprep.subr.bf16.mxu0 %v2238_v14 }
  0x4f   : > { %2114 = vmatpush3.bf16.msra.mxu1 %v2257_v31 }
  0x50   : > { %940 = vmatmul.mubr.bf16.gmra.mrb[12].mxu0 %v2237_v13  ;;  %2115 = vmatprep.subr.bf16.mxu1 %v2258_v32 }
  0x51   : > { %2078 = vmatpush3.bf16.msra.mxu0 %v2241_v16  ;;  %1361 = vmatprep.mubr.bf16.mxu0 %v2235_v12 }
  0x52   : > { %1155 = vmatmul.mubr.bf16.gmra.mrb[12].mxu1 %v2242_v17  ;;  %2079 = vmatprep.subr.bf16.mxu0 %v2243_v18 }
  0x53   : > { %2116 = vmatpush3.bf16.msra.mxu1 %v2258_v32 }
  0x54   : > { %2117 = vmatprep.subr.bf16.mxu1 %v2259_v33 }
  0x55   : > { %2080 = vmatpush3.bf16.msra.mxu0 %v2244_v19 }
  0x56   : > { %2081 = vmatprep.subr.bf16.mxu0 %v2245_v20 }
  0x57   : > { %2118 = vmatpush3.bf16.msra.mxu1 %v2259_v33 }
  0x58   : > { %2119 = vmatprep.subr.bf16.mxu1 %v2260_v34 }
  0x59   : > { %2082 = vmatpush3.bf16.msra.mxu0 %v2246_v21 }
  0x5a   : > { %2083 = vmatprep.subr.bf16.mxu0 %v2247_v22 }
  0x5b   : > { %2120 = vmatpush3.bf16.msra.mxu1 %v2260_v34 }
  0x5c   : > { %2121 = vmatprep.subr.bf16.mxu1 %v2261_v35 }
  0x5d   : > { %2084 = vmatpush3.bf16.msra.mxu0 %v2248_v23 }
  0x5e   : > { %2085 = vmatprep.subr.bf16.mxu0 %v2249_v24 }
  0x5f   : > { %2122 = vmatpush3.bf16.msra.mxu1 %v2261_v35 }
  0x60   : > { %2123 = vmatprep.subr.bf16.mxu1 %v2262_v36 }
  0x61   : > { %2086 = vmatpush3.bf16.msra.mxu0 %v2250_v25 }
  0x62   : > { %2087 = vmatprep.subr.bf16.mxu0 %v2251_v26 }
  0x63   : > { %2124 = vmatpush3.bf16.msra.mxu1 %v2262_v36 }
  0x64   : > { %2125 = vmatprep.subr.bf16.mxu1 %v2263_v37 }
  0x65   : > { %2088 = vmatpush3.bf16.msra.mxu0 %v2252_v27 }
  0x67   : > { %2126 = vmatpush3.bf16.msra.mxu1 %v2263_v37 }
  0x68   : > { %1362 = vmatmul.mubr.bf16.vlgmr.msra.gmra.mrb[16].mxu0 %v2237_v13 }
  0x69   : > { %1369 = vmatprep.mubr.bf16.mxu0 %v2253_v28 }
  0x70   : > { %1370 = vmatmul.mubr.bf16.gmra.mrb[20].mxu0 %v2255_v29 }
  0xfb   : > { %v1977_v38 = vpop.f32.mrb[0].mxu0 }
  0xfc   : > { %v2005_v39 = vpop.f32.mrb[0].mxu1  ;;  %v1978_v40 = vpop.f32.mrb[1].mxu0 }
  0xfd   : > { %v1979_v41 = vadd.f32 %v1978_v40, %v1977_v38  ;;  %v2006_v42 = vpop.f32.mrb[1].mxu1  ;;  %v1980_v43 = vpop.f32.mrb[2].mxu0  ;;  %v1927_v38 = vld [vmem:[%s2666_s3] ss:$0 sm:$0xff] }
  0xfe   : > { %v2007_v44 = vadd.f32 %v2006_v42, %v2005_v39  ;;  %v2008_v45 = vpop.f32.mrb[2].mxu1  ;;  %v1981_v46 = vpop.f32.mrb[3].mxu0 }
  0xff   : > { %v1982_v47 = vadd.f32 %v1981_v46, %v1980_v43  ;;  %v2009_v48 = vpop.f32.mrb[3].mxu1 }
 0x100   : > { %v737_v49 = vadd.f32 %v2007_v44, %v1979_v41  ;;  %v2010_v50 = vadd.f32 %v2009_v48, %v2008_v45 }
 0x102   : > { %v738_v51 = vadd.f32 %v2010_v50, %v1982_v47 }
 0x103   : > { %v1983_v52 = vpop.f32.mrb[4].mxu0 }
 0x104   : > { %v2011_v53 = vpop.f32.mrb[4].mxu1  ;;  %v1984_v54 = vpop.f32.mrb[5].mxu0 }
 0x105   : > { %v2012_v55 = vpop.f32.mrb[5].mxu1  ;;  %v1985_v56 = vadd.f32 %v1984_v54, %v1983_v52  ;;  %v1986_v58 = vpop.f32.mrb[6].mxu0 }
 0x106   : > { %v2013_v57 = vadd.f32 %v2012_v55, %v2011_v53  ;;  %v2014_v59 = vpop.f32.mrb[6].mxu1  ;;  %v1987_v60 = vpop.f32.mrb[7].mxu0 }
 0x107   : > { %v2015_v61 = vpop.f32.mrb[7].mxu1  ;;  %v1988_v63 = vadd.f32 %v1987_v60, %v1986_v58 }
 0x108   : > { %v739_v62 = vadd.f32 %v2013_v57, %v1985_v56  ;;  %v2016_v0 = vadd.f32 %v2015_v61, %v2014_v59  ;;  %v1928_v61 = vld [vmem:[%s2668_s5] ss:$0 sm:$0xff] }
 0x10a   : > { %v740_v1 = vadd.f32 %v2016_v0, %v1988_v63 }
 0x11b   : > { %v2033_v2 = vpop.f32.mrb[8].mxu0 }
 0x11c   : > { %v2034_v3 = vpop.f32.mrb[9].mxu0  ;;  %v2061_v6 = vpop.f32.mrb[8].mxu1 }
 0x11d   : > { %v2035_v4 = vadd.f32 %v2034_v3, %v2033_v2  ;;  %v2036_v5 = vpop.f32.mrb[10].mxu0  ;;  %v2062_v8 = vpop.f32.mrb[9].mxu1 }
 0x11e   : > { %v2037_v7 = vpop.f32.mrb[11].mxu0  ;;  %v2063_v11 = vadd.f32 %v2062_v8, %v2061_v6  ;;  %v2064_v12 = vpop.f32.mrb[10].mxu1 }
 0x11f   : > { %v952_v9 = vadd.f32 %v2035_v4, %v737_v49  ;;  %v2038_v10 = vadd.f32 %v2037_v7, %v2036_v5  ;;  %v2065_v13 = vpop.f32.mrb[11].mxu1 }
 0x120   : > { %v2066_v16 = vadd.f32 %v2065_v13, %v2064_v12 }
 0x121   : > { %v953_v14 = vadd.f32 %v2038_v10, %v738_v51  ;;  %v1167_v15 = vadd.f32 %v2063_v11, %v952_v9 }
 0x123   : > { %v1168_v17 = vadd.f32 %v2066_v16, %v953_v14  ;;  %v2039_v18 = vpop.f32.mrb[12].mxu0 }
 0x124   : > { %v2040_v19 = vpop.f32.mrb[13].mxu0 }
 0x125   : > { %v2041_v20 = vadd.f32 %v2040_v19, %v2039_v18  ;;  %v2042_v21 = vpop.f32.mrb[14].mxu0  ;;  %v2067_v22 = vpop.f32.mrb[12].mxu1 }
 0x126   : > { %v2043_v23 = vpop.f32.mrb[15].mxu0  ;;  %v2068_v24 = vpop.f32.mrb[13].mxu1 }
 0x127   : > { %v954_v25 = vadd.f32 %v2041_v20, %v739_v62  ;;  %v2044_v26 = vadd.f32 %v2043_v23, %v2042_v21  ;;  %v2069_v27 = vadd.f32 %v2068_v24, %v2067_v22  ;;  %v2070_v28 = vpop.f32.mrb[14].mxu1 }
 0x128   : > { %v2071_v29 = vpop.f32.mrb[15].mxu1 }
 0x129   : > { %v955_v30 = vadd.f32 %v2044_v26, %v740_v1  ;;  %v1169_v31 = vadd.f32 %v2069_v27, %v954_v25  ;;  %v2072_v32 = vadd.f32 %v2071_v29, %v2070_v28 }
 0x12b   : > { %v1170_v33 = vadd.f32 %v2072_v32, %v955_v30 }
 0x13b   : > { %v2089_v34 = vpop.f32.mrb[16].mxu0 }
 0x13c   : > { %v2090_v35 = vpop.f32.mrb[17].mxu0 }
 0x13d   : > { %v2091_v36 = vadd.f32 %v2090_v35, %v2089_v34  ;;  %v2092_v37 = vpop.f32.mrb[18].mxu0 }
 0x13e   : > { %v2093_v39 = vpop.f32.mrb[19].mxu0 }
 0x13f   : > { %v1382_v40 = vadd.f32 %v2091_v36, %v1167_v15  ;;  %v2094_v41 = vadd.f32 %v2093_v39, %v2092_v37 }
 0x141   : > { %v1401_v42 = vadd.f32 %v1927_v38, %v1382_v40  ;;  %v1383_v43 = vadd.f32 %v2094_v41, %v1168_v17 }
 0x143   : > { %v1402_v44 = vadd.f32 %v1927_v38, %v1383_v43  ;;  %v2095_v45 = vpop.f32.mrb[20].mxu0  ;;  %v1405_v49 = vmul.f32 %v1401_v42, %v1401_v42 }
 0x144   : > { %v2096_v46 = vpop.f32.mrb[21].mxu0 }
 0x145   : > { %v2097_v47 = vadd.f32 %v2096_v46, %v2095_v45  ;;  %v2098_v48 = vpop.f32.mrb[22].mxu0  ;;  %v1406_v50 = vmul.f32 %v1402_v44, %v1402_v44 }
 0x146   : > { %v2099_v51 = vpop.f32.mrb[23].mxu0 }
 0x147   : > { %v1384_v52 = vadd.f32 %v2097_v47, %v1169_v31  ;;  %v2100_v53 = vadd.f32 %v2099_v51, %v2098_v48  ;;  %v1409_v54 = vpack.c.bf16 %v1406_v50, %v1405_v49 }
 0x149   : > { %v1403_v55 = vadd.f32 %v1927_v38, %v1384_v52  ;;  %v1385_v56 = vadd.f32 %v2100_v53, %v1170_v33  ;;  %2127 = vmatprep.mubr.bf16.mxu1 %v1409_v54 }
 0x14b   : > { %v1404_v57 = vadd.f32 %v1927_v38, %v1385_v56  ;;  %v1407_v58 = vmul.f32 %v1403_v55, %v1403_v55 }
 0x14d   : > { %v1408_v59 = vmul.f32 %v1404_v57, %v1404_v57 }
 0x14f   : > { %v1410_v60 = vpack.c.bf16 %v1408_v59, %v1407_v58 }
 0x151   : > { %2128 = vmatmul.mubr.bf16.vlgmr.msra.gmra.mrb[16].mxu1 %v1410_v60 }
 0x224   : > { %v2129_v62 = vpop.f32.mrb[16].mxu1 }
 0x225   : > { %v1525_v63 = vadd.f32 %v2129_v62, %v1928_v61  ;;  %v1516_v0 = vpop.f32.mrb[17].mxu1 }
 0x226   : > { %v1517_v1 = vadd.f32 %v1928_v61, %v1516_v0  ;;  %v2130_v2 = vpop.f32.mrb[18].mxu1 }
 0x227   : > { %2264 = vrsqrt.f32 %v1525_v63  ;;  %v1528_v3 = vadd.f32 %v2130_v2, %v1928_v61  ;;  %v1519_v4 = vpop.f32.mrb[19].mxu1 }
 0x228   : > { %2266 = vrsqrt.f32 %v1517_v1  ;;  %v1520_v5 = vadd.f32 %v1928_v61, %v1519_v4 }
 0x229   : > { %2268 = vrsqrt.f32 %v1528_v3 }
 0x22a   : > { %2270 = vrsqrt.f32 %v1520_v5 }
 0x231   : > { %v2265_v6 = vpop.eup %2264 }
 0x232   : > { %v2267_v7 = vpop.eup %2266  ;;  %v1537_v10 = vmul.f32 %v2265_v6, %v1403_v55 }
 0x233   : > { %v2269_v8 = vpop.eup %2268  ;;  %v1535_v12 = vmul.f32 %v2267_v7, %v1401_v42 }
 0x234   : > { %v2271_v9 = vpop.eup %2270  ;;  %v1538_v11 = vmul.f32 %v2269_v8, %v1404_v57 }
 0x235   : > { %v1536_v13 = vmul.f32 %v2271_v9, %v1402_v44 }
 0x236   : > { %v1958_v14 = vpack.c.bf16 %v1538_v11, %v1537_v10 }
 0x237   : > { %v1953_v15 = vpack.c.bf16 %v1536_v13, %v1535_v12 }
 0x238   : > { %1960 = vst [vmem:[%s323_s20 + $0x8] sm:$0xff] %v1958_v14  }
 0x239   : > { %1954 = vst [vmem:[%s323_s20] sm:$0xff] %v1953_v15  }
 0x23a PF: > { %s16_s23 = sadd.s32 1, %s2294_s23   ;;  %s2670_s21 = smov %s2290_s22 }
 0x23b   : > { %p13_p5 = scmp.ge.s32.totalorder %s16_s23, 4   ;;  %s2671_s22 = smov %s2673_s24 }
 0x23d   :  { %15 = sbr.rel (!%p13_p5) target bundleno = 2 (0x2), region = 84 }

// kernel: encoder_forward.7
= control target key start
LH: loop header
LB: loop body
LE: loop exit
PB: predicated region body
PF: predicated region fallthrough
CT: control target
= control target key end

     0   :  { %s1849_s15 = smov 0   ;;  %s1851_s16 = smov 0   ;;  %s2150_s0 = inlined_call_operand.vmem [shape: bf16[2,1,3,16,256], index: 0, kind: input, shape index: {}]   ;;  %s2151_s1 = inlined_call_operand.vmem [shape: bf16[2,1,3,16,256], index: 1, kind: input, shape index: {}]   ;;  %s2152_s2 = inlined_call_operand.vmem [shape: bf16[5,256,128], index: 2, kind: input, shape index: {}]   ;;  %s2153_s3 = inlined_call_operand.vmem [shape: f32[1,128], index: 3, kind: input, shape index: {}]   ;;  %s2154_s4 = inlined_call_operand.vmem [shape: f32[2,1,16,128], index: 4, kind: output, shape index: {}]  }
   0x1   :  { %s1853_s17 = smov 0  }
   0x2 LB: > { %s26_s18 = sadd.s32 1, %s1818_s16  ;;  %p1337_p0 = scmp.ge.s32.totalorder %s1822_s17, 1  ;;  %s1822_s17 = sphi %s1853_s17, %s14_s17   ;;  %s1818_s16 = sphi %s1851_s16, %s2156_s16   ;;  %s1814_s15 = sphi %s1849_s15, %s2155_s15  }
   0x3   : > { %p28_p1 = scmp.ge.s32.totalorder %s26_s18, 2  ;;  %p198_p2 = scmp.lt.s32.totalorder %s1822_s17, 3 }
   0x5   : > { %s2158_s18 = smov (%p28_p1, %s26_s18), 0  ;;  %p199_p3 = pnand %p1337_p0, %p198_p2 }
   0x6   : > { %v1705_v0 = vld [vmem:[%s2152_s2 + $0x40] sm:$0xff] (!%p199_p3)   ;;  %v1709_v4 = vld [vmem:[%s2152_s2 + $0x48] sm:$0xff] (!%p199_p3)   ;;  %v1713_v8 = vld [vmem:[%s2152_s2 + $0x50] sm:$0xff] (!%p199_p3)   ;;  %p241_p4 = scmp.lt.s32.totalorder (!%p199_p3), %s1814_s15, 1 }
   0x7   : > { %202 = sbr.rel (%p199_p3) target bundleno = 326 (0x146), region = 36  ;;  %v1706_v1 = vld [vmem:[%s2152_s2 + $0xc0] sm:$0xff] (!%p199_p3)   ;;  %1570 = vmatprep.subr.bf16.mxu0 (!%p199_p3), %v1705_v0  ;;  %v1710_v5 = vld [vmem:[%s2152_s2 + $0xc8] sm:$0xff] (!%p199_p3)   ;;  %v1714_v9 = vld [vmem:[%s2152_s2 + $0xd0] sm:$0xff] (!%p199_p3)  }
   0x8   : > { %v1707_v2 = vld [vmem:[%s2152_s2] sm:$0xff] (!%p199_p3)   ;;  %1592 = vmatprep.subr.bf16.mxu1 (!%p199_p3), %v1706_v1  ;;  %v1711_v6 = vld [vmem:[%s2152_s2 + $0x8] sm:$0xff] (!%p199_p3)   ;;  %v1715_v10 = vld [vmem:[%s2152_s2 + $0x10] sm:$0xff] (!%p199_p3)  }
   0x9   : > { %v1708_v3 = vld [vmem:[%s2152_s2 + $0x80] sm:$0xff] (!%p199_p3)   ;;  %1571 = vmatpush3.bf16.msra.mxu0 (!%p199_p3), %v1707_v2  ;;  %v1712_v7 = vld [vmem:[%s2152_s2 + $0x88] sm:$0xff] (!%p199_p3)   ;;  %v1716_v11 = vld [vmem:[%s2152_s2 + $0x90] sm:$0xff] (!%p199_p3)  }
   0xa   : > { %1593 = vmatpush3.bf16.msra.mxu1 (!%p199_p3), %v1708_v3  ;;  %1572 = vmatprep.subr.bf16.mxu0 (!%p199_p3), %v1709_v4  ;;  %v1717_v12 = vld [vmem:[%s2152_s2 + $0x58] sm:$0xff] (!%p199_p3)   ;;  %v1721_v16 = vld [vmem:[%s2152_s2 + $0x60] sm:$0xff] (!%p199_p3)   ;;  %v1725_v20 = vld [vmem:[%s2152_s2 + $0x68] sm:$0xff] (!%p199_p3)  }
   0xb   : > { %1594 = vmatprep.subr.bf16.mxu1 (!%p199_p3), %v1710_v5  ;;  %v1718_v13 = vld [vmem:[%s2152_s2 + $0xd8] sm:$0xff] (!%p199_p3)   ;;  %v1722_v17 = vld [vmem:[%s2152_s2 + $0xe0] sm:$0xff] (!%p199_p3)   ;;  %v1726_v21 = vld [vmem:[%s2152_s2 + $0xe8] sm:$0xff] (!%p199_p3)  }
   0xc   : > { %v1719_v14 = vld [vmem:[%s2152_s2 + $0x18] sm:$0xff] (!%p199_p3)   ;;  %v1723_v18 = vld [vmem:[%s2152_s2 + $0x20] sm:$0xff] (!%p199_p3)   ;;  %v1727_v22 = vld [vmem:[%s2152_s2 + $0x28] sm:$0xff] (!%p199_p3)  }
   0xd   : > { %1573 = vmatpush3.bf16.msra.mxu0 (!%p199_p3), %v1711_v6  ;;  %v1720_v15 = vld [vmem:[%s2152_s2 + $0x98] sm:$0xff] (!%p199_p3)   ;;  %v1724_v19 = vld [vmem:[%s2152_s2 + $0xa0] sm:$0xff] (!%p199_p3)   ;;  %v1728_v23 = vld [vmem:[%s2152_s2 + $0xa8] sm:$0xff] (!%p199_p3)  }
   0xe   : > { %1595 = vmatpush3.bf16.msra.mxu1 %v1712_v7  ;;  %1574 = vmatprep.subr.bf16.mxu0 %v1713_v8  ;;  %s2160_s15 = smov (!%p241_p4, %s1814_s15), 1  ;;  %v1729_v24 = vld [vmem:[%s2152_s2 + $0x70] sm:$0xff]   ;;  %v1733_v28 = vld [vmem:[%s2152_s2 + $0x78] sm:$0xff]   ;;  %v1743_v36 = vld [vmem:[%s2152_s2 + $0x140] sm:$0xff]  }
   0xf   : > { %1596 = vmatprep.subr.bf16.mxu1 %v1714_v9  ;;  %v1730_v25 = vld [vmem:[%s2152_s2 + $0xf0] sm:$0xff]   ;;  %s1680_s27 = smul.u32 48, %s2160_s15  ;;  %v1734_v29 = vld [vmem:[%s2152_s2 + $0xf8] sm:$0xff]   ;;  %v1744_v37 = vld [vmem:[%s2152_s2 + $0x100] sm:$0xff]  }
  0x10   : > { %v1731_v26 = vld [vmem:[%s2152_s2 + $0x30] sm:$0xff]   ;;  %v1735_v30 = vld [vmem:[%s2152_s2 + $0x38] sm:$0xff]   ;;  %v1745_v38 = vld [vmem:[%s2152_s2 + $0x1c0] sm:$0xff]  }
  0x11   : > { %1575 = vmatpush3.bf16.msra.mxu0 %v1715_v10  ;;  %v1732_v27 = vld [vmem:[%s2152_s2 + $0xb0] sm:$0xff]   ;;  %s1967_s12 = scalar_lea.vmem %s2150_s0, %s1680_s27  ;;  %v1736_v31 = vld [vmem:[%s2152_s2 + $0xb8] sm:$0xff]   ;;  %s1978_s23 = scalar_lea.vmem %s2151_s1, %s1680_s27  ;;  %v1746_v39 = vld [vmem:[%s2152_s2 + $0x180] sm:$0xff]  }
  0x12   : > { %1597 = vmatpush3.bf16.msra.mxu1 %v1716_v11  ;;  %1576 = vmatprep.subr.bf16.mxu0 %v1717_v12  ;;  %v1737_v32 = vld [vmem:[%s1967_s12] ss:$8 sps:$4 sm:$0xff]   ;;  %v1739_v33 = vld [vmem:[%s1967_s12 + $0x4] ss:$8 sps:$4 sm:$0xff]   ;;  %v1751_v44 = vld [vmem:[%s2152_s2 + $0x150] sm:$0xff]  }
  0x13   : > { %1598 = vmatprep.subr.bf16.mxu1 %v1718_v13  ;;  %v1740_v34 = vld [vmem:[%s1978_s23] ss:$8 sps:$4 sm:$0xff]   ;;  %v1742_v35 = vld [vmem:[%s1978_s23 + $0x4] ss:$8 sps:$4 sm:$0xff]   ;;  %441 = vmatprep.mubr.bf16.mxu0 %v1739_v33  ;;  %v1752_v45 = vld [vmem:[%s2152_s2 + $0x110] sm:$0xff]  }
  0x14   : > { %625 = vmatprep.mubr.bf16.mxu1 %v1742_v35  ;;  %v1747_v40 = vld [vmem:[%s2152_s2 + $0x148] sm:$0xff]   ;;  %v1753_v46 = vld [vmem:[%s2152_s2 + $0x1d0] sm:$0xff]   ;;  %v1755_v48 = vld [vmem:[%s2152_s2 + $0x158] sm:$0xff]  }
  0x15   : > { %1577 = vmatpush3.bf16.msra.mxu0 %v1719_v14  ;;  %v1748_v41 = vld [vmem:[%s2152_s2 + $0x108] sm:$0xff]   ;;  %v1754_v47 = vld [vmem:[%s2152_s2 + $0x190] sm:$0xff]   ;;  %v1756_v49 = vld [vmem:[%s2152_s2 + $0x118] sm:$0xff]  }
  0x16   : > { %1599 = vmatpush3.bf16.msra.mxu1 %v1720_v15  ;;  %1578 = vmatprep.subr.bf16.mxu0 %v1721_v16  ;;  %v1749_v42 = vld [vmem:[%s2152_s2 + $0x1c8] sm:$0xff]   ;;  %v1757_v50 = vld [vmem:[%s2152_s2 + $0x1d8] sm:$0xff]   ;;  %v1759_v52 = vld [vmem:[%s2152_s2 + $0x160] sm:$0xff]  }
  0x17   : > { %1600 = vmatprep.subr.bf16.mxu1 %v1722_v17  ;;  %v1750_v43 = vld [vmem:[%s2152_s2 + $0x188] sm:$0xff]   ;;  %v1758_v51 = vld [vmem:[%s2152_s2 + $0x198] sm:$0xff]   ;;  %v1760_v53 = vld [vmem:[%s2152_s2 + $0x120] sm:$0xff]  }
  0x18   : > { %v1761_v54 = vld [vmem:[%s2152_s2 + $0x1e0] sm:$0xff]   ;;  %v1763_v56 = vld [vmem:[%s2152_s2 + $0x168] sm:$0xff]   ;;  %v1767_v60 = vld [vmem:[%s2152_s2 + $0x170] sm:$0xff]  }
  0x19   : > { %1579 = vmatpush3.bf16.msra.mxu0 %v1723_v18  ;;  %v1762_v55 = vld [vmem:[%s2152_s2 + $0x1a0] sm:$0xff]   ;;  %v1764_v57 = vld [vmem:[%s2152_s2 + $0x128] sm:$0xff]   ;;  %v1768_v61 = vld [vmem:[%s2152_s2 + $0x130] sm:$0xff]  }
  0x1a   : > { %1601 = vmatpush3.bf16.msra.mxu1 %v1724_v19  ;;  %1580 = vmatprep.subr.bf16.mxu0 %v1725_v20  ;;  %v1765_v58 = vld [vmem:[%s2152_s2 + $0x1e8] sm:$0xff]   ;;  %v1769_v62 = vld [vmem:[%s2152_s2 + $0x1f0] sm:$0xff]   ;;  %v1771_v0 = vld [vmem:[%s2152_s2 + $0x178] sm:$0xff]  }
  0x1b   : > { %1602 = vmatprep.subr.bf16.mxu1 %v1726_v21  ;;  %v1766_v59 = vld [vmem:[%s2152_s2 + $0x1a8] sm:$0xff]   ;;  %v1770_v63 = vld [vmem:[%s2152_s2 + $0x1b0] sm:$0xff]   ;;  %v1772_v1 = vld [vmem:[%s2152_s2 + $0x138] sm:$0xff]  }
  0x1c   : > { %v1773_v2 = vld [vmem:[%s2152_s2 + $0x1f8] sm:$0xff]   ;;  %v1778_v6 = vld [vmem:[%s2152_s2 + $0x240] sm:$0xff]   ;;  %v1783_v10 = vld [vmem:[%s2152_s2 + $0x248] sm:$0xff]  }
  0x1d   : > { %1581 = vmatpush3.bf16.msra.mxu0 %v1727_v22  ;;  %v1774_v3 = vld [vmem:[%s1967_s12 + $0x10] ss:$8 sps:$4 sm:$0xff]   ;;  %v1776_v4 = vld [vmem:[%s1967_s12 + $0x14] ss:$8 sps:$4 sm:$0xff]   ;;  %v1782_v9 = vld [vmem:[%s2152_s2 + $0x200] sm:$0xff]  }
  0x1e   : > { %1603 = vmatpush3.bf16.msra.mxu1 %v1728_v23  ;;  %1582 = vmatprep.subr.bf16.mxu0 %v1729_v24  ;;  %v1777_v5 = vld [vmem:[%s2152_s2 + $0x1b8] sm:$0xff]   ;;  %v1784_v11 = vld [vmem:[%s2152_s2 + $0x208] sm:$0xff]   ;;  %v1785_v12 = vld [vmem:[%s2152_s2 + $0x250] sm:$0xff]  }
  0x1f   : > { %1604 = vmatprep.subr.bf16.mxu1 %v1730_v25  ;;  %v1779_v7 = vld [vmem:[%s1978_s23 + $0x10] ss:$8 sps:$4 sm:$0xff]   ;;  %v1781_v8 = vld [vmem:[%s1978_s23 + $0x14] ss:$8 sps:$4 sm:$0xff]   ;;  %v1789_v16 = vld [vmem:[%s2152_s2 + $0x260] sm:$0xff]  }
  0x20   : > { %v1786_v13 = vld [vmem:[%s2152_s2 + $0x210] sm:$0xff]   ;;  %v1787_v14 = vld [vmem:[%s2152_s2 + $0x258] sm:$0xff]   ;;  %v1790_v17 = vld [vmem:[%s2152_s2 + $0x220] sm:$0xff]  }
  0x21   : > { %1583 = vmatpush3.bf16.msra.mxu0 %v1731_v26  ;;  %v1788_v15 = vld [vmem:[%s2152_s2 + $0x218] sm:$0xff]   ;;  %v1791_v18 = vld [vmem:[%s2152_s2 + $0x268] sm:$0xff]   ;;  %v1793_v21 = vld [vmem:[%s2152_s2 + $0x270] sm:$0xff]  }
  0x22   : > { %1605 = vmatpush3.bf16.msra.mxu1 %v1732_v27  ;;  %1584 = vmatprep.subr.bf16.mxu0 %v1733_v28  ;;  %v1799_v19 = vld [vmem:[%s1967_s12 + $0x24] ss:$8 sps:$4 sm:$0xff]   ;;  %v1794_v22 = vld [vmem:[%s2152_s2 + $0x230] sm:$0xff]   ;;  %v1795_v23 = vld [vmem:[%s2152_s2 + $0x278] sm:$0xff]  }
  0x23   : > { %1606 = vmatprep.subr.bf16.mxu1 %v1734_v29  ;;  %v1792_v20 = vld [vmem:[%s2152_s2 + $0x228] sm:$0xff]   ;;  %v1796_v24 = vld [vmem:[%s2152_s2 + $0x238] sm:$0xff]  }
  0x24   : > { %v1797_v25 = vld [vmem:[%s1967_s12 + $0x20] ss:$8 sps:$4 sm:$0xff]   ;;  %s1569_s12 = sshll.u32 %s2160_s15, 4 }
  0x25   : > { %1585 = vmatpush3.bf16.msra.mxu0 %v1735_v30  ;;  %s267_s21 = scalar_lea.vmem %s2154_s4, %s1569_s12 }
  0x26   : > { %1607 = vmatpush3.bf16.msra.mxu1 %v1736_v31  ;;  %1614 = vmatprep.subr.bf16.mxu0 %v1743_v36 }
  0x27   : > { %1636 = vmatprep.subr.bf16.mxu1 %v1745_v38 }
  0x28   : > { %442 = vmatmul.mubr.bf16.vlgmr.msra.gmra.mrb[0].mxu0 %v1737_v32 }
  0x29   : > { %626 = vmatmul.mubr.bf16.vlgmr.msra.gmra.mrb[0].mxu1 %v1740_v34  ;;  %1615 = vmatpush3.bf16.msra.mxu0 %v1744_v37 }
  0x2a   : > { %1637 = vmatpush3.bf16.msra.mxu1 %v1746_v39  ;;  %1616 = vmatprep.subr.bf16.mxu0 %v1747_v40 }
  0x2b   : > { %1638 = vmatprep.subr.bf16.mxu1 %v1749_v42  ;;  %814 = vmatprep.mubr.bf16.mxu0 %v1776_v4 }
  0x2c   : > { %1003 = vmatprep.mubr.bf16.mxu1 %v1781_v8 }
  0x2d   : > { %1617 = vmatpush3.bf16.msra.mxu0 %v1748_v41 }
  0x2e   : > { %1639 = vmatpush3.bf16.msra.mxu1 %v1750_v43  ;;  %1618 = vmatprep.subr.bf16.mxu0 %v1751_v44 }
  0x2f   : > { %1640 = vmatprep.subr.bf16.mxu1 %v1753_v46 }
  0x31   : > { %1619 = vmatpush3.bf16.msra.mxu0 %v1752_v45 }
  0x32   : > { %1641 = vmatpush3.bf16.msra.mxu1 %v1754_v47  ;;  %1620 = vmatprep.subr.bf16.mxu0 %v1755_v48 }
  0x33   : > { %1642 = vmatprep.subr.bf16.mxu1 %v1757_v50 }
  0x35   : > { %1621 = vmatpush3.bf16.msra.mxu0 %v1756_v49 }
  0x36   : > { %1643 = vmatpush3.bf16.msra.mxu1 %v1758_v51  ;;  %1622 = vmatprep.subr.bf16.mxu0 %v1759_v52 }
  0x37   : > { %1644 = vmatprep.subr.bf16.mxu1 %v1761_v54 }
  0x39   : > { %1623 = vmatpush3.bf16.msra.mxu0 %v1760_v53 }
  0x3a   : > { %1645 = vmatpush3.bf16.msra.mxu1 %v1762_v55  ;;  %1624 = vmatprep.subr.bf16.mxu0 %v1763_v56 }
  0x3b   : > { %1646 = vmatprep.subr.bf16.mxu1 %v1765_v58 }
  0x3d   : > { %1625 = vmatpush3.bf16.msra.mxu0 %v1764_v57 }
  0x3e   : > { %1647 = vmatpush3.bf16.msra.mxu1 %v1766_v59  ;;  %1626 = vmatprep.subr.bf16.mxu0 %v1767_v60  ;;  %v1566_v60 = vld [vmem:[%s2153_s3] ss:$0 sm:$0xff] }
  0x3f   : > { %1648 = vmatprep.subr.bf16.mxu1 %v1769_v62 }
  0x41   : > { %1627 = vmatpush3.bf16.msra.mxu0 %v1768_v61 }
  0x42   : > { %1649 = vmatpush3.bf16.msra.mxu1 %v1770_v63  ;;  %1628 = vmatprep.subr.bf16.mxu0 %v1771_v0 }
  0x43   : > { %1650 = vmatprep.subr.bf16.mxu1 %v1773_v2 }
  0x45   : > { %1629 = vmatpush3.bf16.msra.mxu0 %v1772_v1 }
  0x46   : > { %1651 = vmatpush3.bf16.msra.mxu1 %v1777_v5  ;;  %1658 = vmatprep.subr.bf16.mxu0 %v1778_v6 }
  0x48   : > { %815 = vmatmul.mubr.bf16.vlgmr.msra.gmra.mrb[4].mxu0 %v1774_v3 }
  0x49   : > { %1659 = vmatpush3.bf16.msra.mxu0 %v1782_v9  ;;  %1004 = vmatmul.mubr.bf16.vlgmr.msra.gmra.mrb[4].mxu1 %v1779_v7 }
  0x4a   : > { %1660 = vmatprep.subr.bf16.mxu0 %v1783_v10  ;;  %1192 = vmatprep.mubr.bf16.mxu0 %v1799_v19 }
  0x4d   : > { %1661 = vmatpush3.bf16.msra.mxu0 %v1784_v11 }
  0x4e   : > { %1662 = vmatprep.subr.bf16.mxu0 %v1785_v12 }
  0x51   : > { %1663 = vmatpush3.bf16.msra.mxu0 %v1786_v13 }
  0x52   : > { %1664 = vmatprep.subr.bf16.mxu0 %v1787_v14 }
  0x55   : > { %1665 = vmatpush3.bf16.msra.mxu0 %v1788_v15 }
  0x56   : > { %1666 = vmatprep.subr.bf16.mxu0 %v1789_v16 }
  0x59   : > { %1667 = vmatpush3.bf16.msra.mxu0 %v1790_v17 }
  0x5a   : > { %1668 = vmatprep.subr.bf16.mxu0 %v1791_v18 }
  0x5d   : > { %1669 = vmatpush3.bf16.msra.mxu0 %v1792_v20 }
  0x5e   : > { %1670 = vmatprep.subr.bf16.mxu0 %v1793_v21 }
  0x61   : > { %1671 = vmatpush3.bf16.msra.mxu0 %v1794_v22 }
  0x62   : > { %1672 = vmatprep.subr.bf16.mxu0 %v1795_v23 }
  0x65   : > { %1673 = vmatpush3.bf16.msra.mxu0 %v1796_v24 }
  0x68   : > { %1193 = vmatmul.mubr.bf16.vlgmr.msra.gmra.mrb[8].mxu0 %v1797_v25 }
  0xfb   : > { %v1586_v26 = vpop.f32.mrb[0].mxu0 }
  0xfc   : > { %v1608_v27 = vpop.f32.mrb[0].mxu1  ;;  %v1587_v28 = vpop.f32.mrb[1].mxu0 }
  0xfd   : > { %v1588_v29 = vadd.f32 %v1587_v28, %v1586_v26  ;;  %v1609_v30 = vpop.f32.mrb[1].mxu1  ;;  %v1589_v31 = vpop.f32.mrb[2].mxu0 }
  0xfe   : > { %v1610_v32 = vadd.f32 %v1609_v30, %v1608_v27  ;;  %v1611_v33 = vpop.f32.mrb[2].mxu1  ;;  %v1590_v34 = vpop.f32.mrb[3].mxu0 }
  0xff   : > { %v1591_v35 = vadd.f32 %v1590_v34, %v1589_v31  ;;  %v1612_v36 = vpop.f32.mrb[3].mxu1 }
 0x100   : > { %v636_v37 = vadd.f32 %v1610_v32, %v1588_v29  ;;  %v1613_v38 = vadd.f32 %v1612_v36, %v1611_v33 }
 0x102   : > { %v637_v39 = vadd.f32 %v1613_v38, %v1591_v35 }
 0x11b   : > { %v1630_v40 = vpop.f32.mrb[4].mxu0 }
 0x11c   : > { %v1631_v41 = vpop.f32.mrb[5].mxu0  ;;  %v1652_v46 = vpop.f32.mrb[4].mxu1 }
 0x11d   : > { %v1632_v42 = vadd.f32 %v1631_v41, %v1630_v40  ;;  %v1633_v43 = vpop.f32.mrb[6].mxu0  ;;  %v1653_v48 = vpop.f32.mrb[5].mxu1 }
 0x11e   : > { %v1634_v44 = vpop.f32.mrb[7].mxu0  ;;  %v1654_v50 = vadd.f32 %v1653_v48, %v1652_v46  ;;  %v1655_v51 = vpop.f32.mrb[6].mxu1 }
 0x11f   : > { %v825_v45 = vadd.f32 %v1632_v42, %v636_v37  ;;  %v1635_v47 = vadd.f32 %v1634_v44, %v1633_v43  ;;  %v1656_v52 = vpop.f32.mrb[7].mxu1 }
 0x120   : > { %v1657_v54 = vadd.f32 %v1656_v52, %v1655_v51 }
 0x121   : > { %v826_v49 = vadd.f32 %v1635_v47, %v637_v39  ;;  %v1014_v53 = vadd.f32 %v1654_v50, %v825_v45 }
 0x123   : > { %v1015_v55 = vadd.f32 %v1657_v54, %v826_v49 }
 0x13b   : > { %v1674_v56 = vpop.f32.mrb[8].mxu0 }
 0x13c   : > { %v1675_v57 = vpop.f32.mrb[9].mxu0 }
 0x13d   : > { %v1676_v58 = vadd.f32 %v1675_v57, %v1674_v56  ;;  %v1677_v59 = vpop.f32.mrb[10].mxu0 }
 0x13e   : > { %v1678_v61 = vpop.f32.mrb[11].mxu0 }
 0x13f   : > { %v1203_v62 = vadd.f32 %v1676_v58, %v1014_v53  ;;  %v1679_v63 = vadd.f32 %v1678_v61, %v1677_v59 }
 0x141   : > { %v1216_v0 = vadd.f32 %v1566_v60, %v1203_v62  ;;  %v1204_v1 = vadd.f32 %v1679_v63, %v1015_v55 }
 0x143   : > { %1218 = vst [vmem:[%s267_s21] sm:$0xff] %v1216_v0  ;;  %v1217_v2 = vadd.f32 %v1566_v60, %v1204_v1 }
 0x145   : > { %1219 = vst [vmem:[%s267_s21 + $0x8] sm:$0xff] %v1217_v2 }
 0x146 PF: > { %s14_s17 = sadd.s32 1, %s1822_s17   ;;  %s2155_s15 = smov %s1818_s16 }
 0x147   : > { %p11_p5 = scmp.ge.s32.totalorder %s14_s17, 4   ;;  %s2156_s16 = smov %s2158_s18 }
 0x149   :  { %13 = sbr.rel (!%p11_p5) target bundleno = 2 (0x2), region = 76 }

</bundles_post_ra>
